<compile_context>
chip_gen: v7x
topology: tpu7x:2x2x1
jax: 0.10.0
libtpu: 0.0.40
codegen_flags: <defaults>
</compile_context>

<pallas_src>
import functools

import jax
import jax.numpy as jnp
from jax import lax
from jax.experimental import pallas as pl
from jax.experimental.pallas import tpu as pltpu  # noqa: F401  (TPU backend assumed)

LN_EPS = 1e-5  # torch.nn.LayerNorm default eps


def _round_up(n, m):
    return -(-n // m) * m


# ----------------------------- fused Pallas kernel ---------------------------


def wconv2_fused_kernel(small_ref, w1_ref, w2_ref, p_ref, out_ref, *,
                        feat_dim, out_c, ckk, blk, inv_in_c):
    # Layouts:
    #   small (8, Ws): row 0 = features, row 1 = b1, row 2 = b2 (block-padded),
    #                  row 3 = gamma (zero-padded to blk), row 4 = beta.
    #   w1 (F, 256); w2 (256, outC*blk) with each outC block padded to blk lanes;
    #   p (CKK, PW) im2col patches, PW multiple of 128;
    #   out (outC, PW)  -- lane axis = padded N*Ho*Wo (lane-dense stores).
    hid = w1_ref.shape[1]

    feat = small_ref[0:1, :feat_dim].astype(jnp.float32)            # (1, F)
    b1 = small_ref[1:2, :hid]                                       # (1, 256)
    b2 = small_ref[2:3, :out_c * blk]                                # (1, outC*blk)
    g = small_ref[3:4, :blk]                                         # (1, blk)
    beta = small_ref[4:5, :blk]                                      # (1, blk)

    # --- Fea2Weight MLP: one dot per layer (kept in f32, HIGHEST precision) ---
    h = jnp.dot(feat, w1_ref[...], preferred_element_type=jnp.float32,
                precision=lax.Precision.HIGHEST) + b1
    h = jnp.maximum(h, 0.0)                                          # ReLU (1, 256)
    wflat = jnp.dot(h, w2_ref[...], preferred_element_type=jnp.float32,
                    precision=lax.Precision.HIGHEST) + b2            # (1, outC*blk)

    # view(outC, CKK): lane-aligned 128-wide slices + axis-0 concat.
    rows = [wflat[:, o * blk:(o + 1) * blk] for o in range(out_c)]
    w = jnp.concatenate(rows, axis=0)                                # (outC, blk)

    # --- LayerNorm over (inC,K,K) per output channel, then / inC ---
    # Padded lanes of w are exactly zero (padded w2/b2 columns are zero), so
    # the sum over blk lanes equals the sum over the ckk valid lanes.
    lane = lax.broadcasted_iota(jnp.int32, (out_c, blk), 1)
    inv_ckk = 1.0 / float(ckk)
    mean = jnp.sum(w, axis=-1, keepdims=True) * inv_ckk
    d = jnp.where(lane < ckk, w - mean, 0.0)
    var = jnp.sum(d * d, axis=-1, keepdims=True) * inv_ckk
    wn = d * lax.rsqrt(var + LN_EPS)
    wn = (wn * g + beta) * inv_in_c                                  # (outC, blk)

    # --- conv as ONE weight-stationary matmul over all batches/pixels ---
    # (outC, CKK) @ (CKK, PW) -> (outC, PW); PW is a multiple of 128 so the
    # store is lane-dense (no masked vst).
    out_ref[...] = jnp.dot(wn[:, :ckk], p_ref[...],
                           preferred_element_type=jnp.float32,
                           precision=lax.Precision.HIGHEST).astype(out_ref.dtype)


# ------------------------------ JAX wrapper ----------------------------------


def wconv2_forward(x, features, params, *, in_c, out_c, kernel_size, padding=0):
    """Pallas implementation of Wconv2.forward(input, features)."""
    if features.ndim == 1:
        features = features[None, :]
    if features.shape[0] != 1:
        raise Exception("1!=features.size(0)")
    # TODO(synk): .to(device)/get_device() have no JAX equivalent; placement is
    # handled by the default TPU backend.

    K = kernel_size
    ckk = in_c * K * K
    blk = _round_up(ckk, 128)            # per-outC lane-aligned block width
    feat_dim = features.shape[1]
    hid = params["w1"].shape[1]          # 256 in the reference module

    if padding:
        x = jnp.pad(x, ((0, 0), (0, 0), (padding, padding), (padding, padding)))
    N, C, H, W = x.shape
    Ho, Wo = H - K + 1, W - K + 1
    npix = N * Ho * Wo
    pw = _round_up(npix, 128)            # lane-dense output width

    # im2col -> (CKK, N*Ho*Wo), zero lane-padded to PW.  Host-side XLA layout
    # ops; fused under jit.
    # TODO(synk): at scale, build the K*K taps in-kernel from a VMEM-resident
    # x tile instead of materializing this 9x-amplified patch matrix in HBM.
    cols = [lax.slice(x, (0, 0, ki, kj), (N, C, ki + Ho, kj + Wo))
            for ki in range(K) for kj in range(K)]             # each (N,C,Ho,Wo)
    patches = (jnp.stack(cols, axis=2)                          # (N,C,K*K,Ho,Wo)
               .transpose(1, 2, 0, 3, 4)                        # (C,K*K,N,Ho,Wo)
               .reshape(ckk, npix))
    patches = jnp.pad(patches, ((0, 0), (0, pw - npix))).astype(jnp.float32)

    # Parameter plumbing.  PyTorch's natural flatten order (o, c, ki, kj)
    # matches the patch-row order; each per-outC column block of w2/b2 is
    # zero-padded out to `blk` lanes so kernel slices are lane-aligned.
    w1 = params["w1"].astype(jnp.float32)                       # (F, 256)
    w2 = params["w2"].astype(jnp.float32)                       # (256, outC*CKK)
    w2p = jnp.pad(w2.reshape(hid, out_c, ckk),
                  ((0, 0), (0, 0), (0, blk - ckk))).reshape(hid, out_c * blk)
    b2p = jnp.pad(params["b2"].astype(jnp.float32).reshape(out_c, ckk),
                  ((0, 0), (0, blk - ckk))).reshape(out_c * blk)

    # Pack all the small vectors into ONE VMEM buffer (fewer tiny DMAs).
    w_small = max(hid, out_c * blk, _round_up(feat_dim, 128))
    small = jnp.zeros((8, w_small), jnp.float32)
    small = small.at[0, :feat_dim].set(features[0].astype(jnp.float32))
    small = small.at[1, :hid].set(params["b1"].astype(jnp.float32))
    small = small.at[2, :out_c * blk].set(b2p)
    small = small.at[3, :ckk].set(params["gamma"].astype(jnp.float32).reshape(ckk))
    small = small.at[4, :ckk].set(params["beta"].astype(jnp.float32).reshape(ckk))

    # Whole problem fits in VMEM at this size -> single full-array invocation.
    fused = pl.pallas_call(
        functools.partial(wconv2_fused_kernel, feat_dim=feat_dim, out_c=out_c,
                          ckk=ckk, blk=blk, inv_in_c=1.0 / float(in_c)),
        out_shape=jax.ShapeDtypeStruct((out_c, pw), jnp.float32),
    )
    out = fused(small, w1, w2p, patches)                        # (outC, PW)
    out = out[:, :npix].reshape(out_c, N, Ho, Wo).transpose(1, 0, 2, 3)
    return out.astype(x.dtype)                                  # (N, outC, Ho, Wo)


# ---------------------------- pure-JAX reference ------------------------------


def reference_forward(x, features, params, *, in_c, out_c, kernel_size, padding=0):
    if features.ndim == 1:
        features = features[None, :]
    K = kernel_size
    h = jnp.maximum(
        jnp.dot(features, params["w1"], precision=lax.Precision.HIGHEST)
        + params["b1"], 0.0)
    wflat = jnp.dot(h, params["w2"], precision=lax.Precision.HIGHEST) + params["b2"]
    w = wflat.reshape(out_c, in_c, K, K)
    mean = w.mean(axis=(1, 2, 3), keepdims=True)
    var = ((w - mean) ** 2).mean(axis=(1, 2, 3), keepdims=True)
    wn = (w - mean) / jnp.sqrt(var + LN_EPS)
    wn = wn * params["gamma"][None] + params["beta"][None]
    wn = wn / in_c
    return lax.conv_general_dilated(
        x, wn, window_strides=(1, 1),
        padding=[(padding, padding), (padding, padding)],
        dimension_numbers=("NCHW", "OIHW", "NCHW"),
        precision=lax.Precision.HIGHEST)


# ---------------------------------- main --------------------------------------


if __name__ == "__main__":
    feature_num = 8
    in_c, out_c, K = 4, 3, 3
    N, H, W = 2, 16, 16
    padding = 0

    key = jax.random.PRNGKey(0)
    ks = jax.random.split(key, 8)
    params = {
        "w1": 0.10 * jax.random.normal(ks[0], (feature_num, 256), jnp.float32),
        "b1": 0.10 * jax.random.normal(ks[1], (256,), jnp.float32),
        "w2": 0.05 * jax.random.normal(ks[2], (256, K * K * in_c * out_c), jnp.float32),
        "b2": 0.05 * jax.random.normal(ks[3], (K * K * in_c * out_c,), jnp.float32),
        "gamma": 1.0 + 0.1 * jax.random.normal(ks[4], (in_c, K, K), jnp.float32),
        "beta": 0.1 * jax.random.normal(ks[5], (in_c, K, K), jnp.float32),
    }
    x = jax.random.normal(ks[6], (N, in_c, H, W), jnp.float32)
    features = jax.random.normal(ks[7], (1, feature_num), jnp.float32)

    fwd = jax.jit(functools.partial(wconv2_forward, in_c=in_c, out_c=out_c,
                                    kernel_size=K, padding=padding))
    out = jax.block_until_ready(fwd(x, features, params))

    ref = reference_forward(x, features, params, in_c=in_c, out_c=out_c,
                            kernel_size=K, padding=padding)
    assert out.shape == (N, out_c, H - K + 1, W - K + 1), out.shape
    assert jnp.allclose(out, ref, atol=1e-3, rtol=1e-3), float(jnp.max(jnp.abs(out - ref)))
    print("KERNEL_OK")
</pallas_src>

<mosaic_0001>
module attributes {stable_mosaic.version = 11 : i64} {
  func.func @wconv2_fused_kernel(%arg0: memref<8x384xf32, #tpu.memory_space<vmem>>, %arg1: memref<8x256xf32, #tpu.memory_space<vmem>>, %arg2: memref<256x384xf32, #tpu.memory_space<vmem>>, %arg3: memref<36x512xf32, #tpu.memory_space<vmem>>, %arg4: memref<3x512xf32, #tpu.memory_space<vmem>>) attributes {dimension_semantics = [], scalar_prefetch = 0 : i64, scratch_operands = 0 : i64, tpu.core_type = #tpu.core_type<tc>} {
    %c0 = arith.constant 0 : index
    %c0_0 = arith.constant 0 : index
    %0 = vector.load %arg0[%c0, %c0_0] : memref<8x384xf32, #tpu.memory_space<vmem>>, vector<1x8xf32>
    %c1 = arith.constant 1 : index
    %c0_1 = arith.constant 0 : index
    %1 = vector.load %arg0[%c1, %c0_1] : memref<8x384xf32, #tpu.memory_space<vmem>>, vector<1x256xf32>
    %c2 = arith.constant 2 : index
    %c0_2 = arith.constant 0 : index
    %2 = vector.load %arg0[%c2, %c0_2] : memref<8x384xf32, #tpu.memory_space<vmem>>, vector<1x384xf32>
    %c3 = arith.constant 3 : index
    %c0_3 = arith.constant 0 : index
    %3 = vector.load %arg0[%c3, %c0_3] : memref<8x384xf32, #tpu.memory_space<vmem>>, vector<1x128xf32>
    %c4 = arith.constant 4 : index
    %c0_4 = arith.constant 0 : index
    %4 = vector.load %arg0[%c4, %c0_4] : memref<8x384xf32, #tpu.memory_space<vmem>>, vector<1x128xf32>
    %c0_5 = arith.constant 0 : index
    %c0_6 = arith.constant 0 : index
    %5 = vector.load %arg1[%c0_5, %c0_6] : memref<8x256xf32, #tpu.memory_space<vmem>>, vector<8x256xf32>
    %cst = arith.constant dense<0.000000e+00> : vector<1x256xf32>
    %6 = tpu.matmul %0, %5, %cst {dimension_numbers = #tpu.dot_dimension_numbers<[1], [0], [0], [1], [0, 0, 1, 1], [], []>, precision = #tpu.contract_precision<fp32>} : vector<1x8xf32>, vector<8x256xf32>, vector<1x256xf32> -> vector<1x256xf32>
    %7 = arith.addf %6, %1 : vector<1x256xf32>
    %cst_7 = arith.constant 0.000000e+00 : f32
    %8 = vector.broadcast %cst_7 : f32 to vector<1x256xf32>
    %9 = arith.maximumf %7, %8 : vector<1x256xf32>
    %c0_8 = arith.constant 0 : index
    %c0_9 = arith.constant 0 : index
    %10 = vector.load %arg2[%c0_8, %c0_9] : memref<256x384xf32, #tpu.memory_space<vmem>>, vector<256x384xf32>
    %cst_10 = arith.constant dense<0.000000e+00> : vector<1x384xf32>
    %11 = tpu.matmul %9, %10, %cst_10 {dimension_numbers = #tpu.dot_dimension_numbers<[1], [0], [0], [1], [0, 0, 1, 1], [], []>, precision = #tpu.contract_precision<fp32>} : vector<1x256xf32>, vector<256x384xf32>, vector<1x384xf32> -> vector<1x384xf32>
    %12 = arith.addf %11, %2 : vector<1x384xf32>
    %13 = vector.extract_strided_slice %12 {offsets = [0, 0], sizes = [1, 128], strides = [1, 1]} : vector<1x384xf32> to vector<1x128xf32>
    %14 = vector.extract_strided_slice %12 {offsets = [0, 128], sizes = [1, 128], strides = [1, 1]} : vector<1x384xf32> to vector<1x128xf32>
    %15 = vector.extract_strided_slice %12 {offsets = [0, 256], sizes = [1, 128], strides = [1, 1]} : vector<1x384xf32> to vector<1x128xf32>
    %16 = tpu.concatenate %13, %14, %15 in 0 : vector<1x128xf32>, vector<1x128xf32>, vector<1x128xf32> -> vector<3x128xf32>
    %17 = tpu.iota {dimensions = array<i32: 1>} : vector<3x128xi32>
    %cst_11 = arith.constant dense<0.000000e+00> : vector<3xf32>
    %18 = vector.multi_reduction <add>, %16, %cst_11 [1] : vector<3x128xf32> to vector<3xf32>
    %19 = vector.shape_cast %18 : vector<3xf32> to vector<3x1xf32>
    %cst_12 = arith.constant 0.027777778 : f32
    %20 = vector.broadcast %cst_12 : f32 to vector<3x1xf32>
    %21 = arith.mulf %19, %20 : vector<3x1xf32>
    %c36_i32 = arith.constant 36 : i32
    %22 = vector.broadcast %c36_i32 : i32 to vector<3x128xi32>
    %23 = arith.cmpi slt, %17, %22 : vector<3x128xi32>
    %24 = vector.broadcast %21 : vector<3x1xf32> to vector<3x128xf32>
    %25 = arith.subf %16, %24 : vector<3x128xf32>
    %cst_13 = arith.constant 0.000000e+00 : f32
    %26 = vector.broadcast %cst_13 : f32 to vector<3x128xf32>
    %27 = arith.select %23, %25, %26 : vector<3x128xi1>, vector<3x128xf32>
    %28 = arith.mulf %27, %27 : vector<3x128xf32>
    %cst_14 = arith.constant dense<0.000000e+00> : vector<3xf32>
    %29 = vector.multi_reduction <add>, %28, %cst_14 [1] : vector<3x128xf32> to vector<3xf32>
    %30 = vector.shape_cast %29 : vector<3xf32> to vector<3x1xf32>
    %cst_15 = arith.constant 0.027777778 : f32
    %31 = vector.broadcast %cst_15 : f32 to vector<3x1xf32>
    %32 = arith.mulf %30, %31 : vector<3x1xf32>
    %cst_16 = arith.constant 9.99999974E-6 : f32
    %33 = vector.broadcast %cst_16 : f32 to vector<3x1xf32>
    %34 = arith.addf %32, %33 : vector<3x1xf32>
    %35 = math.rsqrt %34 : vector<3x1xf32>
    %36 = vector.broadcast %35 : vector<3x1xf32> to vector<3x128xf32>
    %37 = arith.mulf %27, %36 : vector<3x128xf32>
    %38 = vector.broadcast %3 : vector<1x128xf32> to vector<3x128xf32>
    %39 = arith.mulf %37, %38 : vector<3x128xf32>
    %40 = vector.broadcast %4 : vector<1x128xf32> to vector<3x128xf32>
    %41 = arith.addf %39, %40 : vector<3x128xf32>
    %cst_17 = arith.constant 2.500000e-01 : f32
    %42 = vector.broadcast %cst_17 : f32 to vector<3x128xf32>
    %43 = arith.mulf %41, %42 : vector<3x128xf32>
    %44 = vector.extract_strided_slice %43 {offsets = [0, 0], sizes = [3, 36], strides = [1, 1]} : vector<3x128xf32> to vector<3x36xf32>
    %c0_18 = arith.constant 0 : index
    %c0_19 = arith.constant 0 : index
    %45 = vector.load %arg3[%c0_18, %c0_19] : memref<36x512xf32, #tpu.memory_space<vmem>>, vector<36x512xf32>
    %cst_20 = arith.constant dense<0.000000e+00> : vector<3x512xf32>
    %46 = tpu.matmul %44, %45, %cst_20 {dimension_numbers = #tpu.dot_dimension_numbers<[1], [0], [0], [1], [0, 0, 1, 1], [], []>, precision = #tpu.contract_precision<fp32>} : vector<3x36xf32>, vector<36x512xf32>, vector<3x512xf32> -> vector<3x512xf32>
    %c0_21 = arith.constant 0 : index
    %c0_22 = arith.constant 0 : index
    %47 = vector.load %arg4[%c0_21, %c0_22] : memref<3x512xf32, #tpu.memory_space<vmem>>, vector<3x512xf32>
    tpu.vector_store %arg4[%c0_21, %c0_22], %46 {strides = array<i32>} : memref<3x512xf32, #tpu.memory_space<vmem>>, vector<3x512xf32>,
    return
  }
}

</mosaic_0001>

<bundles_post_ra>
// kernel: wconv2_forward.1
= control target key start
LH: loop header
LB: loop body
LE: loop exit
PB: predicated region body
PF: predicated region fallthrough
CT: control target
= control target key end

     0   :  { %vm37_vm0 = vcmask 64512   ;;  %v7124_v2 = vmov 0.0   ;;  %vm2772_vm1 = vcmask 1040384   ;;  %vm2774_vm2 = vcmask 1041408   ;;  %s7116_s1 = inlined_call_operand.vmem [shape: f32[8,256], index: 1, kind: input, shape index: {}]   ;;  %s7117_s0 = inlined_call_operand.vmem [shape: f32[8,384], index: 0, kind: input, shape index: {}]   ;;  %s7118_s2 = inlined_call_operand.vmem [shape: f32[256,384], index: 2, kind: input, shape index: {}]   ;;  %s7119_s3 = inlined_call_operand.vmem [shape: f32[36,512], index: 3, kind: input, shape index: {}]   ;;  %s7120_s4 = inlined_call_operand.vmem [shape: f32[3,512], index: 4, kind: output, shape index: {}]  }
   0x1   :  { %v25_v0 = vld [vmem:[%s7116_s1 + $0x8] sm:$0xff]  ;;  %v24_v1 = vld [vmem:[%s7116_s1] sm:$0xff]  ;;  %107 = vmatprep.mubr.f32.mxu0 %v7124_v2  ;;  %v511_v13 = vld [vmem:[%s7118_s2 + $0x18] sm:$0xff]  ;;  %vm2778_vm3 = vcmask 1042432   ;;  %vm2821_vm5 = vcmask 1043456   ;;  %vm2817_vm6 = vcmask 293888  }
   0x2   :  { %v17_v3 = vld [vmem:[%s7117_s0] ss:$0 sm:$0xff]  ;;  %v4953_v4 = vand.u32 4294901760, %v25_v0  ;;  %v4955_v5 = vand.u32 4294901760, %v24_v1  ;;  %v509_v7 = vld [vmem:[%s7118_s2 + $0x8] sm:$0xff]  ;;  %v515_v15 = vld [vmem:[%s7118_s2 + $0x38] sm:$0xff] }
   0x3   :  { %v39_v6 = vsel %vm37_vm0, %v17_v3, 0  ;;  %v512_v8 = vld [vmem:[%s7118_s2 + $0x20] sm:$0xff]  ;;  %v620_v11 = vand.u32 4294901760, %v509_v7  ;;  %v626_v18 = vand.u32 4294901760, %v511_v13  ;;  %v518_v19 = vld [vmem:[%s7118_s2 + $0x50] sm:$0xff]  ;;  %v628_v20 = vand.u32 4294901760, %v515_v15 }
   0x4   :  { %v508_v9 = vld [vmem:[%s7118_s2] sm:$0xff]  ;;  %v4966_v10 = vand.u32 4294901760, %v39_v6  ;;  %v624_v12 = vand.u32 4294901760, %v512_v8  ;;  %42 = vmatprep.subr.mxu0 %v4953_v4  ;;  %v4976_v16 = vsub.f32 %v24_v1, %v4955_v5  ;;  %v4979_v17 = vsub.f32 %v25_v0, %v4953_v4  ;;  %v514_v25 = vld [vmem:[%s7118_s2 + $0x30] sm:$0xff]  ;;  %v517_v26 = vld [vmem:[%s7118_s2 + $0x48] sm:$0xff] }
   0x5   :  { %v622_v14 = vand.u32 4294901760, %v508_v9  ;;  %44 = vmatpush1.msra.mxu0 %v4955_v5  ;;  %v4990_v23 = vsub.f32 %v509_v7, %v620_v11  ;;  %v521_v31 = vld [vmem:[%s7118_s2 + $0x68] sm:$0xff]  ;;  %v5011_v33 = vsub.f32 %v511_v13, %v626_v18  ;;  %v632_v34 = vand.u32 4294901760, %v518_v19  ;;  %v524_v40 = vld [vmem:[%s7118_s2 + $0x80] sm:$0xff]  ;;  %v523_v46 = vld [vmem:[%s7118_s2 + $0x78] sm:$0xff] }
   0x6   :  { %v4986_v21 = vsub.f32 %v39_v6, %v4966_v10  ;;  %v4988_v22 = vpack.c.bf16 %v624_v12, %v620_v11  ;;  %v4992_v24 = vsub.f32 %v512_v8, %v624_v12  ;;  %v7123_v27 = vand.u32 4294901760, %v4979_v17  ;;  %v520_v41 = vld [vmem:[%s7118_s2 + $0x60] sm:$0xff]  ;;  %v527_v47 = vld [vmem:[%s7118_s2 + $0x98] sm:$0xff]  ;;  %v530_v48 = vld [vmem:[%s7118_s2 + $0xb0] sm:$0xff] }
   0x7   :  { %7513 = vst [vmem:[#allocation3_spill] sm:$0xff] %v4990_v23  ;;  %v7121_v28 = vand.u32 4294901760, %v4976_v16  ;;  %v5002_v29 = vpack.c.bf16 %v626_v18, %v622_v14  ;;  %v5004_v30 = vsub.f32 %v508_v9, %v622_v14  ;;  %7517 = vst [vmem:[#allocation7_spill] sm:$0xff] %v5011_v33  ;;  %v5013_v35 = vsub.f32 %v515_v15, %v628_v20  ;;  %v526_v53 = vld [vmem:[%s7118_s2 + $0x90] sm:$0xff]  ;;  %v529_v54 = vld [vmem:[%s7118_s2 + $0xa8] sm:$0xff] }
   0x8   :  { %7512 = vst [vmem:[#allocation2_spill] sm:$0xff] %v4988_v22  ;;  %7514 = vst [vmem:[#allocation4_spill] sm:$0xff] %v4992_v24  ;;  %v7122_v32 = vand.u32 4294901760, %v4986_v21  ;;  %4199 = vmatprep.subr.bf16.mxu1 %v4988_v22  ;;  %v122_v36 = vsub.f32 %v4979_v17, %v7123_v27  ;;  %v630_v38 = vand.u32 4294901760, %v514_v25  ;;  %v634_v39 = vand.u32 4294901760, %v517_v26  ;;  %v533_v59 = vld [vmem:[%s7118_s2 + $0xc8] sm:$0xff] }
   0x9   :  { %7515 = vst [vmem:[#allocation5_spill] sm:$0xff] %v5002_v29  ;;  %7516 = vst [vmem:[#allocation6_spill] sm:$0xff] %v5004_v30  ;;  %v128_v37 = vsub.f32 %v4976_v16, %v7121_v28  ;;  %4201 = vmatpush1.bf16.msra.mxu1 %v5002_v29  ;;  %v5031_v43 = vpack.c.bf16 %v632_v34, %v628_v20  ;;  %v5033_v44 = vsub.f32 %v518_v19, %v632_v34  ;;  %v536_v0 = vld [vmem:[%s7118_s2 + $0xe0] sm:$0xff]  ;;  %v535_v14 = vld [vmem:[%s7118_s2 + $0xd8] sm:$0xff] }
   0xa   :  { %7518 = vst [vmem:[#allocation8_spill] sm:$0xff] %v5013_v35  ;;  %v111_v42 = vsub.f32 %v4986_v21, %v7122_v32  ;;  %v636_v45 = vand.u32 4294901760, %v521_v31  ;;  %v123_v49 = vand.u32 4294901760, %v122_v36  ;;  %v5044_v51 = vpack.c.bf16 %v634_v39, %v630_v38  ;;  %v532_v13 = vld [vmem:[%s7118_s2 + $0xc0] sm:$0xff]  ;;  %v5179_v32 = vld [vmem:[%s7118_s2 + $0x190] sm:$0xff] }
   0xb   :  { %7519 = vst [vmem:[#allocation9_spill] sm:$0xff] %v5031_v43  ;;  %7520 = vst [vmem:[#allocation10_spill] sm:$0xff] %v5033_v44  ;;  %v129_v50 = vand.u32 4294901760, %v128_v37  ;;  %v5046_v52 = vsub.f32 %v514_v25, %v630_v38  ;;  %4203 = vmatprep.subr.bf16.mxu1 %v5031_v43  ;;  %v5055_v56 = vsub.f32 %v517_v26, %v634_v39  ;;  %v640_v57 = vand.u32 4294901760, %v524_v40  ;;  %v539_v25 = vld [vmem:[%s7118_s2 + $0xf8] sm:$0xff]  ;;  %v542_v26 = vld [vmem:[%s7118_s2 + $0x110] sm:$0xff] }
   0xc   :  { %7521 = vst [vmem:[#allocation11_spill] sm:$0xff] %v5044_v51  ;;  %v112_v55 = vand.u32 4294901760, %v111_v42  ;;  %v5057_v58 = vsub.f32 %v521_v31, %v636_v45  ;;  %124 = vmatprep.subr.mxu0 %v123_v49  ;;  %v638_v60 = vand.u32 4294901760, %v520_v41  ;;  %v642_v61 = vand.u32 4294901760, %v523_v46  ;;  %v538_v31 = vld [vmem:[%s7118_s2 + $0xf0] sm:$0xff]  ;;  %v541_v39 = vld [vmem:[%s7118_s2 + $0x108] sm:$0xff] }
   0xd   :  { %7522 = vst [vmem:[#allocation12_spill] sm:$0xff] %v5046_v52  ;;  %7523 = vst [vmem:[#allocation13_spill] sm:$0xff] %v5055_v56  ;;  %4205 = vmatpush1.bf16.msra.mxu1 %v5044_v51  ;;  %v644_v62 = vand.u32 4294901760, %v527_v47  ;;  %v648_v63 = vand.u32 4294901760, %v530_v48  ;;  %v5066_v1 = vpack.c.bf16 %v640_v57, %v636_v45  ;;  %v5068_v3 = vsub.f32 %v524_v40, %v640_v57  ;;  %v545_v40 = vld [vmem:[%s7118_s2 + $0x128] sm:$0xff]  ;;  %v560_v28 = vld [vmem:[%s7118_s2 + $0x1a0] sm:$0xff] }
   0xe   :  { %7524 = vst [vmem:[#allocation14_spill] sm:$0xff] %v5057_v58  ;;  %113 = vmatmul.mubr.f32.vlgmr.msra.gmra.mrb[0].mxu0 %v112_v55  ;;  %v646_v6 = vand.u32 4294901760, %v526_v53  ;;  %v650_v7 = vand.u32 4294901760, %v529_v54  ;;  %v5071_v8 = vpack.c.bf16 %v642_v61, %v638_v60  ;;  %v5073_v9 = vsub.f32 %v520_v41, %v638_v60  ;;  %v547_v60 = vld [vmem:[%s7118_s2 + $0x138] sm:$0xff]  ;;  %v5331_v44 = vld [vmem:[%s7118_s2 + $0x1f0] sm:$0xff] }
   0xf   :  { %7525 = vst [vmem:[#allocation15_spill] sm:$0xff] %v5066_v1  ;;  %7526 = vst [vmem:[#allocation16_spill] sm:$0xff] %v5068_v3  ;;  %130 = vmatpush1.msra.mxu0 %v129_v50  ;;  %193 = vmatprep.mubr.f32.mxu0 %v7124_v2  ;;  %v5075_v11 = vsub.f32 %v523_v46, %v642_v61  ;;  %v652_v12 = vand.u32 4294901760, %v533_v59  ;;  %v5085_v15 = vpack.c.bf16 %v648_v63, %v644_v62  ;;  %v548_v50 = vld [vmem:[%s7118_s2 + $0x140] sm:$0xff] }
  0x10   :  { %7527 = vst [vmem:[#allocation17_spill] sm:$0xff] %v5071_v8  ;;  %7528 = vst [vmem:[#allocation18_spill] sm:$0xff] %v5073_v9  ;;  %203 = vmatprep.subr.mxu0 %v4979_v17  ;;  %4207 = vmatprep.subr.bf16.mxu1 %v5066_v1  ;;  %v5087_v18 = vsub.f32 %v527_v47, %v644_v62  ;;  %v5089_v19 = vsub.f32 %v530_v48, %v648_v63  ;;  %v656_v20 = vand.u32 4294901760, %v536_v0 }
  0x11   :  { %7529 = vst [vmem:[#allocation19_spill] sm:$0xff] %v5075_v11  ;;  %7530 = vst [vmem:[#allocation20_spill] sm:$0xff] %v5085_v15  ;;  %4209 = vmatpush1.bf16.msra.mxu1 %v5071_v8  ;;  %v5101_v34 = vpack.c.bf16 %v650_v7, %v646_v6  ;;  %v5103_v36 = vsub.f32 %v526_v53, %v646_v6  ;;  %v5105_v37 = vsub.f32 %v529_v54, %v650_v7  ;;  %v551_v6 = vld [vmem:[%s7118_s2 + $0x158] sm:$0xff]  ;;  %v554_v7 = vld [vmem:[%s7118_s2 + $0x170] sm:$0xff] }
  0x12   :  { %7531 = vst [vmem:[#allocation21_spill] sm:$0xff] %v5087_v18  ;;  %7532 = vst [vmem:[#allocation22_spill] sm:$0xff] %v5089_v19  ;;  %v5107_v38 = vsub.f32 %v533_v59, %v652_v12  ;;  %4211 = vmatprep.subr.bf16.mxu1 %v5085_v15  ;;  %v5116_v41 = vpack.c.bf16 %v656_v20, %v652_v12  ;;  %v5118_v42 = vsub.f32 %v536_v0, %v656_v20  ;;  %v544_v59 = vld [vmem:[%s7118_s2 + $0x120] sm:$0xff]  ;;  %v5151_v12 = vld [vmem:[%s7118_s2 + $0x150] sm:$0xff] }
  0x13   :  { %7533 = vst [vmem:[#allocation23_spill] sm:$0xff] %v5101_v34  ;;  %7534 = vst [vmem:[#allocation24_spill] sm:$0xff] %v5103_v36  ;;  %v654_v45 = vand.u32 4294901760, %v532_v13  ;;  %v658_v46 = vand.u32 4294901760, %v535_v14  ;;  %v660_v47 = vand.u32 4294901760, %v539_v25  ;;  %v664_v48 = vand.u32 4294901760, %v542_v26 }
  0x14   :  { %7535 = vst [vmem:[#allocation25_spill] sm:$0xff] %v5105_v37  ;;  %7536 = vst [vmem:[#allocation26_spill] sm:$0xff] %v5107_v38  ;;  %v662_v49 = vand.u32 4294901760, %v538_v31  ;;  %v666_v55 = vand.u32 4294901760, %v541_v39  ;;  %v668_v57 = vand.u32 4294901760, %v545_v40  ;;  %v672_v20 = vand.u32 4294901760, %v548_v50 }
  0x15   :  { %7537 = vst [vmem:[#allocation27_spill] sm:$0xff] %v5116_v41  ;;  %7538 = vst [vmem:[#allocation28_spill] sm:$0xff] %v5118_v42  ;;  %v5123_v53 = vsub.f32 %v532_v13, %v654_v45  ;;  %v5125_v54 = vsub.f32 %v535_v14, %v658_v46  ;;  %4213 = vmatpush1.bf16.msra.mxu1 %v5101_v34  ;;  %v5134_v61 = vpack.c.bf16 %v658_v46, %v654_v45  ;;  %v5191_v34 = vld [vmem:[%s7118_s2 + $0x1a8] sm:$0xff]  ;;  %v5196_v15 = vld [vmem:[%s7118_s2 + $0x180] sm:$0xff] }
  0x16   :  { %v5136_v62 = vpack.c.bf16 %v664_v48, %v660_v47  ;;  %v5138_v63 = vsub.f32 %v539_v25, %v660_v47  ;;  %v5140_v0 = vsub.f32 %v542_v26, %v664_v48  ;;  %195 = vmatmul.mubr.f32.vlgmr.msra.gmra.mrb[0].mxu0 %v4966_v10  ;;  %4215 = vmatprep.subr.bf16.mxu1 %v5116_v41  ;;  %v553_v26 = vld [vmem:[%s7118_s2 + $0x168] sm:$0xff]  ;;  %v670_v45 = vand.u32 4294901760, %v544_v59  ;;  %v5216_v8 = vld [vmem:[%s7118_s2 + $0x10] sm:$0xff]  ;;  %v5251_v37 = vld [vmem:[%s7118_s2 + $0x1c0] sm:$0xff] }
  0x17   :  { %7539 = vst [vmem:[#allocation29_spill] sm:$0xff] %v5123_v53  ;;  %7540 = vst [vmem:[#allocation30_spill] sm:$0xff] %v5125_v54  ;;  %v5155_v13 = vsub.f32 %v538_v31, %v662_v49  ;;  %v5157_v14 = vsub.f32 %v541_v39, %v666_v55  ;;  %v5159_v25 = vsub.f32 %v545_v40, %v668_v57  ;;  %206 = vmatpush1.msra.mxu0 %v4976_v16  ;;  %v557_v40 = vld [vmem:[%s7118_s2 + $0x188] sm:$0xff]  ;;  %v562_v36 = vld [vmem:[%s7118_s2 + $0x1b0] sm:$0xff] }
  0x18   :  { %7541 = vst [vmem:[#allocation31_spill] sm:$0xff] %v5134_v61  ;;  %7542 = vst [vmem:[#allocation32_spill] sm:$0xff] %v5136_v62  ;;  %269 = vmatprep.mubr.f32.mxu0 %v7124_v2  ;;  %v674_v46 = vand.u32 4294901760, %v547_v60  ;;  %279 = vmatprep.subr.mxu0 %v4953_v4  ;;  %v5167_v47 = vsub.f32 %v548_v50, %v672_v20  ;;  %v676_v31 = vand.u32 4294901760, %v551_v6  ;;  %v680_v39 = vand.u32 4294901760, %v554_v7  ;;  %v565_v18 = vld [vmem:[%s7118_s2 + $0x1c8] sm:$0xff] }
  0x19   :  { %7543 = vst [vmem:[#allocation33_spill] sm:$0xff] %v5138_v63  ;;  %7544 = vst [vmem:[#allocation34_spill] sm:$0xff] %v5140_v0  ;;  %v678_v48 = vand.u32 4294901760, %v5151_v12  ;;  %4217 = vmatpush1.bf16.msra.mxu1 %v5134_v61  ;;  %v5182_v50 = vpack.c.bf16 %v666_v55, %v662_v49  ;;  %v5184_v27 = vsub.f32 %v544_v59, %v670_v45  ;;  %v682_v41 = vand.u32 4294901760, %v553_v26  ;;  %v5201_v49 = vld [vmem:[%s7118_s2 + $0x198] sm:$0xff]  ;;  %v5290_v11 = vld [vmem:[%s7118_s2 + $0x40] sm:$0xff] }
  0x1a   :  { %7545 = vst [vmem:[#allocation35_spill] sm:$0xff] %v5155_v13  ;;  %7546 = vst [vmem:[#allocation36_spill] sm:$0xff] %v5157_v14  ;;  %v5186_v2 = vsub.f32 %v547_v60, %v674_v46  ;;  %4219 = vmatprep.subr.bf16.mxu1 %v5136_v62  ;;  %v5204_v55 = vpack.c.bf16 %v672_v20, %v668_v57  ;;  %v5206_v59 = vsub.f32 %v551_v6, %v676_v31  ;;  %v5224_v57 = vld [vmem:[%s7118_s2 + $0x28] sm:$0xff]  ;;  %v592_v54 = vld [vmem:[%s7118_s2 + $0x2a0] sm:$0xff] }
  0x1b   :  { %7547 = vst [vmem:[#allocation37_spill] sm:$0xff] %v5159_v25  ;;  %7548 = vst [vmem:[#allocation38_spill] sm:$0xff] %v5167_v47  ;;  %v5208_v60 = vsub.f32 %v554_v7, %v680_v39  ;;  %v5211_v61 = vsub.f32 %v5151_v12, %v678_v48  ;;  %v5218_v1 = vsub.f32 %v553_v26, %v682_v41  ;;  %v684_v51 = vand.u32 4294901760, %v557_v40  ;;  %v563_v26 = vld [vmem:[%s7118_s2 + $0x1b8] sm:$0xff]  ;;  %v566_v7 = vld [vmem:[%s7118_s2 + $0x1d0] sm:$0xff] }
  0x1c   :  { %7549 = vst [vmem:[#allocation39_spill] sm:$0xff] %v5182_v50  ;;  %7550 = vst [vmem:[#allocation40_spill] sm:$0xff] %v5184_v27  ;;  %v688_v43 = vand.u32 4294901760, %v560_v28  ;;  %v5226_v6 = vpack.c.bf16 %v674_v46, %v670_v45  ;;  %v686_v12 = vand.u32 4294901760, %v5196_v15  ;;  %v690_v20 = vand.u32 4294901760, %v5201_v49  ;;  %v596_v25 = vld [vmem:[%s7118_s2 + $0x2c0] sm:$0xff] }
  0x1d   :  { %7551 = vst [vmem:[#allocation41_spill] sm:$0xff] %v5186_v2  ;;  %7552 = vst [vmem:[#allocation42_spill] sm:$0xff] %v5204_v55  ;;  %4221 = vmatpush1.bf16.msra.mxu1 %v5182_v50  ;;  %v5235_v62 = vsub.f32 %v557_v40, %v684_v51  ;;  %v7560_v22 = vand.u32 4294901760, %v5179_v32  ;;  %v5266_v50 = vld [vmem:[%s7118_s2 + $0x1d8] sm:$0xff]  ;;  %v7568_v46 = vand.u32 4294901760, %v5216_v8  ;;  %v692_v19 = vand.u32 4294901760, %v563_v26 }
  0x1e   :  { %7553 = vst [vmem:[#allocation43_spill] sm:$0xff] %v5206_v59  ;;  %7554 = vst [vmem:[#allocation44_spill] sm:$0xff] %v5208_v60  ;;  %v5237_v29 = vsub.f32 %v560_v28, %v688_v43  ;;  %272 = vmatmul.mubr.f32.vlgmr.msra.gmra.mrb[0].mxu0 %v4986_v21  ;;  %4223 = vmatprep.subr.bf16.mxu1 %v5204_v55  ;;  %v5255_v28 = vpack.c.bf16 %v680_v39, %v676_v31  ;;  %v7565_v31 = vmov 0.0   ;;  %v7572_v9 = vand.u32 4294901760, %v5224_v57  ;;  %v597_v63 = vld [vmem:[%s7118_s2 + $0x2c8] sm:$0xff]  ;;  %v595_v53 = vld [vmem:[%s7118_s2 + $0x2b8] sm:$0xff] }
  0x1f   :  { %7555 = vst [vmem:[#allocation45_spill] sm:$0xff] %v5211_v61  ;;  %7556 = vst [vmem:[#allocation46_spill] sm:$0xff] %v5218_v1  ;;  %v5242_v45 = vsub.f32 %v5179_v32, %v7560_v22  ;;  %v7563_v22 = vand.u32 4294901760, %v5191_v34  ;;  %281 = vmatpush1.msra.mxu0 %v4955_v5  ;;  %344 = vmatprep.mubr.f32.mxu0 %v7565_v31  ;;  %v5274_v39 = vsub.f32 %v5196_v15, %v686_v12 }
  0x20   :  { %7557 = vst [vmem:[#allocation47_spill] sm:$0xff] %v5226_v6  ;;  %7558 = vst [vmem:[#allocation48_spill] sm:$0xff] %v5235_v62  ;;  %v5282_v55 = vsub.f32 %v5216_v8, %v7568_v46  ;;  %v7570_v15 = vand.u32 4294901760, %v4979_v17  ;;  %v5299_v46 = vsub.f32 %v5224_v57, %v7572_v9  ;;  %v696_v3 = vand.u32 4294901760, %v566_v7  ;;  %v569_v9 = vld [vmem:[%s7118_s2 + $0x1e8] sm:$0xff]  ;;  %v574_v62 = vld [vmem:[%s7118_s2 + $0x210] sm:$0xff] }
  0x21   :  { %7559 = vst [vmem:[#allocation49_spill] sm:$0xff] %v5237_v29  ;;  %7561 = vst [vmem:[#allocation50_spill] sm:$0xff] %v5242_v45  ;;  %v5260_v40 = vsub.f32 %v5191_v34, %v7563_v22  ;;  %v5277_v22 = vsub.f32 %v5201_v49, %v690_v20  ;;  %v5294_v49 = vpack.c.bf16 %v682_v41, %v678_v48  ;;  %v7167_v58 = vand.u32 4294901760, %v5251_v37  ;;  %v5311_v41 = vld [vmem:[%s7118_s2 + $0x58] sm:$0xff] }
  0x22   :  { %7562 = vst [vmem:[#allocation51_spill] sm:$0xff] %v5255_v28  ;;  %7566 = vst [vmem:[#allocation53_spill] sm:$0xff] %v5274_v39  ;;  %357 = vmatprep.subr.mxu0 %v7570_v15  ;;  %4225 = vmatpush1.bf16.msra.mxu1 %v5226_v6  ;;  %v5303_v56 = vpack.c.bf16 %v688_v43, %v684_v51  ;;  %v5305_v52 = vsub.f32 %v563_v26, %v692_v19  ;;  %v694_v17 = vand.u32 4294901760, %v562_v36  ;;  %v572_v15 = vld [vmem:[%s7118_s2 + $0x200] sm:$0xff] }
  0x23   :  { %7564 = vst [vmem:[#allocation52_spill] sm:$0xff] %v5260_v40  ;;  %7567 = vst [vmem:[#allocation54_spill] sm:$0xff] %v5277_v22  ;;  %4227 = vmatprep.subr.bf16.mxu1 %v5255_v28  ;;  %v5317_v48 = vsub.f32 %v566_v7, %v696_v3  ;;  %v5322_v43 = vsub.f32 %v5251_v37, %v7167_v58  ;;  %v698_v51 = vand.u32 4294901760, %v565_v18  ;;  %v7578_v7 = vand.u32 4294901760, %v5266_v50  ;;  %v5343_v58 = vld [vmem:[%s7118_s2 + $0x208] sm:$0xff]  ;;  %v568_v26 = vld [vmem:[%s7118_s2 + $0x1e0] sm:$0xff] }
  0x24   :  { %7569 = vst [vmem:[#allocation55_spill] sm:$0xff] %v5282_v55  ;;  %7571 = vst [vmem:[#allocation56_spill] sm:$0xff] %v5294_v49  ;;  %v5338_v6 = vsub.f32 %v562_v36, %v694_v17  ;;  %v7582_v30 = vand.u32 4294901760, %v5290_v11  ;;  %v700_v36 = vand.u32 4294901760, %v569_v9  ;;  %v5367_v33 = vpack.c.bf16 %v696_v3, %v692_v19  ;;  %v5384_v3 = vld [vmem:[%s7118_s2 + $0x88] sm:$0xff] }
  0x25   :  { %7573 = vst [vmem:[#allocation57_spill] sm:$0xff] %v5299_v46  ;;  %7574 = vst [vmem:[#allocation58_spill] sm:$0xff] %v5303_v56  ;;  %v5336_v28 = vsub.f32 %v5266_v50, %v7578_v7  ;;  %v5348_v35 = vsub.f32 %v565_v18, %v698_v51  ;;  %v5365_v18 = vpack.c.bf16 %v690_v20, %v686_v12  ;;  %v7587_v22 = vand.u32 4294901760, %v5311_v41  ;;  %v578_v12 = vld [vmem:[%s7118_s2 + $0x230] sm:$0xff] }
  0x26   :  { %7575 = vst [vmem:[#allocation59_spill] sm:$0xff] %v5305_v52  ;;  %7576 = vst [vmem:[#allocation60_spill] sm:$0xff] %v5317_v48  ;;  %v5354_v7 = vsub.f32 %v5290_v11, %v7582_v30  ;;  %v5362_v48 = vld [vmem:[%s7118_s2 + $0x70] sm:$0xff]  ;;  %4229 = vmatpush1.bf16.msra.mxu1 %v5294_v49  ;;  %v7586_v52 = vand.u32 4294901760, %v4986_v21  ;;  %v5378_v29 = vsub.f32 %v569_v9, %v700_v36  ;;  %v702_v20 = vand.u32 4294901760, %v568_v26  ;;  %v575_v21 = vld [vmem:[%s7118_s2 + $0x218] sm:$0xff] }
  0x27   :  { %7577 = vst [vmem:[#allocation61_spill] sm:$0xff] %v5322_v43  ;;  %7579 = vst [vmem:[#allocation62_spill] sm:$0xff] %v5336_v28  ;;  %4231 = vmatprep.subr.bf16.mxu1 %v5303_v56  ;;  %v5376_v39 = vsub.f32 %v5311_v41, %v7587_v22  ;;  %v1917_v9 = vand.u32 4294901760, %v5362_v48  ;;  %v576_v30 = vld [vmem:[%s7118_s2 + $0x220] sm:$0xff]  ;;  %v7595_v49 = vand.u32 4294901760, %v5343_v58  ;;  %v736_v0 = vand.u32 4294901760, %v596_v25 }
  0x28   :  { %7580 = vst [vmem:[#allocation63_spill] sm:$0xff] %v5338_v6  ;;  %7581 = vst [vmem:[#allocation64_spill] sm:$0xff] %v5348_v35  ;;  %v571_v6 = vld [vmem:[%s7118_s2 + $0x1f8] sm:$0xff]  ;;  %v704_v35 = vand.u32 4294901760, %v572_v15  ;;  %348 = vmatmul.mubr.f32.vlgmr.msra.gmra.mrb[0].mxu0 %v7586_v52  ;;  %v7590_v52 = vand.u32 4294901760, %v4976_v16  ;;  %v1971_v1 = vand.u32 4294901760, %v576_v30 }
  0x29   :  { %7583 = vst [vmem:[#allocation65_spill] sm:$0xff] %v5354_v7  ;;  %7584 = vst [vmem:[#allocation66_spill] sm:$0xff] %v5365_v18  ;;  %424 = vmatprep.mubr.f32.mxu0 %v7565_v31  ;;  %v706_v22 = vand.u32 4294901760, %v571_v6  ;;  %v579_v16 = vld [vmem:[%s7118_s2 + $0x238] sm:$0xff]  ;;  %v1992_v42 = vand.u32 4294901760, %v597_v63  ;;  %v734_v38 = vand.u32 4294901760, %v592_v54 }
  0x2a   :  { %7585 = vst [vmem:[#allocation67_spill] sm:$0xff] %v5367_v33  ;;  %7588 = vst [vmem:[#allocation68_spill] sm:$0xff] %v5376_v39  ;;  %361 = vmatpush1.msra.mxu0 %v7590_v52  ;;  %v5392_v19 = vsub.f32 %v572_v15, %v704_v35  ;;  %v5405_v52 = vpack.c.bf16 %v698_v51, %v694_v17  ;;  %v7593_v15 = vand.u32 4294901760, %v5331_v44  ;;  %4233 = vmatpush1.bf16.msra.mxu1 %v5365_v18 }
  0x2b   :  { %7589 = vst [vmem:[#allocation69_spill] sm:$0xff] %v5378_v29  ;;  %433 = vmatprep.subr.mxu0 %v4953_v4  ;;  %v5417_v29 = vsub.f32 %v568_v26, %v702_v20  ;;  %v577_v4 = vld [vmem:[%s7118_s2 + $0x228] sm:$0xff]  ;;  %v5426_v17 = vsub.f32 %v571_v6, %v706_v22  ;;  %v1920_v51 = vand.u32 4294901760, %v5384_v3  ;;  %4235 = vmatprep.subr.bf16.mxu1 %v5367_v33  ;;  %v1974_v61 = vand.u32 4294901760, %v579_v16  ;;  %v531_v33 = vld [vmem:[%s7118_s2 + $0xb8] sm:$0xff] }
  0x2c   :  { %7591 = vst [vmem:[#allocation70_spill] sm:$0xff] %v5392_v19  ;;  %7592 = vst [vmem:[#allocation71_spill] sm:$0xff] %v5405_v52  ;;  %v5410_v56 = vsub.f32 %v5331_v44, %v7593_v15  ;;  %v5415_v19 = vsub.f32 %v5343_v58, %v7595_v49  ;;  %v5430_v15 = vsub.f32 %v5362_v48, %v1917_v9  ;;  %v708_v49 = vand.u32 4294901760, %v575_v21  ;;  %v528_v48 = vld [vmem:[%s7118_s2 + $0xa0] sm:$0xff] }
  0x2d   :  { %7597 = vst [vmem:[#allocation74_spill] sm:$0xff] %v5417_v29  ;;  %7598 = vst [vmem:[#allocation75_spill] sm:$0xff] %v5426_v17  ;;  %v5433_v26 = vpack.c.bf16 %v704_v35, %v700_v36  ;;  %v712_v29 = vand.u32 4294901760, %v578_v12  ;;  %v5436_v60 = vsub.f32 %v5384_v3, %v1920_v51  ;;  %v710_v6 = vand.u32 4294901760, %v574_v62 }
  0x2e   :  { %7594 = vst [vmem:[#allocation72_spill] sm:$0xff] %v5410_v56  ;;  %7596 = vst [vmem:[#allocation73_spill] sm:$0xff] %v5415_v19  ;;  %v5438_v59 = vsub.f32 %v575_v21, %v708_v49  ;;  %v714_v18 = vand.u32 4294901760, %v577_v4  ;;  %v7603_v35 = vand.u32 4294901760, %v5179_v32  ;;  %v7604_v36 = vand.u32 4294901760, %v5191_v34  ;;  %4237 = vmatpush1.bf16.msra.mxu1 %v5405_v52 }
  0x2f   :  { %7599 = vst [vmem:[#allocation76_spill] sm:$0xff] %v5430_v15  ;;  %7600 = vst [vmem:[#allocation77_spill] sm:$0xff] %v5433_v26  ;;  %v5452_v3 = vsub.f32 %v578_v12, %v712_v29  ;;  %v5454_v21 = vsub.f32 %v576_v30, %v1971_v1  ;;  %v5459_v2 = vsub.f32 %v579_v16, %v1974_v61  ;;  %4239 = vmatprep.subr.bf16.mxu1 %v5433_v26 }
  0x30   :  { %7601 = vst [vmem:[#allocation78_spill] sm:$0xff] %v5436_v60  ;;  %7602 = vst [vmem:[#allocation79_spill] sm:$0xff] %v5438_v59  ;;  %v5450_v17 = vpack.c.bf16 %v7604_v36, %v7603_v35  ;;  %v5457_v59 = vpack.c.bf16 %v706_v22, %v702_v20  ;;  %v5461_v27 = vsub.f32 %v574_v62, %v710_v6  ;;  %426 = vmatmul.mubr.f32.vlgmr.msra.gmra.mrb[0].mxu0 %v4966_v10  ;;  %v583_v35 = vld [vmem:[%s7118_s2 + $0x258] sm:$0xff] }
  0x31   :  { %7606 = vst [vmem:[#allocation81_spill] sm:$0xff] %v5452_v3  ;;  %7607 = vst [vmem:[#allocation82_spill] sm:$0xff] %v5454_v21  ;;  %v5463_v47 = vsub.f32 %v577_v4, %v714_v18  ;;  %v5467_v32 = vpack.c.bf16 %v712_v29, %v708_v49  ;;  %v1923_v34 = vand.u32 4294901760, %v528_v48  ;;  %v1926_v12 = vand.u32 4294901760, %v531_v33  ;;  %435 = vmatpush1.msra.mxu0 %v4955_v5  ;;  %v593_v3 = vld [vmem:[%s7118_s2 + $0x2a8] sm:$0xff] }
  0x32   :  { %7605 = vst [vmem:[#allocation80_spill] sm:$0xff] %v5450_v17  ;;  %7608 = vst [vmem:[#allocation83_spill] sm:$0xff] %v5457_v59  ;;  %498 = vmatprep.mubr.f32.mxu0 %v7565_v31  ;;  %4583 = vmatprep.subr.bf16.mxu0 %v5450_v17  ;;  %v5477_v20 = vpack.c.bf16 %v714_v18, %v710_v6  ;;  %v7616_v29 = vand.u32 4294901760, %v5216_v8  ;;  %v7617_v22 = vand.u32 4294901760, %v5224_v57  ;;  %v7619_v5 = vand.u32 4294901760, %v5251_v37  ;;  %v591_v31 = vld [vmem:[%s7118_s2 + $0x298] sm:$0xff] }
  0x33   :  { %7609 = vst [vmem:[#allocation84_spill] sm:$0xff] %v5459_v2  ;;  %7610 = vst [vmem:[#allocation85_spill] sm:$0xff] %v5461_v27  ;;  %v5472_v30 = vsub.f32 %v528_v48, %v1923_v34  ;;  %v5474_v62 = vsub.f32 %v531_v33, %v1926_v12  ;;  %4241 = vmatpush1.bf16.msra.mxu1 %v5457_v59  ;;  %v7620_v4 = vand.u32 4294901760, %v5266_v50  ;;  %v7622_v33 = vand.u32 4294901760, %v5290_v11  ;;  %v580_v48 = vld [vmem:[%s7118_s2 + $0x240] sm:$0xff] }
  0x34   :  { %7611 = vst [vmem:[#allocation86_spill] sm:$0xff] %v5463_v47  ;;  %7612 = vst [vmem:[#allocation87_spill] sm:$0xff] %v5467_v32  ;;  %4243 = vmatprep.subr.bf16.mxu1 %v5467_v32  ;;  %v5484_v16 = vpack.c.bf16 %v7617_v22, %v7616_v29  ;;  %v7623_v8 = vand.u32 4294901760, %v5311_v41  ;;  %v7625_v37 = vand.u32 4294901760, %v5331_v44  ;;  %v7626_v50 = vand.u32 4294901760, %v5343_v58  ;;  %v5522_v44 = vld [vmem:[%s7118_s2 + $0x248] sm:$0xff] }
  0x35   :  { %7613 = vst [vmem:[#allocation88_spill] sm:$0xff] %v5472_v30  ;;  %7614 = vst [vmem:[#allocation89_spill] sm:$0xff] %v5474_v62  ;;  %v5490_v49 = vpack.c.bf16 %v7620_v4, %v7619_v5  ;;  %v5509_v6 = vpack.c.bf16 %v1920_v51, %v1917_v9  ;;  %v5515_v11 = vpack.c.bf16 %v1926_v12, %v1923_v34  ;;  %v5527_v58 = vld [vmem:[%s7118_s2 + $0x260] sm:$0xff]  ;;  %v5539_v9 = vld [vmem:[%s7118_s2 + $0x268] sm:$0xff]  ;;  %v718_v34 = vand.u32 4294901760, %v580_v48 }
  0x36   :  { %7615 = vst [vmem:[#allocation90_spill] sm:$0xff] %v5477_v20  ;;  %7618 = vst [vmem:[#allocation91_spill] sm:$0xff] %v5484_v16  ;;  %v5499_v18 = vpack.c.bf16 %v7623_v8, %v7622_v33  ;;  %v5506_v57 = vpack.c.bf16 %v7626_v50, %v7625_v37  ;;  %v720_v41 = vand.u32 4294901760, %v5527_v58  ;;  %v1980_v36 = vand.u32 4294901760, %v5539_v9  ;;  %v534_v29 = vld [vmem:[%s7118_s2 + $0xd0] sm:$0xff]  ;;  %v537_v22 = vld [vmem:[%s7118_s2 + $0xe8] sm:$0xff] }
  0x37   :  { %7621 = vst [vmem:[#allocation92_spill] sm:$0xff] %v5490_v49  ;;  %4245 = vmatpush1.bf16.msra.mxu1 %v5477_v20  ;;  %7628 = vst [vmem:[#allocation95_spill] sm:$0xff] %v5509_v6  ;;  %v722_v12 = vand.u32 4294901760, %v583_v35  ;;  %v1929_v4 = vand.u32 4294901760, %v534_v29  ;;  %v1932_v33 = vand.u32 4294901760, %v537_v22  ;;  %v587_v50 = vld [vmem:[%s7118_s2 + $0x278] sm:$0xff]  ;;  %v5641_v39 = vsub.f32 %v580_v48, %v718_v34 }
  0x38   :  { %500 = vmatmul.mubr.f32.vlgmr.msra.gmra.mrb[0].mxu0 %v4966_v10  ;;  %7624 = vst [vmem:[#allocation93_spill] sm:$0xff] %v5499_v18  ;;  %7627 = vst [vmem:[#allocation94_spill] sm:$0xff] %v5506_v57  ;;  %v5512_v10 = vpack.c.bf16 %v1974_v61, %v1971_v1  ;;  %v5532_v1 = vld [vmem:[%s7118_s2 + $0x250] sm:$0xff]  ;;  %v716_v61 = vand.u32 4294901760, %v5522_v44  ;;  %v588_v32 = vld [vmem:[%s7118_s2 + $0x280] sm:$0xff]  ;;  %v724_v26 = vand.u32 4294901760, %v587_v50  ;;  %v5633_v15 = vsub.f32 %v5527_v58, %v720_v41 }
  0x39   :  { %4585 = vmatpush3.bf16.msra.mxu0 %v5484_v16  ;;  %7630 = vst [vmem:[#allocation97_spill] sm:$0xff] %v5515_v11  ;;  %v1977_v51 = vand.u32 4294901760, %v5532_v1  ;;  %v5559_v37 = vpack.c.bf16 %v722_v12, %v718_v34  ;;  %v590_v20 = vld [vmem:[%s7118_s2 + $0x290] sm:$0xff]  ;;  %v5571_v59 = vpack.c.bf16 %v1932_v33, %v1929_v4  ;;  %v543_v16 = vld [vmem:[%s7118_s2 + $0x118] sm:$0xff]  ;;  %v732_v13 = vand.u32 4294901760, %v593_v3  ;;  %v549_v30 = vld [vmem:[%s7118_s2 + $0x148] sm:$0xff] }
  0x3a   :  { %4587 = vmatprep.subr.bf16.mxu0 %v5490_v49  ;;  %7629 = vst [vmem:[#allocation96_spill] sm:$0xff] %v5512_v10  ;;  %v5555_v5 = vpack.c.bf16 %v720_v41, %v716_v61  ;;  %v728_v52 = vand.u32 4294901760, %v590_v20  ;;  %v540_v49 = vld [vmem:[%s7118_s2 + $0x100] sm:$0xff]  ;;  %v546_v62 = vld [vmem:[%s7118_s2 + $0x130] sm:$0xff]  ;;  %v738_v21 = vand.u32 4294901760, %v595_v53  ;;  %7641 = vst [vmem:[#allocation108_spill] sm:$0xff] %v5633_v15  ;;  %v5639_v56 = vsub.f32 %v5539_v9, %v1980_v36 }
  0x3b   :  { %v5557_v8 = vpack.c.bf16 %v1980_v36, %v1977_v51  ;;  %7633 = vst [vmem:[#allocation100_spill] sm:$0xff] %v5559_v37  ;;  %7634 = vst [vmem:[#allocation101_spill] sm:$0xff] %v5571_v59  ;;  %v1935_v47 = vand.u32 4294901760, %v540_v49  ;;  %v5627_v2 = vpack.c.bf16 %v736_v0, %v732_v13  ;;  %v1941_v60 = vand.u32 4294901760, %v546_v62 }
  0x3c   :  { %7631 = vst [vmem:[#allocation98_spill] sm:$0xff] %v5555_v5  ;;  %4247 = vmatprep.subr.bf16.mxu1 %v5555_v5  ;;  %v1983_v5 = vand.u32 4294901760, %v588_v32  ;;  %v5591_v17 = vpack.c.bf16 %v728_v52, %v724_v26  ;;  %v5636_v19 = vsub.f32 %v5532_v1, %v1977_v51  ;;  %7643 = vst [vmem:[#allocation110_spill] sm:$0xff] %v5639_v56 }
  0x3d   :  { %4589 = vmatpush3.bf16.msra.mxu0 %v5499_v18  ;;  %7632 = vst [vmem:[#allocation99_spill] sm:$0xff] %v5557_v8  ;;  %4249 = vmatpush1.bf16.msra.mxu1 %v5559_v37  ;;  %7639 = vst [vmem:[#allocation106_spill] sm:$0xff] %v5627_v2  ;;  %v5645_v7 = vsub.f32 %v534_v29, %v1929_v4  ;;  %v5647_v28 = vsub.f32 %v537_v22, %v1932_v33 }
  0x3e   :  { %4591 = vmatprep.subr.bf16.mxu0 %v5506_v57  ;;  %7635 = vst [vmem:[#allocation102_spill] sm:$0xff] %v5591_v17  ;;  %4251 = vmatprep.subr.bf16.mxu1 %v5591_v17  ;;  %7642 = vst [vmem:[#allocation109_spill] sm:$0xff] %v5636_v19  ;;  %v5652_v58 = vsub.f32 %v590_v20, %v728_v52  ;;  %v5662_v51 = vsub.f32 %v540_v49, %v1935_v47  ;;  %v602_v52 = vld [vmem:[%s7118_s2 + $0x2f0] sm:$0xff] }
  0x3f   :  { %7644 = vst [vmem:[#allocation111_spill] sm:$0xff] %v5641_v39  ;;  %7646 = vst [vmem:[#allocation113_spill] sm:$0xff] %v5645_v7  ;;  %v598_v49 = vld [vmem:[%s7118_s2 + $0x2d0] sm:$0xff] }
  0x40   :  { %7647 = vst [vmem:[#allocation114_spill] sm:$0xff] %v5647_v28  ;;  %7649 = vst [vmem:[#allocation116_spill] sm:$0xff] %v5652_v58 }
  0x41   :  { %4593 = vmatpush3.bf16.msra.mxu0 %v5509_v6  ;;  %v1986_v6 = vand.u32 4294901760, %v591_v31  ;;  %7654 = vst [vmem:[#allocation121_spill] sm:$0xff] %v5662_v51 }
  0x42   :  { %4595 = vmatprep.subr.bf16.mxu0 %v5512_v10  ;;  %v589_v10 = vld [vmem:[%s7118_s2 + $0x288] sm:$0xff] }
  0x43   :  { %v730_v18 = vand.u32 4294901760, %v589_v10  ;;  %v5593_v27 = vpack.c.bf16 %v1986_v6, %v1983_v5  ;;  %v5656_v1 = vsub.f32 %v591_v31, %v1986_v6  ;;  %v5674_v31 = vsub.f32 %v596_v25, %v736_v0 }
  0x44   :  { %v5691_v0 = vpack.c.bf16 %v738_v21, %v734_v38  ;;  %v5693_v25 = vsub.f32 %v592_v54, %v734_v38  ;;  %v5709_v38 = vsub.f32 %v546_v62, %v1941_v60  ;;  %v742_v6 = vand.u32 4294901760, %v598_v49 }
  0x45   :  { %4597 = vmatpush3.bf16.msra.mxu0 %v5515_v11  ;;  %v586_v11 = vld [vmem:[%s7118_s2 + $0x270] sm:$0xff]  ;;  %7636 = vst [vmem:[#allocation103_spill] sm:$0xff] %v5593_v27  ;;  %7651 = vst [vmem:[#allocation118_spill] sm:$0xff] %v5656_v1  ;;  %v5660_v9 = vsub.f32 %v589_v10, %v730_v18 }
  0x46   :  { %4599 = vmatprep.subr.bf16.mxu0 %v5557_v8  ;;  %v726_v57 = vand.u32 4294901760, %v586_v11  ;;  %v1938_v8 = vand.u32 4294901760, %v543_v16  ;;  %7657 = vst [vmem:[#allocation124_spill] sm:$0xff] %v5674_v31  ;;  %7661 = vst [vmem:[#allocation128_spill] sm:$0xff] %v5691_v0  ;;  %v5729_v22 = vsub.f32 %v598_v49, %v742_v6  ;;  %v7273_v49 = vand.u32 4294901760, %v5282_v55 }
  0x47   :  { %7653 = vst [vmem:[#allocation120_spill] sm:$0xff] %v5660_v9  ;;  %7662 = vst [vmem:[#allocation129_spill] sm:$0xff] %v5693_v25 }
  0x48   :  { %v5595_v37 = vpack.c.bf16 %v730_v18, %v726_v57  ;;  %v5607_v14 = vpack.c.bf16 %v1938_v8, %v1935_v47  ;;  %v5658_v41 = vsub.f32 %v586_v11, %v726_v57  ;;  %v5664_v48 = vsub.f32 %v543_v16, %v1938_v8  ;;  %v600_v47 = vld [vmem:[%s7118_s2 + $0x2e0] sm:$0xff]  ;;  %v603_v16 = vld [vmem:[%s7118_s2 + $0x2f8] sm:$0xff]  ;;  %7665 = vst [vmem:[#allocation132_spill] sm:$0xff] %v5709_v38 }
  0x49   :  { %4601 = vmatpush3.bf16.msra.mxu0 %v5571_v59  ;;  %v594_v59 = vld [vmem:[%s7118_s2 + $0x2b0] sm:$0xff]  ;;  %v555_v18 = vld [vmem:[%s7118_s2 + $0x178] sm:$0xff]  ;;  %v1998_v57 = vand.u32 4294901760, %v603_v16  ;;  %7674 = vst [vmem:[#allocation141_spill] sm:$0xff] %v5729_v22 }
  0x4a   :  { %7637 = vst [vmem:[#allocation104_spill] sm:$0xff] %v5595_v37  ;;  %7638 = vst [vmem:[#allocation105_spill] sm:$0xff] %v5607_v14  ;;  %4603 = vmatprep.subr.bf16.mxu0 %v5593_v27  ;;  %4253 = vmatpush1.bf16.msra.mxu1 %v5595_v37  ;;  %v1989_v17 = vand.u32 4294901760, %v594_v59  ;;  %v1944_v27 = vand.u32 4294901760, %v549_v30  ;;  %v5630_v37 = vsub.f32 %v5522_v44, %v716_v61  ;;  %v1950_v34 = vand.u32 4294901760, %v555_v18  ;;  %v7699_v22 = vld [vmem:[#allocation29_spill] sm:$0xff] }
  0x4b   :  { %4255 = vmatprep.subr.bf16.mxu1 %v5627_v2  ;;  %v5650_v44 = vsub.f32 %v587_v50, %v724_v26  ;;  %v5654_v61 = vsub.f32 %v588_v32, %v1983_v5  ;;  %7652 = vst [vmem:[#allocation119_spill] sm:$0xff] %v5658_v41  ;;  %7655 = vst [vmem:[#allocation122_spill] sm:$0xff] %v5664_v48  ;;  %v5672_v26 = vsub.f32 %v593_v3, %v732_v13  ;;  %v552_v3 = vld [vmem:[%s7118_s2 + $0x160] sm:$0xff] }
  0x4c   :  { %7640 = vst [vmem:[#allocation107_spill] sm:$0xff] %v5630_v37  ;;  %v5676_v32 = vpack.c.bf16 %v1992_v42, %v1989_v17  ;;  %v5678_v20 = vsub.f32 %v594_v59, %v1989_v17  ;;  %v5689_v13 = vsub.f32 %v597_v63, %v1992_v42  ;;  %v5695_v59 = vsub.f32 %v595_v53, %v738_v21  ;;  %v601_v17 = vld [vmem:[%s7118_s2 + $0x2e8] sm:$0xff] }
  0x4d   :  { %4605 = vmatpush3.bf16.msra.mxu0 %v5607_v14  ;;  %v5643_v14 = vsub.f32 %v583_v35, %v722_v12  ;;  %7648 = vst [vmem:[#allocation115_spill] sm:$0xff] %v5650_v44  ;;  %7650 = vst [vmem:[#allocation117_spill] sm:$0xff] %v5654_v61  ;;  %v599_v35 = vld [vmem:[%s7118_s2 + $0x2d8] sm:$0xff]  ;;  %v5707_v42 = vpack.c.bf16 %v1944_v27, %v1941_v60  ;;  %v5711_v53 = vsub.f32 %v549_v30, %v1944_v27 }
  0x4e   :  { %7656 = vst [vmem:[#allocation123_spill] sm:$0xff] %v5672_v26  ;;  %7658 = vst [vmem:[#allocation125_spill] sm:$0xff] %v5676_v32  ;;  %4607 = vmatprep.subr.bf16.mxu0 %v5676_v32  ;;  %v740_v54 = vand.u32 4294901760, %v599_v35  ;;  %4257 = vmatpush1.bf16.msra.mxu1 %v5691_v0  ;;  %v744_v63 = vand.u32 4294901760, %v602_v52  ;;  %v1995_v21 = vand.u32 4294901760, %v600_v47  ;;  %v746_v11 = vand.u32 4294901760, %v601_v17 }
  0x4f   :  { %7645 = vst [vmem:[#allocation112_spill] sm:$0xff] %v5643_v14  ;;  %7659 = vst [vmem:[#allocation126_spill] sm:$0xff] %v5678_v20  ;;  %v1947_v36 = vand.u32 4294901760, %v552_v3  ;;  %v5725_v62 = vsub.f32 %v603_v16, %v1998_v57  ;;  %v5739_v8 = vsub.f32 %v555_v18, %v1950_v34  ;;  %v7266_v50 = vand.u32 4294901760, %v4990_v23 }
  0x50   :  { %7660 = vst [vmem:[#allocation127_spill] sm:$0xff] %v5689_v13  ;;  %7663 = vst [vmem:[#allocation130_spill] sm:$0xff] %v5695_v59  ;;  %v5715_v10 = vsub.f32 %v599_v35, %v740_v54  ;;  %v5717_v12 = vpack.c.bf16 %v744_v63, %v740_v54  ;;  %v5719_v60 = vsub.f32 %v602_v52, %v744_v63  ;;  %v7265_v35 = vand.u32 4294901760, %v4992_v24 }
  0x51   :  { %7664 = vst [vmem:[#allocation131_spill] sm:$0xff] %v5707_v42  ;;  %7666 = vst [vmem:[#allocation133_spill] sm:$0xff] %v5711_v53  ;;  %4609 = vmatpush3.bf16.msra.mxu0 %v5707_v42  ;;  %v5721_v27 = vpack.c.bf16 %v1998_v57, %v1995_v21  ;;  %v5723_v30 = vsub.f32 %v600_v47, %v1995_v21  ;;  %v5727_v29 = vpack.c.bf16 %v746_v11, %v742_v6  ;;  %v7691_v42 = vld [vmem:[#allocation84_spill] sm:$0xff] }
  0x52   :  { %7667 = vst [vmem:[#allocation134_spill] sm:$0xff] %v5715_v10  ;;  %7668 = vst [vmem:[#allocation135_spill] sm:$0xff] %v5717_v12  ;;  %v5731_v5 = vsub.f32 %v601_v17, %v746_v11  ;;  %4259 = vmatprep.subr.bf16.mxu1 %v5717_v12  ;;  %v5735_v4 = vpack.c.bf16 %v1950_v34, %v1947_v36  ;;  %v5737_v33 = vsub.f32 %v552_v3, %v1947_v36 }
  0x53   :  { %7669 = vst [vmem:[#allocation136_spill] sm:$0xff] %v5719_v60  ;;  %7670 = vst [vmem:[#allocation137_spill] sm:$0xff] %v5721_v27  ;;  %4611 = vmatprep.subr.bf16.mxu0 %v5721_v27  ;;  %4261 = vmatpush1.bf16.msra.mxu1 %v5727_v29  ;;  %v7267_v52 = vand.u32 4294901760, %v5242_v45  ;;  %v7272_v47 = vand.u32 4294901760, %v5260_v40  ;;  %v768_v16 = vsub.f32 %v4990_v23, %v7266_v50  ;;  %v7276_v17 = vand.u32 4294901760, %v5299_v46 }
  0x54   :  { %7671 = vst [vmem:[#allocation138_spill] sm:$0xff] %v5723_v30  ;;  %7672 = vst [vmem:[#allocation139_spill] sm:$0xff] %v5725_v62  ;;  %v780_v3 = vsub.f32 %v4992_v24, %v7265_v35  ;;  %v2020_v21 = vsub.f32 %v5282_v55, %v7273_v49  ;;  %v7300_v32 = vand.u32 4294901760, %v7691_v42  ;;  %v7693_v24 = vld [vmem:[#allocation88_spill] sm:$0xff] }
  0x55   :  { %7673 = vst [vmem:[#allocation140_spill] sm:$0xff] %v5727_v29  ;;  %7675 = vst [vmem:[#allocation142_spill] sm:$0xff] %v5731_v5  ;;  %4613 = vmatpush3.bf16.msra.mxu0 %v5735_v4  ;;  %v2132_v18 = vsub.f32 %v5242_v45, %v7267_v52  ;;  %v2139_v54 = vsub.f32 %v5260_v40, %v7272_v47  ;;  %v769_v63 = vand.u32 4294901760, %v768_v16  ;;  %v7275_v29 = vand.u32 4294901760, %v5322_v43  ;;  %v7680_v16 = vld [vmem:[#allocation62_spill] sm:$0xff]  ;;  %v7736_v45 = vld [vmem:[#allocation64_spill] sm:$0xff] }
  0x56   :  { %7676 = vst [vmem:[#allocation143_spill] sm:$0xff] %v5735_v4  ;;  %7677 = vst [vmem:[#allocation144_spill] sm:$0xff] %v5737_v33  ;;  %v2027_v57 = vsub.f32 %v5299_v46, %v7276_v17  ;;  %v781_v6 = vand.u32 4294901760, %v780_v3  ;;  %v2021_v34 = vand.u32 4294901760, %v2020_v21  ;;  %v7274_v47 = vand.u32 4294901760, %v7680_v16  ;;  %v7690_v4 = vld [vmem:[#allocation82_spill] sm:$0xff] }
  0x57   :  { %7678 = vst [vmem:[#allocation145_spill] sm:$0xff] %v5739_v8  ;;  %v2133_v11 = vand.u32 4294901760, %v2132_v18  ;;  %v2140_v36 = vand.u32 4294901760, %v2139_v54  ;;  %v2146_v49 = vsub.f32 %v5322_v43, %v7275_v29  ;;  %v7681_v18 = vld [vmem:[#allocation65_spill] sm:$0xff]  ;;  %v7299_v27 = vand.u32 4294901760, %v7690_v4 }
  0x58   :  { %v2028_v35 = vand.u32 4294901760, %v2027_v57  ;;  %v4262_v50 = vpack.c.bf16 %v781_v6, %v769_v63  ;;  %v2153_v3 = vsub.f32 %v7680_v16, %v7274_v47  ;;  %v7279_v54 = vand.u32 4294901760, %v7681_v18  ;;  %v7682_v63 = vld [vmem:[#allocation68_spill] sm:$0xff]  ;;  %v7685_v29 = vld [vmem:[#allocation73_spill] sm:$0xff]  ;;  %v7739_v16 = vld [vmem:[#allocation70_spill] sm:$0xff] }
  0x59   :  { %v4614_v52 = vpack.c.bf16 %v2140_v36, %v2133_v11  ;;  %v7280_v21 = vand.u32 4294901760, %v7682_v63  ;;  %v2147_v57 = vand.u32 4294901760, %v2146_v49  ;;  %v7288_v17 = vand.u32 4294901760, %v7685_v29  ;;  %v7738_v43 = vld [vmem:[#allocation69_spill] sm:$0xff] }
  0x5a   :  { %v5768_v12 = vpack.c.bf16 %v2028_v35, %v2021_v34  ;;  %4263 = vmatprep.subr.bf16.mxu1 %v4262_v50  ;;  %v2154_v6 = vand.u32 4294901760, %v2153_v3  ;;  %v2034_v35 = vsub.f32 %v7681_v18, %v7279_v54  ;;  %v7684_v34 = vld [vmem:[#allocation72_spill] sm:$0xff] }
  0x5b   :  { %4615 = vmatprep.subr.bf16.mxu0 %v4614_v52  ;;  %v2041_v50 = vsub.f32 %v7682_v63, %v7280_v21  ;;  %v7283_v47 = vand.u32 4294901760, %v7684_v34  ;;  %v2167_v3 = vsub.f32 %v7685_v29, %v7288_v17  ;;  %v7687_v54 = vld [vmem:[#allocation76_spill] sm:$0xff] }
  0x5c   :  { %7679 = vst [vmem:[#allocation146_spill] sm:$0xff] %v5768_v12  ;;  %v5785_v52 = vpack.c.bf16 %v2154_v6, %v2147_v57  ;;  %v2035_v11 = vand.u32 4294901760, %v2034_v35  ;;  %v7293_v21 = vand.u32 4294901760, %v7687_v54  ;;  %v7688_v57 = vld [vmem:[#allocation78_spill] sm:$0xff] }
  0x5d   :  { %v2042_v36 = vand.u32 4294901760, %v2041_v50  ;;  %v2160_v49 = vsub.f32 %v7684_v34, %v7283_v47  ;;  %v7296_v6 = vand.u32 4294901760, %v7688_v57  ;;  %v2168_v50 = vand.u32 4294901760, %v2167_v3  ;;  %v7744_v34 = vld [vmem:[#allocation81_spill] sm:$0xff] }
  0x5e   :  { %7683 = vst [vmem:[#allocation147_spill] sm:$0xff] %v5785_v52  ;;  %v2048_v2 = vsub.f32 %v7687_v54, %v7293_v21  ;;  %v2181_v21 = vsub.f32 %v7691_v42, %v7300_v32  ;;  %v7387_v29 = vand.u32 4294901760, %v7744_v34 }
  0x5f   :  { %v5789_v0 = vpack.c.bf16 %v2042_v36, %v2035_v11  ;;  %v2161_v35 = vand.u32 4294901760, %v2160_v49  ;;  %v2055_v11 = vsub.f32 %v7688_v57, %v7296_v6  ;;  %v2174_v49 = vsub.f32 %v7690_v4, %v7299_v27  ;;  %v7746_v57 = vld [vmem:[#allocation86_spill] sm:$0xff] }
  0x60   :  { %v2049_v47 = vand.u32 4294901760, %v2048_v2  ;;  %v7301_v6 = vand.u32 4294901760, %v7693_v24  ;;  %v2182_v23 = vand.u32 4294901760, %v2181_v21  ;;  %v7390_v63 = vand.u32 4294901760, %v7746_v57 }
  0x61   :  { %7686 = vst [vmem:[#allocation148_spill] sm:$0xff] %v5789_v0  ;;  %v5805_v36 = vpack.c.bf16 %v2168_v50, %v2161_v35  ;;  %v2056_v17 = vand.u32 4294901760, %v2055_v11  ;;  %v7694_v35 = vld [vmem:[#allocation89_spill] sm:$0xff]  ;;  %v2175_v2 = vand.u32 4294901760, %v2174_v49 }
  0x62   :  { %v7302_v50 = vand.u32 4294901760, %v7694_v35  ;;  %v2062_v11 = vsub.f32 %v7693_v24, %v7301_v6  ;;  %v7308_v6 = vand.u32 4294901760, %v5636_v19 }
  0x63   :  { %7689 = vst [vmem:[#allocation149_spill] sm:$0xff] %v5805_v36  ;;  %v5812_v3 = vpack.c.bf16 %v2056_v17, %v2049_v47  ;;  %v7695_v47 = vld [vmem:[#allocation26_spill] sm:$0xff]  ;;  %v5827_v0 = vpack.c.bf16 %v2182_v23, %v2175_v2  ;;  %v7313_v23 = vand.u32 4294901760, %v7699_v22 }
  0x64   :  { %v2069_v27 = vsub.f32 %v7694_v35, %v7302_v50  ;;  %v7305_v17 = vand.u32 4294901760, %v7695_v47  ;;  %v2063_v32 = vand.u32 4294901760, %v2062_v11  ;;  %v7310_v50 = vand.u32 4294901760, %v5639_v56  ;;  %v7700_v2 = vld [vmem:[#allocation30_spill] sm:$0xff] }
  0x65   :  { %7692 = vst [vmem:[#allocation150_spill] sm:$0xff] %v5812_v3  ;;  %v7696_v3 = vld [vmem:[#allocation28_spill] sm:$0xff]  ;;  %7697 = vst [vmem:[#allocation88_spill] sm:$0xff] %v5827_v0  ;;  %v7314_v11 = vand.u32 4294901760, %v7700_v2  ;;  %v7316_v0 = vand.u32 4294901760, %v5645_v7 }
  0x66   :  { %v7306_v36 = vand.u32 4294901760, %v7696_v3  ;;  %v2070_v52 = vand.u32 4294901760, %v2069_v27  ;;  %v864_v21 = vsub.f32 %v7695_v47, %v7305_v17  ;;  %v2188_v17 = vsub.f32 %v5636_v19, %v7308_v6 }
  0x68   :  { %v876_v49 = vsub.f32 %v7696_v3, %v7306_v36  ;;  %v5837_v12 = vpack.c.bf16 %v2070_v52, %v2063_v32  ;;  %v865_v5 = vand.u32 4294901760, %v864_v21  ;;  %v2195_v36 = vsub.f32 %v5639_v56, %v7310_v50 }
  0x69   :  { %v870_v32 = vsub.f32 %v7699_v22, %v7313_v23  ;;  %v882_v52 = vsub.f32 %v7700_v2, %v7314_v11  ;;  %v7317_v21 = vand.u32 4294901760, %v5647_v28  ;;  %v2189_v6 = vand.u32 4294901760, %v2188_v17 }
  0x6a   :  { %7698 = vst [vmem:[#allocation89_spill] sm:$0xff] %v5837_v12  ;;  %v877_v27 = vand.u32 4294901760, %v876_v49  ;;  %v7701_v49 = vld [vmem:[#allocation33_spill] sm:$0xff]  ;;  %v2196_v47 = vand.u32 4294901760, %v2195_v36  ;;  %v2076_v50 = vsub.f32 %v5645_v7, %v7316_v0  ;;  %v7321_v36 = vand.u32 4294901760, %v5654_v61 }
  0x6b   :  { %v7318_v12 = vand.u32 4294901760, %v7701_v49  ;;  %v871_v60 = vand.u32 4294901760, %v870_v32  ;;  %v883_v10 = vand.u32 4294901760, %v882_v52  ;;  %v2083_v23 = vsub.f32 %v5647_v28, %v7317_v21 }
  0x6c   :  { %v5856_v3 = vpack.c.bf16 %v877_v27, %v865_v5  ;;  %v5867_v2 = vpack.c.bf16 %v2196_v47, %v2189_v6  ;;  %v2077_v5 = vand.u32 4294901760, %v2076_v50  ;;  %v7704_v27 = vld [vmem:[#allocation34_spill] sm:$0xff]  ;;  %v7322_v52 = vand.u32 4294901760, %v5656_v1  ;;  %v7706_v47 = vld [vmem:[#allocation35_spill] sm:$0xff] }
  0x6d   :  { %v888_v11 = vsub.f32 %v7701_v49, %v7318_v12  ;;  %v7320_v17 = vand.u32 4294901760, %v7704_v27  ;;  %v2084_v0 = vand.u32 4294901760, %v2083_v23  ;;  %v2202_v6 = vsub.f32 %v5654_v61, %v7321_v36  ;;  %v7707_v12 = vld [vmem:[#allocation36_spill] sm:$0xff] }
  0x6e   :  { %7702 = vst [vmem:[#allocation151_spill] sm:$0xff] %v5856_v3  ;;  %7703 = vst [vmem:[#allocation152_spill] sm:$0xff] %v5867_v2  ;;  %v5871_v3 = vpack.c.bf16 %v883_v10, %v871_v60  ;;  %v7325_v50 = vand.u32 4294901760, %v7706_v47  ;;  %v7328_v2 = vand.u32 4294901760, %v7707_v12  ;;  %v2209_v10 = vsub.f32 %v5656_v1, %v7322_v52 }
  0x6f   :  { %v889_v32 = vand.u32 4294901760, %v888_v11  ;;  %v900_v21 = vsub.f32 %v7704_v27, %v7320_v17  ;;  %v5882_v49 = vpack.c.bf16 %v2084_v0, %v2077_v5  ;;  %v7329_v60 = vand.u32 4294901760, %v5662_v51 }
  0x70   :  { %7705 = vst [vmem:[#allocation153_spill] sm:$0xff] %v5871_v3  ;;  %v7331_v23 = vand.u32 4294901760, %v5664_v48  ;;  %v2203_v17 = vand.u32 4294901760, %v2202_v6  ;;  %v894_v36 = vsub.f32 %v7706_v47, %v7325_v50  ;;  %v906_v3 = vsub.f32 %v7707_v12, %v7328_v2  ;;  %v7711_v50 = vld [vmem:[#allocation38_spill] sm:$0xff] }
  0x71   :  { %7708 = vst [vmem:[#allocation154_spill] sm:$0xff] %v5882_v49  ;;  %v901_v11 = vand.u32 4294901760, %v900_v21  ;;  %v2210_v0 = vand.u32 4294901760, %v2209_v10  ;;  %v2090_v5 = vsub.f32 %v5662_v51, %v7329_v60  ;;  %v7709_v49 = vld [vmem:[#allocation37_spill] sm:$0xff]  ;;  %v7332_v47 = vand.u32 4294901760, %v7711_v50 }
  0x72   :  { %v2097_v52 = vsub.f32 %v5664_v48, %v7331_v23  ;;  %v7333_v21 = vand.u32 4294901760, %v7709_v49  ;;  %v895_v27 = vand.u32 4294901760, %v894_v36  ;;  %v907_v22 = vand.u32 4294901760, %v906_v3 }
  0x73   :  { %v5902_v6 = vpack.c.bf16 %v901_v11, %v889_v32  ;;  %v5905_v59 = vpack.c.bf16 %v2210_v0, %v2203_v17  ;;  %v2091_v2 = vand.u32 4294901760, %v2090_v5  ;;  %v924_v23 = vsub.f32 %v7711_v50, %v7332_v47  ;;  %v7715_v11 = vld [vmem:[#allocation40_spill] sm:$0xff] }
  0x74   :  { %v2098_v10 = vand.u32 4294901760, %v2097_v52  ;;  %v912_v60 = vsub.f32 %v7709_v49, %v7333_v21  ;;  %v5910_v12 = vpack.c.bf16 %v907_v22, %v895_v27  ;;  %v7334_v32 = vand.u32 4294901760, %v5678_v20  ;;  %v7716_v52 = vld [vmem:[#allocation41_spill] sm:$0xff] }
  0x75   :  { %7710 = vst [vmem:[#allocation155_spill] sm:$0xff] %v5902_v6  ;;  %7712 = vst [vmem:[#allocation156_spill] sm:$0xff] %v5905_v59  ;;  %v7335_v3 = vand.u32 4294901760, %v5689_v13  ;;  %v7337_v0 = vand.u32 4294901760, %v7715_v11  ;;  %v7338_v5 = vand.u32 4294901760, %v7716_v52  ;;  %v925_v59 = vand.u32 4294901760, %v924_v23 }
  0x76   :  { %7713 = vst [vmem:[#allocation157_spill] sm:$0xff] %v5910_v12  ;;  %v5917_v36 = vpack.c.bf16 %v2098_v10, %v2091_v2  ;;  %v913_v17 = vand.u32 4294901760, %v912_v60  ;;  %v2216_v22 = vsub.f32 %v5678_v20, %v7334_v32  ;;  %v7340_v47 = vand.u32 4294901760, %v5709_v38  ;;  %v7717_v10 = vld [vmem:[#allocation43_spill] sm:$0xff] }
  0x77   :  { %v2223_v27 = vsub.f32 %v5689_v13, %v7335_v3  ;;  %v918_v2 = vsub.f32 %v7715_v11, %v7337_v0  ;;  %v930_v60 = vsub.f32 %v7716_v52, %v7338_v5  ;;  %v7341_v23 = vand.u32 4294901760, %v5711_v53 }
  0x78   :  { %7714 = vst [vmem:[#allocation158_spill] sm:$0xff] %v5917_v36  ;;  %v7342_v21 = vand.u32 4294901760, %v7717_v10  ;;  %v5936_v36 = vpack.c.bf16 %v925_v59, %v913_v17  ;;  %v2217_v32 = vand.u32 4294901760, %v2216_v22  ;;  %v2104_v3 = vsub.f32 %v5709_v38, %v7340_v47  ;;  %v7720_v17 = vld [vmem:[#allocation44_spill] sm:$0xff] }
  0x79   :  { %v2224_v12 = vand.u32 4294901760, %v2223_v27  ;;  %v919_v6 = vand.u32 4294901760, %v918_v2  ;;  %v931_v50 = vand.u32 4294901760, %v930_v60  ;;  %v2111_v0 = vsub.f32 %v5711_v53, %v7341_v23  ;;  %v7797_v53 = vld [vmem:[#allocation25_spill] sm:$0xff] }
  0x7a   :  { %7718 = vst [vmem:[#allocation159_spill] sm:$0xff] %v5936_v36  ;;  %v936_v5 = vsub.f32 %v7717_v10, %v7342_v21  ;;  %v2105_v59 = vand.u32 4294901760, %v2104_v3  ;;  %v7344_v22 = vand.u32 4294901760, %v7720_v17  ;;  %v7345_v27 = vand.u32 4294901760, %v5723_v30  ;;  %v7723_v21 = vld [vmem:[#allocation46_spill] sm:$0xff] }
  0x7b   :  { %v5947_v52 = vpack.c.bf16 %v2224_v12, %v2217_v32  ;;  %v5951_v36 = vpack.c.bf16 %v931_v50, %v919_v6  ;;  %v2112_v47 = vand.u32 4294901760, %v2111_v0  ;;  %v7346_v60 = vand.u32 4294901760, %v5725_v62  ;;  %v7722_v32 = vld [vmem:[#allocation45_spill] sm:$0xff] }
  0x7c   :  { %v937_v2 = vand.u32 4294901760, %v936_v5  ;;  %v948_v23 = vsub.f32 %v7720_v17, %v7344_v22  ;;  %v2230_v12 = vsub.f32 %v5723_v30, %v7345_v27  ;;  %v7349_v3 = vand.u32 4294901760, %v7722_v32 }
  0x7d   :  { %7719 = vst [vmem:[#allocation160_spill] sm:$0xff] %v5947_v52  ;;  %7721 = vst [vmem:[#allocation161_spill] sm:$0xff] %v5951_v36  ;;  %v7352_v52 = vand.u32 4294901760, %v7723_v21  ;;  %v5962_v10 = vpack.c.bf16 %v2112_v47, %v2105_v59  ;;  %v2237_v50 = vsub.f32 %v5725_v62, %v7346_v60  ;;  %v7353_v6 = vand.u32 4294901760, %v5737_v33 }
  0x7e   :  { %v7355_v0 = vand.u32 4294901760, %v5739_v8  ;;  %v949_v5 = vand.u32 4294901760, %v948_v23  ;;  %v2231_v22 = vand.u32 4294901760, %v2230_v12  ;;  %v942_v27 = vsub.f32 %v7722_v32, %v7349_v3  ;;  %v7727_v3 = vld [vmem:[#allocation49_spill] sm:$0xff] }
  0x7f   :  { %7724 = vst [vmem:[#allocation162_spill] sm:$0xff] %v5962_v10  ;;  %v954_v36 = vsub.f32 %v7723_v21, %v7352_v52  ;;  %v2238_v47 = vand.u32 4294901760, %v2237_v50  ;;  %v2118_v59 = vsub.f32 %v5737_v33, %v7353_v6  ;;  %v7725_v10 = vld [vmem:[#allocation48_spill] sm:$0xff]  ;;  %v7357_v32 = vand.u32 4294901760, %v7727_v3  ;;  %v7764_v33 = vld [vmem:[#allocation35_spill] sm:$0xff] }
  0x80   :  { %v2125_v60 = vsub.f32 %v5739_v8, %v7355_v0  ;;  %v7356_v23 = vand.u32 4294901760, %v7725_v10  ;;  %v5982_v12 = vpack.c.bf16 %v949_v5, %v937_v2  ;;  %v943_v17 = vand.u32 4294901760, %v942_v27  ;;  %v7765_v8 = vld [vmem:[#allocation36_spill] sm:$0xff] }
  0x81   :  { %v955_v11 = vand.u32 4294901760, %v954_v36  ;;  %v5985_v49 = vpack.c.bf16 %v2238_v47, %v2231_v22  ;;  %v2119_v52 = vand.u32 4294901760, %v2118_v59  ;;  %v972_v0 = vsub.f32 %v7727_v3, %v7357_v32  ;;  %v7730_v36 = vld [vmem:[#allocation53_spill] sm:$0xff]  ;;  %v7732_v47 = vld [vmem:[#allocation54_spill] sm:$0xff] }
  0x82   :  { %7726 = vst [vmem:[#allocation163_spill] sm:$0xff] %v5982_v12  ;;  %v2126_v50 = vand.u32 4294901760, %v2125_v60  ;;  %v960_v6 = vsub.f32 %v7725_v10, %v7356_v23  ;;  %v7362_v2 = vand.u32 4294901760, %v7730_v36  ;;  %v7367_v60 = vand.u32 4294901760, %v7732_v47 }
  0x83   :  { %7728 = vst [vmem:[#allocation164_spill] sm:$0xff] %v5985_v49  ;;  %v5990_v21 = vpack.c.bf16 %v955_v11, %v943_v17  ;;  %v973_v23 = vand.u32 4294901760, %v972_v0  ;;  %v7733_v17 = vld [vmem:[#allocation59_spill] sm:$0xff]  ;;  %v7374_v59 = vand.u32 4294901760, %v7736_v45 }
  0x84   :  { %v5998_v5 = vpack.c.bf16 %v2126_v50, %v2119_v52  ;;  %v961_v22 = vand.u32 4294901760, %v960_v6  ;;  %v966_v11 = vsub.f32 %v7730_v36, %v7362_v2  ;;  %v7370_v32 = vand.u32 4294901760, %v7733_v17  ;;  %v7735_v50 = vld [vmem:[#allocation63_spill] sm:$0xff]  ;;  %v7793_v36 = vld [vmem:[#allocation22_spill] sm:$0xff] }
  0x85   :  { %7729 = vst [vmem:[#allocation165_spill] sm:$0xff] %v5990_v21  ;;  %v7734_v21 = vld [vmem:[#allocation60_spill] sm:$0xff]  ;;  %v978_v52 = vsub.f32 %v7732_v47, %v7367_v60  ;;  %v7373_v27 = vand.u32 4294901760, %v7735_v50  ;;  %v1002_v6 = vsub.f32 %v7736_v45, %v7374_v59 }
  0x86   :  { %7731 = vst [vmem:[#allocation166_spill] sm:$0xff] %v5998_v5  ;;  %v7372_v49 = vand.u32 4294901760, %v7734_v21  ;;  %v6015_v0 = vpack.c.bf16 %v973_v23, %v961_v22  ;;  %v967_v55 = vand.u32 4294901760, %v966_v11  ;;  %v984_v2 = vsub.f32 %v7733_v17, %v7370_v32  ;;  %v7782_v17 = vld [vmem:[#allocation16_spill] sm:$0xff] }
  0x87   :  { %v979_v40 = vand.u32 4294901760, %v978_v52  ;;  %v990_v60 = vsub.f32 %v7735_v50, %v7373_v27  ;;  %v7376_v32 = vand.u32 4294901760, %v7738_v43 }
  0x88   :  { %7737 = vst [vmem:[#allocation167_spill] sm:$0xff] %v6015_v0  ;;  %v996_v46 = vsub.f32 %v7734_v21, %v7372_v49  ;;  %v985_v22 = vand.u32 4294901760, %v984_v2  ;;  %v7379_v0 = vand.u32 4294901760, %v7739_v16  ;;  %v1003_v49 = vand.u32 4294901760, %v1002_v6  ;;  %v7740_v2 = vld [vmem:[#allocation74_spill] sm:$0xff]  ;;  %v7743_v6 = vld [vmem:[#allocation79_spill] sm:$0xff] }
  0x89   :  { %v6033_v5 = vpack.c.bf16 %v979_v40, %v967_v55  ;;  %v991_v52 = vand.u32 4294901760, %v990_v60  ;;  %v1008_v59 = vsub.f32 %v7738_v43, %v7376_v32  ;;  %v7381_v23 = vand.u32 4294901760, %v7740_v2  ;;  %v7742_v55 = vld [vmem:[#allocation75_spill] sm:$0xff]  ;;  %v7745_v60 = vld [vmem:[#allocation85_spill] sm:$0xff] }
  0x8a   :  { %v997_v11 = vand.u32 4294901760, %v996_v46  ;;  %v1020_v46 = vsub.f32 %v7739_v16, %v7379_v0  ;;  %v7384_v40 = vand.u32 4294901760, %v7742_v55  ;;  %v7776_v43 = vld [vmem:[#allocation7_spill] sm:$0xff] }
  0x8b   :  { %v6046_v18 = vpack.c.bf16 %v1003_v49, %v991_v52  ;;  %v1014_v32 = vsub.f32 %v7740_v2, %v7381_v23  ;;  %v1044_v23 = vsub.f32 %v7744_v34, %v7387_v29  ;;  %v7775_v2 = vld [vmem:[#allocation6_spill] sm:$0xff]  ;;  %v7462_v16 = vand.u32 4294901760, %v7776_v43 }
  0x8c   :  { %v6037_v12 = vpack.c.bf16 %v997_v11, %v985_v22  ;;  %v7385_v22 = vand.u32 4294901760, %v7743_v6  ;;  %v1009_v11 = vand.u32 4294901760, %v1008_v59  ;;  %v1021_v27 = vand.u32 4294901760, %v1020_v46 }
  0x8d   :  { %7741 = vst [vmem:[#allocation168_spill] sm:$0xff] %v6046_v18  ;;  %v1026_v49 = vsub.f32 %v7742_v55, %v7384_v40  ;;  %v7388_v59 = vand.u32 4294901760, %v7745_v60  ;;  %v1015_v54 = vand.u32 4294901760, %v1014_v32  ;;  %v1045_v4 = vand.u32 4294901760, %v1044_v23 }
  0x8e   :  { %v1032_v52 = vsub.f32 %v7743_v6, %v7385_v22  ;;  %v6065_v46 = vpack.c.bf16 %v1021_v27, %v1009_v11  ;;  %v1050_v32 = vsub.f32 %v7746_v57, %v7390_v63  ;;  %v7391_v27 = vand.u32 4294901760, %v5630_v37 }
  0x8f   :  { %v1027_v18 = vand.u32 4294901760, %v1026_v49  ;;  %v1038_v22 = vsub.f32 %v7745_v60, %v7388_v59  ;;  %v7394_v11 = vand.u32 4294901760, %v5633_v15  ;;  %v7395_v59 = vand.u32 4294901760, %v5641_v39 }
  0x90   :  { %v1033_v40 = vand.u32 4294901760, %v1032_v52  ;;  %v1051_v0 = vand.u32 4294901760, %v1050_v32  ;;  %v1056_v23 = vsub.f32 %v5630_v37, %v7391_v27  ;;  %v7402_v27 = vand.u32 4294901760, %v5652_v58 }
  0x91   :  { %v6081_v29 = vpack.c.bf16 %v1027_v18, %v1015_v54  ;;  %v1039_v49 = vand.u32 4294901760, %v1038_v22  ;;  %v1068_v63 = vsub.f32 %v5633_v15, %v7394_v11  ;;  %v1062_v18 = vsub.f32 %v5641_v39, %v7395_v59  ;;  %v7778_v15 = vld [vmem:[#allocation10_spill] sm:$0xff] }
  0x92   :  { %v6086_v42 = vpack.c.bf16 %v1045_v4, %v1033_v40  ;;  %v7398_v54 = vand.u32 4294901760, %v5643_v14  ;;  %v7399_v4 = vand.u32 4294901760, %v5650_v44  ;;  %v1057_v32 = vand.u32 4294901760, %v1056_v23 }
  0x93   :  { %v6101_v40 = vpack.c.bf16 %v1051_v0, %v1039_v49  ;;  %v1069_v52 = vand.u32 4294901760, %v1068_v63  ;;  %v1063_v19 = vand.u32 4294901760, %v1062_v18  ;;  %v1092_v63 = vsub.f32 %v5652_v58, %v7402_v27 }
  0x94   :  { %v1074_v11 = vsub.f32 %v5643_v14, %v7398_v54  ;;  %v1080_v59 = vsub.f32 %v5650_v44, %v7399_v4  ;;  %v7403_v0 = vand.u32 4294901760, %v5658_v41  ;;  %v7406_v49 = vand.u32 4294901760, %v5660_v9  ;;  %v7781_v14 = vld [vmem:[#allocation14_spill] sm:$0xff] }
  0x95   :  { %v6112_v7 = vpack.c.bf16 %v1069_v52, %v1057_v32  ;;  %v7409_v4 = vand.u32 4294901760, %v5672_v26  ;;  %v1093_v28 = vand.u32 4294901760, %v1092_v63  ;;  %v7417_v27 = vand.u32 4294901760, %v5674_v31 }
  0x96   :  { %v1075_v23 = vand.u32 4294901760, %v1074_v11  ;;  %v1081_v18 = vand.u32 4294901760, %v1080_v59  ;;  %v1086_v52 = vsub.f32 %v5658_v41, %v7403_v0  ;;  %v1098_v32 = vsub.f32 %v5660_v9, %v7406_v49 }
  0x97   :  { %v1104_v59 = vsub.f32 %v5672_v26, %v7409_v4  ;;  %v7416_v63 = vand.u32 4294901760, %v5693_v25  ;;  %v1116_v49 = vsub.f32 %v5674_v31, %v7417_v27  ;;  %v7753_v27 = vld [vmem:[#allocation141_spill] sm:$0xff]  ;;  %v7457_v55 = vand.u32 4294901760, %v7775_v2  ;;  %v7789_v31 = vld [vmem:[#allocation18_spill] sm:$0xff] }
  0x98   :  { %v6129_v22 = vpack.c.bf16 %v1075_v23, %v1063_v19  ;;  %v6137_v54 = vpack.c.bf16 %v1093_v28, %v1081_v18  ;;  %v1087_v0 = vand.u32 4294901760, %v1086_v52  ;;  %v1099_v51 = vand.u32 4294901760, %v1098_v32  ;;  %v7749_v23 = vld [vmem:[#allocation130_spill] sm:$0xff]  ;;  %v7752_v32 = vld [vmem:[#allocation136_spill] sm:$0xff] }
  0x99   :  { %v1105_v48 = vand.u32 4294901760, %v1104_v59  ;;  %v1110_v19 = vsub.f32 %v5693_v25, %v7416_v63  ;;  %v7420_v4 = vand.u32 4294901760, %v7749_v23  ;;  %v1117_v28 = vand.u32 4294901760, %v1116_v49  ;;  %v7751_v18 = vld [vmem:[#allocation134_spill] sm:$0xff]  ;;  %v7791_v25 = vld [vmem:[#allocation19_spill] sm:$0xff] }
  0x9a   :  { %7747 = vst [vmem:[#allocation169_spill] sm:$0xff] %v6129_v22  ;;  %7748 = vst [vmem:[#allocation170_spill] sm:$0xff] %v6137_v54  ;;  %v6148_v20 = vpack.c.bf16 %v1099_v51, %v1087_v0  ;;  %v7421_v52 = vand.u32 4294901760, %v7751_v18  ;;  %v7426_v13 = vand.u32 4294901760, %v7752_v32  ;;  %v7431_v1 = vand.u32 4294901760, %v7753_v27  ;;  %v7755_v49 = vld [vmem:[#allocation142_spill] sm:$0xff] }
  0x9b   :  { %v1111_v61 = vand.u32 4294901760, %v1110_v19  ;;  %v1122_v59 = vsub.f32 %v7749_v23, %v7420_v4  ;;  %v6158_v54 = vpack.c.bf16 %v1117_v28, %v1105_v48  ;;  %v7438_v19 = vand.u32 4294901760, %v7755_v49  ;;  %v3986_v63 = vld [vmem:[%s7117_s0 + $0x1] ss:$8 sm:$0x3] }
  0x9c   :  { %7750 = vst [vmem:[#allocation171_spill] sm:$0xff] %v6148_v20  ;;  %v1128_v51 = vsub.f32 %v7751_v18, %v7421_v52  ;;  %v1140_v0 = vsub.f32 %v7752_v32, %v7426_v13  ;;  %v1134_v4 = vsub.f32 %v7753_v27, %v7431_v1  ;;  %v7760_v20 = vld [vmem:[#allocation29_spill] sm:$0xff]  ;;  %v7761_v1 = vld [vmem:[#allocation30_spill] sm:$0xff]  ;;  %v7790_v44 = vand.u32 4294901760, %v7782_v17  ;;  %v7796_v18 = vld [vmem:[#allocation24_spill] sm:$0xff] }
  0x9d   :  { %7754 = vst [vmem:[#allocation172_spill] sm:$0xff] %v6158_v54  ;;  %v1123_v11 = vand.u32 4294901760, %v1122_v59  ;;  %v1146_v52 = vsub.f32 %v7755_v49, %v7438_v19  ;;  %v7795_v47 = vand.u32 4294901760, %v7791_v25  ;;  %v7490_v32 = vand.u32 4294901760, %v7796_v18 }
  0x9e   :  { %v1129_v48 = vand.u32 4294901760, %v1128_v51  ;;  %v1141_v28 = vand.u32 4294901760, %v1140_v0  ;;  %v1135_v62 = vand.u32 4294901760, %v1134_v4  ;;  %v7762_v51 = vld [vmem:[#allocation33_spill] sm:$0xff]  ;;  %v7763_v0 = vld [vmem:[#allocation34_spill] sm:$0xff] }
  0x9f   :  { %v6175_v30 = vpack.c.bf16 %v1123_v11, %v1111_v61  ;;  %v1147_v38 = vand.u32 4294901760, %v1146_v52  ;;  %v7766_v61 = vld [vmem:[#allocation37_spill] sm:$0xff]  ;;  %v7767_v11 = vld [vmem:[#allocation38_spill] sm:$0xff] }
  0xa0   :  { %v6177_v13 = vpack.c.bf16 %v1141_v28, %v1129_v48  ;;  %v7768_v48 = vld [vmem:[#allocation40_spill] sm:$0xff]  ;;  %v7769_v28 = vld [vmem:[#allocation41_spill] sm:$0xff] }
  0xa1   :  { %7756 = vst [vmem:[#allocation173_spill] sm:$0xff] %v6175_v30  ;;  %v6183_v56 = vpack.c.bf16 %v1147_v38, %v1135_v62  ;;  %v7771_v30 = vld [vmem:[#allocation44_spill] sm:$0xff]  ;;  %v7439_v62 = vlaneseq }
  0xa2   :  { %7757 = vst [vmem:[#allocation174_spill] sm:$0xff] %v6177_v13 }
  0xa3   :  { %v6206_v52 = vshrl.u32 %v7439_v62, 7 }
  0xa5   :  { %7774 = vst [vmem:[#allocation175_spill] sm:$0xff] %v6206_v52  ;;  %v7448_v38 = vsub.s32 0, %v6206_v52  ;;  %v7449_v19 = vsub.s32 1, %v6206_v52  ;;  %v7777_v52 = vld [vmem:[#allocation8_spill] sm:$0xff] }
  0xa7   :  { %v30_v54 = vrot.slane %v3986_v63, %v7448_v38  ;;  %v34_v22 = vrot.slane %v3986_v63, %v7449_v19  ;;  %v774_v38 = vsub.f32 %v7775_v2, %v7457_v55  ;;  %v786_v63 = vsub.f32 %v7776_v43, %v7462_v16  ;;  %v7780_v55 = vld [vmem:[#allocation13_spill] sm:$0xff] }
  0xa8   :  { %v7784_v16 = vand.u32 4294901760, %v7778_v15 }
  0xa9   :  { %v775_v60 = vand.u32 4294901760, %v774_v38  ;;  %v787_v57 = vand.u32 4294901760, %v786_v63 }
  0xaa   :  { %v804_v38 = vsub.f32 %v7778_v15, %v7784_v16 }
 0x10b   :  { %v501_v45 = vpop.f32.mrb[0].mxu0 }
 0x10c   :  { %v4870_v6 = vadd.f32 %v501_v45, %v30_v54  ;;  %v503_v34 = vpop.f32.mrb[1].mxu0  ;;  %v7779_v45 = vld [vmem:[#allocation12_spill] sm:$0xff]  ;;  %v7783_v54 = vand.u32 4294901760, %v7777_v52 }
 0x10d   :  { %v4871_v62 = vadd.f32 %v503_v34, %v34_v22  ;;  %v7785_v63 = vand.u32 4294901760, %v7779_v45 }
 0x10e   :  { %v506_v19 = vmax.f32 %v4870_v6, 0.0  ;;  %v792_v4 = vsub.f32 %v7777_v52, %v7783_v54  ;;  %v7787_v54 = vand.u32 4294901760, %v7780_v55 }
 0x10f   :  { %v507_v37 = vmax.f32 %v4871_v62, 0.0  ;;  %v798_v50 = vsub.f32 %v7779_v45, %v7785_v63  ;;  %v4264_v63 = vpack.c.bf16 %v787_v57, %v775_v60  ;;  %v805_v60 = vand.u32 4294901760, %v804_v38 }
 0x110   :  { %v6244_v22 = vand.u32 4294901760, %v506_v19  ;;  %v810_v34 = vsub.f32 %v7780_v55, %v7787_v54  ;;  %v7792_v54 = vld [vmem:[#allocation21_spill] sm:$0xff]  ;;  %v793_v57 = vand.u32 4294901760, %v792_v4 }
 0x111   :  { %v6248_v6 = vand.u32 4294901760, %v507_v37  ;;  %v799_v10 = vand.u32 4294901760, %v798_v50 }
 0x112   :  { %v6252_v62 = vsub.f32 %v506_v19, %v6244_v22  ;;  %v828_v19 = vsub.f32 %v7782_v17, %v7790_v44  ;;  %v811_v23 = vand.u32 4294901760, %v810_v34  ;;  %v7798_v44 = vand.u32 4294901760, %v7792_v54 }
 0x113   :  { %v6260_v39 = vsub.f32 %v507_v37, %v6248_v6  ;;  %v7788_v37 = vand.u32 4294901760, %v7781_v14 }
 0x114   :  { %v6271_v41 = vand.u32 4294901760, %v6252_v62  ;;  %v829_v13 = vand.u32 4294901760, %v828_v19  ;;  %v840_v50 = vsub.f32 %v7792_v54, %v7798_v44  ;;  %v846_v19 = vsub.f32 %v7796_v18, %v7490_v32  ;;  %v7863_v32 = vld [vmem:[#allocation172_spill] sm:$0xff] }
 0x115   :  { %v816_v26 = vsub.f32 %v7781_v14, %v7788_v37  ;;  %v6281_v9 = vand.u32 4294901760, %v6260_v39  ;;  %v834_v37 = vsub.f32 %v7791_v25, %v7795_v47  ;;  %v4268_v47 = vpack.c.bf16 %v811_v23, %v799_v10  ;;  %v7802_v23 = vld [vmem:[#allocation147_spill] sm:$0xff] }
 0x116   :  { %7786 = vst [vmem:[#allocation6_spill] sm:$0xff] %v6271_v41  ;;  %v757_v58 = vsub.f32 %v6252_v62, %v6271_v41  ;;  %v7794_v41 = vand.u32 4294901760, %v7789_v31  ;;  %v7801_v44 = vand.u32 4294901760, %v7797_v53 }
 0x117   :  { %v751_v16 = vsub.f32 %v6260_v39, %v6281_v9  ;;  %v817_v3 = vand.u32 4294901760, %v816_v26  ;;  %v7799_v26 = vand.u32 4294901760, %v7793_v36 }
 0x118   :  { %v822_v21 = vsub.f32 %v7789_v31, %v7794_v41  ;;  %v758_v38 = vand.u32 4294901760, %v757_v58  ;;  %v4266_v41 = vpack.c.bf16 %v805_v60, %v793_v57  ;;  %v835_v58 = vand.u32 4294901760, %v834_v37 }
 0x119   :  { %v752_v59 = vand.u32 4294901760, %v751_v16  ;;  %v852_v34 = vsub.f32 %v7793_v36, %v7799_v26  ;;  %v7800_v16 = vld [vmem:[#allocation146_spill] sm:$0xff]  ;;  %v858_v27 = vsub.f32 %v7797_v53, %v7801_v44  ;;  %v841_v57 = vand.u32 4294901760, %v840_v50  ;;  %v7808_v50 = vld [vmem:[#allocation151_spill] sm:$0xff] }
 0x11a   :  { %v823_v4 = vand.u32 4294901760, %v822_v21  ;;  %v7803_v21 = vld [vmem:[#allocation148_spill] sm:$0xff]  ;;  %v847_v37 = vand.u32 4294901760, %v846_v19  ;;  %v7815_v19 = vld [vmem:[#allocation158_spill] sm:$0xff] }
 0x11b   :  { %753 = vmatprep.mubr.f32.mxu1 %v752_v59  ;;  %2005 = vmatprep.mubr.f32.mxu0 %v752_v59  ;;  %v4270_v59 = vpack.c.bf16 %v829_v13, %v817_v3  ;;  %v853_v10 = vand.u32 4294901760, %v852_v34  ;;  %v859_v60 = vand.u32 4294901760, %v858_v27  ;;  %v7806_v13 = vld [vmem:[#allocation88_spill] sm:$0xff]  ;;  %v7807_v3 = vld [vmem:[#allocation89_spill] sm:$0xff]  ;;  %v7811_v27 = vld [vmem:[#allocation154_spill] sm:$0xff] }
 0x11c   :  { %759 = vmatmul.mubr.f32.vlgmr.msra.gmra.mrb[0].mxu1 %v758_v38  ;;  %2011 = vmatmul.mubr.f32.vlgmr.msra.gmra.mrb[2].mxu0 %v758_v38  ;;  %v7804_v38 = vld [vmem:[#allocation149_spill] sm:$0xff]  ;;  %v7809_v34 = vld [vmem:[#allocation152_spill] sm:$0xff] }
 0x11d   :  { %4265 = vmatpush1.bf16.msra.mxu1 %v4264_v63  ;;  %4617 = vmatpush3.bf16.msra.mxu0 %v7800_v16  ;;  %v4272_v63 = vpack.c.bf16 %v835_v58, %v823_v4  ;;  %v4274_v26 = vpack.c.bf16 %v853_v10, %v841_v57  ;;  %v7805_v16 = vld [vmem:[#allocation150_spill] sm:$0xff]  ;;  %v4276_v44 = vpack.c.bf16 %v859_v60, %v847_v37  ;;  %v7810_v4 = vld [vmem:[#allocation153_spill] sm:$0xff]  ;;  %v7817_v57 = vld [vmem:[#allocation160_spill] sm:$0xff] }
 0x11e   :  { %1150 = vmatprep.mubr.f32.mxu1 %v6248_v6  ;;  %2241 = vmatprep.mubr.f32.mxu0 %v6248_v6  ;;  %v7814_v58 = vld [vmem:[#allocation157_spill] sm:$0xff]  ;;  %v7823_v60 = vld [vmem:[#allocation166_spill] sm:$0xff] }
 0x11f   :  { %4267 = vmatprep.subr.bf16.mxu1 %v4266_v41  ;;  %4619 = vmatprep.subr.bf16.mxu0 %v7802_v23  ;;  %v7812_v41 = vld [vmem:[#allocation155_spill] sm:$0xff]  ;;  %v7818_v10 = vld [vmem:[#allocation161_spill] sm:$0xff]  ;;  %v7819_v23 = vld [vmem:[#allocation162_spill] sm:$0xff] }
 0x120   :  { %v7822_v37 = vld [vmem:[#allocation165_spill] sm:$0xff] }
 0x121   :  { %4269 = vmatpush1.bf16.msra.mxu1 %v4268_v47  ;;  %4621 = vmatpush3.bf16.msra.mxu0 %v7803_v21  ;;  %v7813_v47 = vld [vmem:[#allocation156_spill] sm:$0xff]  ;;  %v7820_v21 = vld [vmem:[#allocation163_spill] sm:$0xff] }
 0x122   :  { %4271 = vmatprep.subr.bf16.mxu1 %v4270_v59  ;;  %4623 = vmatprep.subr.bf16.mxu0 %v7804_v38  ;;  %v7816_v59 = vld [vmem:[#allocation159_spill] sm:$0xff] }
 0x123   :  { %v7824_v38 = vld [vmem:[#allocation167_spill] sm:$0xff] }
 0x125   :  { %4273 = vmatpush1.bf16.msra.mxu1 %v4272_v63  ;;  %4625 = vmatpush3.bf16.msra.mxu0 %v7805_v16  ;;  %v7821_v63 = vld [vmem:[#allocation164_spill] sm:$0xff]  ;;  %v7826_v16 = vld [vmem:[#allocation50_spill] sm:$0xff] }
 0x126   :  { %4275 = vmatprep.subr.bf16.mxu1 %v4274_v26  ;;  %4627 = vmatprep.subr.bf16.mxu0 %v7806_v13  ;;  %v7825_v26 = vld [vmem:[#allocation52_spill] sm:$0xff]  ;;  %v7828_v13 = vld [vmem:[#allocation57_spill] sm:$0xff] }
 0x129   :  { %4277 = vmatpush1.bf16.msra.mxu1 %v4276_v44  ;;  %4629 = vmatpush3.bf16.msra.mxu0 %v7807_v3  ;;  %v7827_v44 = vpack.c.bf16 %v7825_v26, %v7826_v16  ;;  %v7829_v3 = vld [vmem:[#allocation55_spill] sm:$0xff] }
 0x12a   :  { %4279 = vmatprep.subr.bf16.mxu1 %v7808_v50  ;;  %4631 = vmatprep.subr.bf16.mxu0 %v7809_v34  ;;  %v7830_v50 = vpack.c.bf16 %v7828_v13, %v7829_v3  ;;  %v7831_v34 = vld [vmem:[#allocation62_spill] sm:$0xff] }
 0x12d   :  { %4281 = vmatpush1.bf16.msra.mxu1 %v7810_v4  ;;  %4633 = vmatpush3.bf16.msra.mxu0 %v7811_v27  ;;  %v7832_v4 = vld [vmem:[#allocation61_spill] sm:$0xff] }
 0x12e   :  { %4283 = vmatprep.subr.bf16.mxu1 %v7812_v41  ;;  %4635 = vmatprep.subr.bf16.mxu0 %v7813_v47  ;;  %v7833_v27 = vpack.c.bf16 %v7831_v34, %v7832_v4  ;;  %v7834_v41 = vld [vmem:[#allocation168_spill] sm:$0xff] }
 0x12f   :  { %v7835_v47 = vld [vmem:[#allocation68_spill] sm:$0xff] }
 0x131   :  { %4285 = vmatpush1.bf16.msra.mxu1 %v7814_v58  ;;  %4637 = vmatpush3.bf16.msra.mxu0 %v7815_v19  ;;  %v7836_v58 = vld [vmem:[#allocation65_spill] sm:$0xff] }
 0x132   :  { %4287 = vmatprep.subr.bf16.mxu1 %v7816_v59  ;;  %4639 = vmatprep.subr.bf16.mxu0 %v7817_v57  ;;  %v7837_v19 = vpack.c.bf16 %v7835_v47, %v7836_v58  ;;  %v7839_v59 = vld [vmem:[#allocation72_spill] sm:$0xff] }
 0x135   :  { %4289 = vmatpush1.bf16.msra.mxu1 %v7818_v10  ;;  %4641 = vmatpush3.bf16.msra.mxu0 %v7819_v23  ;;  %v7841_v10 = vld [vmem:[#allocation78_spill] sm:$0xff] }
 0x136   :  { %4291 = vmatprep.subr.bf16.mxu1 %v7820_v21  ;;  %4643 = vmatprep.subr.bf16.mxu0 %v7821_v63  ;;  %v7844_v21 = vld [vmem:[#allocation84_spill] sm:$0xff]  ;;  %v7845_v63 = vld [vmem:[#allocation82_spill] sm:$0xff] }
 0x139   :  { %4293 = vmatpush1.bf16.msra.mxu1 %v7822_v37  ;;  %4645 = vmatpush3.bf16.msra.mxu0 %v7823_v60  ;;  %v7846_v37 = vpack.c.bf16 %v7844_v21, %v7845_v63  ;;  %v7848_v60 = vld [vmem:[#allocation110_spill] sm:$0xff] }
 0x13a   :  { %4295 = vmatprep.subr.bf16.mxu1 %v7824_v38  ;;  %4647 = vmatprep.subr.bf16.mxu0 %v7827_v44  ;;  %v7851_v44 = vld [vmem:[#allocation169_spill] sm:$0xff] }
 0x13c   :  { %2243 = vmatmul.mubr.f32.vlgmr.msra.gmra.mrb[4].mxu0 %v6244_v22 }
 0x13d   :  { %4297 = vmatpush1.bf16.msra.mxu1 %v6033_v5  ;;  %4649 = vmatpush3.bf16.msra.mxu0 %v7830_v50  ;;  %v7838_v5 = vld [vmem:[#allocation73_spill] sm:$0xff]  ;;  %v7852_v50 = vld [vmem:[#allocation114_spill] sm:$0xff] }
 0x13e   :  { %2378 = vmatprep.mubr.f32.mxu0 %v6260_v39  ;;  %4299 = vmatprep.subr.bf16.mxu1 %v6037_v12  ;;  %v7840_v57 = vpack.c.bf16 %v7838_v5, %v7839_v59  ;;  %v7842_v12 = vld [vmem:[#allocation76_spill] sm:$0xff] }
 0x13f   :  { %4651 = vmatprep.subr.bf16.mxu0 %v7833_v27  ;;  %v7843_v23 = vpack.c.bf16 %v7841_v10, %v7842_v12 }
 0x141   :  { %4301 = vmatpush1.bf16.msra.mxu1 %v7834_v41  ;;  %4653 = vmatpush3.bf16.msra.mxu0 %v7837_v19  ;;  %v7855_v41 = vld [vmem:[#allocation170_spill] sm:$0xff] }
 0x142   :  { %4303 = vmatprep.subr.bf16.mxu1 %v6065_v46  ;;  %4655 = vmatprep.subr.bf16.mxu0 %v7840_v57  ;;  %v7847_v46 = vpack.c.bf16 %v7694_v35, %v7693_v24  ;;  %v7856_v19 = vld [vmem:[#allocation118_spill] sm:$0xff] }
 0x145   :  { %4305 = vmatpush1.bf16.msra.mxu1 %v6081_v29  ;;  %4657 = vmatpush3.bf16.msra.mxu0 %v7843_v23  ;;  %v7849_v29 = vld [vmem:[#allocation109_spill] sm:$0xff]  ;;  %v7859_v23 = vld [vmem:[#allocation171_spill] sm:$0xff] }
 0x146   :  { %4307 = vmatprep.subr.bf16.mxu1 %v6086_v42  ;;  %4659 = vmatprep.subr.bf16.mxu0 %v7846_v37  ;;  %v7850_v38 = vpack.c.bf16 %v7848_v60, %v7849_v29  ;;  %v7853_v42 = vld [vmem:[#allocation113_spill] sm:$0xff]  ;;  %v7860_v37 = vld [vmem:[#allocation122_spill] sm:$0xff] }
 0x147   :  { %v7854_v27 = vpack.c.bf16 %v7852_v50, %v7853_v42  ;;  %v7867_v50 = vld [vmem:[#allocation173_spill] sm:$0xff] }
 0x149   :  { %4309 = vmatpush1.bf16.msra.mxu1 %v6101_v40  ;;  %4661 = vmatpush3.bf16.msra.mxu0 %v7847_v46  ;;  %v7857_v40 = vld [vmem:[#allocation117_spill] sm:$0xff] }
 0x14a   :  { %4311 = vmatprep.subr.bf16.mxu1 %v6112_v7  ;;  %4663 = vmatprep.subr.bf16.mxu0 %v7850_v38  ;;  %v7858_v57 = vpack.c.bf16 %v7856_v19, %v7857_v40  ;;  %v7861_v7 = vld [vmem:[#allocation121_spill] sm:$0xff]  ;;  %v7864_v38 = vld [vmem:[#allocation127_spill] sm:$0xff]  ;;  %v7871_v19 = vld [vmem:[#allocation174_spill] sm:$0xff] }
 0x14b   :  { %v7862_v46 = vpack.c.bf16 %v7860_v37, %v7861_v7  ;;  %v7875_v37 = vld [vmem:[#allocation3_spill] sm:$0xff] }
 0x14d   :  { %4313 = vmatpush1.bf16.msra.mxu1 %v7851_v44  ;;  %4665 = vmatpush3.bf16.msra.mxu0 %v7854_v27  ;;  %v7865_v44 = vld [vmem:[#allocation126_spill] sm:$0xff]  ;;  %v7868_v27 = vld [vmem:[#allocation133_spill] sm:$0xff] }
 0x14e   :  { %4315 = vmatprep.subr.bf16.mxu1 %v7855_v41  ;;  %4667 = vmatprep.subr.bf16.mxu0 %v7858_v57  ;;  %v7866_v49 = vpack.c.bf16 %v7864_v38, %v7865_v44  ;;  %v7869_v41 = vld [vmem:[#allocation132_spill] sm:$0xff]  ;;  %v7872_v57 = vld [vmem:[#allocation139_spill] sm:$0xff] }
 0x14f   :  { %v7870_v42 = vpack.c.bf16 %v7868_v27, %v7869_v41  ;;  %v7878_v38 = vld [vmem:[#allocation144_spill] sm:$0xff] }
 0x151   :  { %4317 = vmatpush1.bf16.msra.mxu1 %v7859_v23  ;;  %4669 = vmatpush3.bf16.msra.mxu0 %v7862_v46  ;;  %v7873_v23 = vld [vmem:[#allocation138_spill] sm:$0xff]  ;;  %v7876_v46 = vld [vmem:[#allocation4_spill] sm:$0xff] }
 0x152   :  { %4319 = vmatprep.subr.bf16.mxu1 %v7863_v32  ;;  %4671 = vmatprep.subr.bf16.mxu0 %v7866_v49  ;;  %v7874_v40 = vpack.c.bf16 %v7872_v57, %v7873_v23  ;;  %v4326_v7 = vpack.c.bf16 %v7876_v46, %v7875_v37  ;;  %v7877_v32 = vld [vmem:[#allocation145_spill] sm:$0xff] }
 0x153   :  { %v7879_v49 = vpack.c.bf16 %v7877_v32, %v7878_v38 }
 0x155   :  { %4321 = vmatpush1.bf16.msra.mxu1 %v7867_v50  ;;  %4673 = vmatpush3.bf16.msra.mxu0 %v7870_v42  ;;  %v4328_v50 = vpack.c.bf16 %v7776_v43, %v7775_v2  ;;  %v7880_v42 = vld [vmem:[#allocation80_spill] sm:$0xff] }
 0x156   :  { %4323 = vmatprep.subr.bf16.mxu1 %v7871_v19  ;;  %4675 = vmatprep.subr.bf16.mxu0 %v7874_v40  ;;  %v4330_v19 = vpack.c.bf16 %v7778_v15, %v7777_v52  ;;  %v7881_v40 = vld [vmem:[#allocation91_spill] sm:$0xff]  ;;  %v4336_v15 = vpack.c.bf16 %v7791_v25, %v7789_v31  ;;  %v7888_v25 = vld [vmem:[#allocation28_spill] sm:$0xff]  ;;  %v7889_v31 = vld [vmem:[#allocation26_spill] sm:$0xff] }
 0x159   :  { %4325 = vmatpush1.bf16.msra.mxu1 %v6183_v56  ;;  %4677 = vmatpush3.bf16.msra.mxu0 %v7879_v49  ;;  %v4332_v56 = vpack.c.bf16 %v7780_v55, %v7779_v45  ;;  %v7882_v49 = vld [vmem:[#allocation92_spill] sm:$0xff]  ;;  %v7884_v55 = vld [vmem:[#allocation94_spill] sm:$0xff]  ;;  %v4340_v45 = vpack.c.bf16 %v7797_v53, %v7796_v18  ;;  %v7895_v53 = vld [vmem:[#allocation103_spill] sm:$0xff] }
 0x15a   :  { %4327 = vmatprep.subr.bf16.mxu1 %v4326_v7  ;;  %4679 = vmatprep.subr.bf16.mxu0 %v7880_v42  ;;  %v4334_v7 = vpack.c.bf16 %v7782_v17, %v7781_v14  ;;  %v7885_v17 = vld [vmem:[#allocation95_spill] sm:$0xff] }
 0x15b   :  { %v7891_v14 = vld [vmem:[#allocation99_spill] sm:$0xff] }
 0x15c   :  { %1152 = vmatmul.mubr.f32.vlgmr.msra.gmra.mrb[0].mxu1 %v6244_v22  ;;  %2381 = vmatmul.mubr.f32.vlgmr.msra.gmra.mrb[6].mxu0 %v6252_v62 }
 0x15d   :  { %4329 = vmatpush1.bf16.msra.mxu1 %v4328_v50  ;;  %1352 = vmatprep.mubr.f32.mxu1 %v6260_v39  ;;  %v7883_v50 = vld [vmem:[#allocation93_spill] sm:$0xff]  ;;  %v4338_v39 = vpack.c.bf16 %v7793_v36, %v7792_v54 }
 0x15e   :  { %4681 = vmatpush3.bf16.msra.mxu0 %v7881_v40  ;;  %2485 = vmatprep.mubr.f32.mxu0 %v6281_v9  ;;  %v7893_v36 = vld [vmem:[#allocation101_spill] sm:$0xff] }
 0x15f   :  { %4331 = vmatprep.subr.bf16.mxu1 %v4330_v19  ;;  %4683 = vmatprep.subr.bf16.mxu0 %v7882_v49  ;;  %v7886_v19 = vld [vmem:[#allocation96_spill] sm:$0xff] }
 0x161   :  { %4333 = vmatpush1.bf16.msra.mxu1 %v4332_v56  ;;  %v7887_v56 = vld [vmem:[#allocation97_spill] sm:$0xff] }
 0x162   :  { %4685 = vmatpush3.bf16.msra.mxu0 %v7883_v50  ;;  %4335 = vmatprep.subr.bf16.mxu1 %v4334_v7  ;;  %v7890_v7 = vpack.c.bf16 %v7888_v25, %v7889_v31  ;;  %v7897_v25 = vld [vmem:[#allocation105_spill] sm:$0xff]  ;;  %v7910_v31 = vld [vmem:[#allocation143_spill] sm:$0xff] }
 0x163   :  { %4687 = vmatprep.subr.bf16.mxu0 %v7884_v55 }
 0x165   :  { %4337 = vmatpush1.bf16.msra.mxu1 %v4336_v15  ;;  %v7892_v15 = vpack.c.bf16 %v7761_v1, %v7760_v20  ;;  %v7899_v1 = vld [vmem:[#allocation125_spill] sm:$0xff] }
 0x166   :  { %4689 = vmatpush3.bf16.msra.mxu0 %v7885_v17  ;;  %4339 = vmatprep.subr.bf16.mxu1 %v4338_v39  ;;  %v7894_v39 = vpack.c.bf16 %v7763_v0, %v7762_v51  ;;  %v7901_v0 = vld [vmem:[#allocation131_spill] sm:$0xff] }
 0x167   :  { %4691 = vmatprep.subr.bf16.mxu0 %v7886_v19 }
 0x169   :  { %4341 = vmatpush1.bf16.msra.mxu1 %v4340_v45  ;;  %v7896_v45 = vpack.c.bf16 %v7765_v8, %v7764_v33  ;;  %v7904_v8 = vld [vmem:[#allocation137_spill] sm:$0xff]  ;;  %v7906_v33 = vand.u32 4294901760, %v7825_v26 }
 0x16a   :  { %4693 = vmatpush3.bf16.msra.mxu0 %v7887_v56  ;;  %4343 = vmatprep.subr.bf16.mxu1 %v7890_v7  ;;  %v7898_v7 = vpack.c.bf16 %v7767_v11, %v7766_v61  ;;  %v7908_v61 = vld [vmem:[#allocation45_spill] sm:$0xff] }
 0x16b   :  { %4695 = vmatprep.subr.bf16.mxu0 %v7891_v14 }
 0x16d   :  { %4345 = vmatpush1.bf16.msra.mxu1 %v7892_v15  ;;  %v7900_v15 = vpack.c.bf16 %v7769_v28, %v7768_v48  ;;  %v7912_v28 = vld [vmem:[#allocation48_spill] sm:$0xff] }
 0x16e   :  { %4697 = vmatpush3.bf16.msra.mxu0 %v7893_v36  ;;  %4347 = vmatprep.subr.bf16.mxu1 %v7894_v39  ;;  %v7902_v39 = vld [vmem:[#allocation43_spill] sm:$0xff] }
 0x16f   :  { %4699 = vmatprep.subr.bf16.mxu0 %v7895_v53  ;;  %v7903_v51 = vpack.c.bf16 %v7771_v30, %v7902_v39  ;;  %v7914_v30 = vand.u32 4294901760, %v7829_v3  ;;  %v7925_v3 = vld [vmem:[#allocation59_spill] sm:$0xff] }
 0x171   :  { %4349 = vmatpush1.bf16.msra.mxu1 %v7896_v45  ;;  %v7905_v45 = vand.u32 4294901760, %v7826_v16  ;;  %v7916_v16 = vand.u32 4294901760, %v7832_v4 }
 0x172   :  { %4701 = vmatpush3.bf16.msra.mxu0 %v7897_v25  ;;  %4351 = vmatprep.subr.bf16.mxu1 %v7898_v7  ;;  %v7907_v7 = vld [vmem:[#allocation46_spill] sm:$0xff] }
 0x173   :  { %4703 = vmatprep.subr.bf16.mxu0 %v7899_v1  ;;  %v4710_v11 = vpack.c.bf16 %v7906_v33, %v7905_v45  ;;  %v7909_v20 = vpack.c.bf16 %v7907_v7, %v7908_v61  ;;  %v7917_v33 = vand.u32 4294901760, %v7831_v34  ;;  %v7918_v45 = vld [vmem:[#allocation6_spill] sm:$0xff]  ;;  %v7920_v7 = vld [vmem:[#allocation53_spill] sm:$0xff]  ;;  %v7927_v34 = vand.u32 4294901760, %v7839_v59 }
 0x174   :  { %v7937_v59 = vand.u32 4294901760, %v7845_v63  ;;  %v7947_v63 = vand.u32 4294901760, %v7849_v29 }
 0x175   :  { %4353 = vmatpush1.bf16.msra.mxu1 %v7900_v15  ;;  %v7911_v15 = vld [vmem:[#allocation49_spill] sm:$0xff]  ;;  %v4714_v26 = vpack.c.bf16 %v7917_v33, %v7916_v16  ;;  %v7929_v33 = vld [vmem:[#allocation64_spill] sm:$0xff] }
 0x176   :  { %4705 = vmatpush3.bf16.msra.mxu0 %v7901_v0  ;;  %4355 = vmatprep.subr.bf16.mxu1 %v7903_v51  ;;  %v7913_v48 = vpack.c.bf16 %v7911_v15, %v7912_v28  ;;  %v7915_v51 = vand.u32 4294901760, %v7828_v13  ;;  %v7923_v13 = vand.u32 4294901760, %v7835_v47  ;;  %v7935_v47 = vand.u32 4294901760, %v7842_v12 }
 0x177   :  { %4707 = vmatprep.subr.bf16.mxu0 %v7904_v8  ;;  %v7945_v12 = vand.u32 4294901760, %v7693_v24 }
 0x178   :  { %v4712_v39 = vpack.c.bf16 %v7915_v51, %v7914_v30  ;;  %v7928_v51 = vand.u32 4294901760, %v7838_v5  ;;  %v7938_v5 = vand.u32 4294901760, %v7844_v21  ;;  %v7948_v21 = vand.u32 4294901760, %v7848_v60 }
 0x179   :  { %4357 = vmatpush1.bf16.msra.mxu1 %v7909_v20  ;;  %v7919_v20 = vld [vmem:[#allocation54_spill] sm:$0xff] }
 0x17a   :  { %4709 = vmatpush3.bf16.msra.mxu0 %v7910_v31  ;;  %4359 = vmatprep.subr.bf16.mxu1 %v7913_v48  ;;  %v7921_v61 = vpack.c.bf16 %v7919_v20, %v7920_v7  ;;  %v7922_v48 = vand.u32 4294901760, %v7836_v58  ;;  %v4718_v16 = vpack.c.bf16 %v7928_v51, %v7927_v34  ;;  %v7932_v20 = vld [vmem:[#allocation70_spill] sm:$0xff]  ;;  %v7933_v58 = vld [vmem:[#allocation69_spill] sm:$0xff] }
 0x17b   :  { %4711 = vmatprep.subr.bf16.mxu0 %v4710_v11  ;;  %v7924_v11 = vld [vmem:[#allocation60_spill] sm:$0xff]  ;;  %v7934_v7 = vpack.c.bf16 %v7932_v20, %v7933_v58  ;;  %v7940_v34 = vld [vmem:[#allocation74_spill] sm:$0xff] }
 0x17c   :  { %v4716_v30 = vpack.c.bf16 %v7923_v13, %v7922_v48  ;;  %v7926_v4 = vpack.c.bf16 %v7924_v11, %v7925_v3  ;;  %v7936_v48 = vand.u32 4294901760, %v7841_v10  ;;  %v7946_v10 = vand.u32 4294901760, %v7694_v35 }
 0x17d   :  { %2489 = vmatmul.mubr.f32.vlgmr.msra.gmra.mrb[8].mxu0 %v7918_v45  ;;  %4361 = vmatpush1.bf16.msra.mxu1 %v7921_v61  ;;  %v7930_v61 = vld [vmem:[#allocation63_spill] sm:$0xff] }
 0x17e   :  { %4713 = vmatpush3.bf16.msra.mxu0 %v4712_v39  ;;  %2655 = vmatprep.mubr.f32.mxu0 %v6248_v6  ;;  %v7931_v39 = vpack.c.bf16 %v7929_v33, %v7930_v61  ;;  %v4720_v13 = vpack.c.bf16 %v7936_v48, %v7935_v47  ;;  %v7949_v47 = vld [vmem:[#allocation86_spill] sm:$0xff]  ;;  %v7950_v48 = vld [vmem:[#allocation85_spill] sm:$0xff] }
 0x17f   :  { %4363 = vmatprep.subr.bf16.mxu1 %v7926_v4  ;;  %4715 = vmatprep.subr.bf16.mxu0 %v4714_v26  ;;  %v4722_v26 = vpack.c.bf16 %v7938_v5, %v7937_v59  ;;  %v7939_v4 = vld [vmem:[#allocation75_spill] sm:$0xff]  ;;  %v7951_v59 = vpack.c.bf16 %v7949_v47, %v7950_v48 }
 0x180   :  { %v7941_v51 = vpack.c.bf16 %v7939_v4, %v7940_v34  ;;  %v7953_v5 = vld [vmem:[#allocation107_spill] sm:$0xff] }
 0x181   :  { %4365 = vmatpush1.bf16.msra.mxu1 %v7931_v39  ;;  %v7943_v39 = vld [vmem:[#allocation79_spill] sm:$0xff] }
 0x182   :  { %4717 = vmatpush3.bf16.msra.mxu0 %v4716_v30  ;;  %4367 = vmatprep.subr.bf16.mxu1 %v7934_v7  ;;  %v7942_v30 = vld [vmem:[#allocation81_spill] sm:$0xff]  ;;  %v4724_v7 = vpack.c.bf16 %v7946_v10, %v7945_v12  ;;  %v7961_v10 = vld [vmem:[#allocation118_spill] sm:$0xff] }
 0x183   :  { %4719 = vmatprep.subr.bf16.mxu0 %v4718_v16  ;;  %v7944_v20 = vpack.c.bf16 %v7942_v30, %v7943_v39  ;;  %v4726_v16 = vpack.c.bf16 %v7948_v21, %v7947_v63  ;;  %v7957_v30 = vld [vmem:[#allocation114_spill] sm:$0xff]  ;;  %v7962_v60 = vand.u32 4294901760, %v7961_v10  ;;  %v7963_v21 = vld [vmem:[#allocation112_spill] sm:$0xff]  ;;  %v7964_v39 = vld [vmem:[#allocation111_spill] sm:$0xff] }
 0x184   :  { %v7958_v35 = vand.u32 4294901760, %v7957_v30  ;;  %v7965_v47 = vpack.c.bf16 %v7963_v21, %v7964_v39  ;;  %v7976_v10 = vld [vmem:[#allocation120_spill] sm:$0xff] }
 0x185   :  { %4369 = vmatpush1.bf16.msra.mxu1 %v7941_v51 }
 0x186   :  { %4721 = vmatpush3.bf16.msra.mxu0 %v4720_v13  ;;  %4371 = vmatprep.subr.bf16.mxu1 %v7944_v20  ;;  %v7952_v13 = vld [vmem:[#allocation108_spill] sm:$0xff]  ;;  %v7955_v20 = vld [vmem:[#allocation113_spill] sm:$0xff] }
 0x187   :  { %4723 = vmatprep.subr.bf16.mxu0 %v4722_v26  ;;  %v7954_v51 = vpack.c.bf16 %v7952_v13, %v7953_v5  ;;  %v7956_v24 = vand.u32 4294901760, %v7955_v20  ;;  %v7959_v26 = vld [vmem:[#allocation117_spill] sm:$0xff]  ;;  %v7971_v5 = vld [vmem:[#allocation122_spill] sm:$0xff] }
 0x188   :  { %v7960_v29 = vand.u32 4294901760, %v7959_v26  ;;  %v7972_v30 = vand.u32 4294901760, %v7971_v5  ;;  %v7983_v5 = vand.u32 4294901760, %v7868_v27  ;;  %v7993_v27 = vand.u32 4294901760, %v7877_v32  ;;  %v8000_v32 = vld [vmem:[#allocation11_spill] sm:$0xff] }
 0x189   :  { %4373 = vmatpush1.bf16.msra.mxu1 %v7951_v59  ;;  %v4728_v12 = vpack.c.bf16 %v7958_v35, %v7956_v24  ;;  %v7967_v59 = vld [vmem:[#allocation115_spill] sm:$0xff] }
 0x18a   :  { %4725 = vmatpush3.bf16.msra.mxu0 %v4724_v7  ;;  %4375 = vmatprep.subr.bf16.mxu1 %v7954_v51  ;;  %v4730_v63 = vpack.c.bf16 %v7962_v60, %v7960_v29  ;;  %v7966_v7 = vld [vmem:[#allocation116_spill] sm:$0xff]  ;;  %v7969_v51 = vld [vmem:[#allocation121_spill] sm:$0xff]  ;;  %v7974_v35 = vld [vmem:[#allocation127_spill] sm:$0xff] }
 0x18b   :  { %4727 = vmatprep.subr.bf16.mxu0 %v4726_v16  ;;  %v7968_v13 = vpack.c.bf16 %v7966_v7, %v7967_v59  ;;  %v7970_v20 = vand.u32 4294901760, %v7969_v51  ;;  %v7973_v16 = vand.u32 4294901760, %v7865_v44  ;;  %v7975_v26 = vand.u32 4294901760, %v7974_v35  ;;  %v7977_v60 = vld [vmem:[#allocation119_spill] sm:$0xff] }
 0x18c   :  { %v7978_v21 = vpack.c.bf16 %v7976_v10, %v7977_v60  ;;  %v7984_v44 = vand.u32 4294901760, %v7873_v23  ;;  %v7995_v23 = vld [vmem:[#allocation141_spill] sm:$0xff] }
 0x18d   :  { %4377 = vmatpush1.bf16.msra.mxu1 %v7965_v47  ;;  %v4732_v24 = vpack.c.bf16 %v7972_v30, %v7970_v20  ;;  %v4734_v29 = vpack.c.bf16 %v7975_v26, %v7973_v16  ;;  %v7979_v47 = vld [vmem:[#allocation124_spill] sm:$0xff]  ;;  %v7986_v30 = vld [vmem:[#allocation130_spill] sm:$0xff]  ;;  %v7987_v16 = vld [vmem:[#allocation129_spill] sm:$0xff] }
 0x18e   :  { %4729 = vmatpush3.bf16.msra.mxu0 %v4728_v12  ;;  %4379 = vmatprep.subr.bf16.mxu1 %v7968_v13  ;;  %v7980_v12 = vld [vmem:[#allocation123_spill] sm:$0xff]  ;;  %v7982_v13 = vand.u32 4294901760, %v7869_v41  ;;  %v7988_v35 = vpack.c.bf16 %v7986_v30, %v7987_v16  ;;  %v7992_v41 = vand.u32 4294901760, %v7878_v38  ;;  %v7999_v38 = vld [vmem:[#allocation9_spill] sm:$0xff] }
 0x18f   :  { %4731 = vmatprep.subr.bf16.mxu0 %v4730_v63  ;;  %v7981_v7 = vpack.c.bf16 %v7979_v47, %v7980_v12  ;;  %v7985_v63 = vand.u32 4294901760, %v7872_v57  ;;  %v7997_v57 = vld [vmem:[#allocation2_spill] sm:$0xff] }
 0x190   :  { %v4736_v51 = vpack.c.bf16 %v7983_v5, %v7982_v13  ;;  %v7998_v5 = vld [vmem:[#allocation5_spill] sm:$0xff] }
 0x191   :  { %4381 = vmatpush1.bf16.msra.mxu1 %v7978_v21  ;;  %v4738_v20 = vpack.c.bf16 %v7985_v63, %v7984_v44  ;;  %v7989_v21 = vld [vmem:[#allocation136_spill] sm:$0xff]  ;;  %v8017_v44 = vld [vmem:[#allocation71_spill] sm:$0xff] }
 0x192   :  { %4733 = vmatpush3.bf16.msra.mxu0 %v4732_v24  ;;  %4383 = vmatprep.subr.bf16.mxu1 %v7981_v7  ;;  %v7990_v24 = vld [vmem:[#allocation134_spill] sm:$0xff]  ;;  %v4740_v7 = vpack.c.bf16 %v7993_v27, %v7992_v41  ;;  %v8019_v63 = vld [vmem:[#allocation83_spill] sm:$0xff]  ;;  %v8025_v41 = vld [vmem:[#allocation104_spill] sm:$0xff] }
 0x193   :  { %4735 = vmatprep.subr.bf16.mxu0 %v4734_v29  ;;  %v7991_v26 = vpack.c.bf16 %v7989_v21, %v7990_v24  ;;  %v7994_v29 = vld [vmem:[#allocation142_spill] sm:$0xff] }
 0x194   :  { %v7996_v13 = vpack.c.bf16 %v7994_v29, %v7995_v23  ;;  %v8026_v27 = vld [vmem:[#allocation106_spill] sm:$0xff] }
 0x195   :  { %4385 = vmatpush1.bf16.msra.mxu1 %v7988_v35  ;;  %v8023_v35 = vld [vmem:[#allocation100_spill] sm:$0xff] }
 0x196   :  { %4737 = vmatpush3.bf16.msra.mxu0 %v4736_v51  ;;  %4387 = vmatprep.subr.bf16.mxu1 %v7991_v26  ;;  %v8015_v51 = vld [vmem:[#allocation67_spill] sm:$0xff]  ;;  %v8024_v26 = vld [vmem:[#allocation102_spill] sm:$0xff] }
 0x197   :  { %4739 = vmatprep.subr.bf16.mxu0 %v4738_v20  ;;  %v8021_v20 = vld [vmem:[#allocation90_spill] sm:$0xff] }
 0x199   :  { %4389 = vmatpush1.bf16.msra.mxu1 %v7996_v13  ;;  %v8028_v13 = vld [vmem:[#allocation135_spill] sm:$0xff] }
 0x19a   :  { %4741 = vmatpush3.bf16.msra.mxu0 %v4740_v7  ;;  %4391 = vmatprep.subr.bf16.mxu1 %v7997_v57  ;;  %v8027_v7 = vld [vmem:[#allocation128_spill] sm:$0xff] }
 0x19b   :  { %4743 = vmatprep.subr.bf16.mxu0 %v7880_v42  ;;  %v8001_v42 = vld [vmem:[#allocation15_spill] sm:$0xff] }
 0x19c   :  { %1355 = vmatmul.mubr.f32.vlgmr.msra.gmra.mrb[0].mxu1 %v6252_v62  ;;  %v8002_v62 = vld [vmem:[#allocation17_spill] sm:$0xff] }
 0x19d   :  { %2657 = vmatmul.mubr.f32.vlgmr.msra.gmra.mrb[10].mxu0 %v6244_v22  ;;  %4393 = vmatpush1.bf16.msra.mxu1 %v7998_v5 }
 0x19e   :  { %1492 = vmatprep.mubr.f32.mxu1 %v6281_v9  ;;  %4745 = vmatpush3.bf16.msra.mxu0 %v7881_v40  ;;  %v8003_v9 = vld [vmem:[#allocation20_spill] sm:$0xff]  ;;  %v8004_v40 = vld [vmem:[#allocation23_spill] sm:$0xff] }
 0x19f   :  { %2759 = vmatprep.mubr.f32.mxu0 %v6248_v6  ;;  %4395 = vmatprep.subr.bf16.mxu1 %v7999_v38 }
 0x1a0   :  { %4747 = vmatprep.subr.bf16.mxu0 %v7882_v49  ;;  %v8005_v49 = vld [vmem:[#allocation27_spill] sm:$0xff] }
 0x1a1   :  { %4397 = vmatpush1.bf16.msra.mxu1 %v8000_v32 }
 0x1a2   :  { %4749 = vmatpush3.bf16.msra.mxu0 %v7883_v50  ;;  %4399 = vmatprep.subr.bf16.mxu1 %v8001_v42  ;;  %v8006_v50 = vld [vmem:[#allocation31_spill] sm:$0xff] }
 0x1a3   :  { %4751 = vmatprep.subr.bf16.mxu0 %v7884_v55  ;;  %v8007_v55 = vld [vmem:[#allocation32_spill] sm:$0xff] }
 0x1a5   :  { %4401 = vmatpush1.bf16.msra.mxu1 %v8002_v62 }
 0x1a6   :  { %4753 = vmatpush3.bf16.msra.mxu0 %v7885_v17  ;;  %4403 = vmatprep.subr.bf16.mxu1 %v8003_v9  ;;  %v8008_v17 = vld [vmem:[#allocation39_spill] sm:$0xff] }
 0x1a7   :  { %4755 = vmatprep.subr.bf16.mxu0 %v7886_v19  ;;  %v8009_v19 = vld [vmem:[#allocation42_spill] sm:$0xff] }
 0x1a9   :  { %4405 = vmatpush1.bf16.msra.mxu1 %v8004_v40 }
 0x1aa   :  { %4757 = vmatpush3.bf16.msra.mxu0 %v7887_v56  ;;  %4407 = vmatprep.subr.bf16.mxu1 %v8005_v49  ;;  %v8010_v56 = vld [vmem:[#allocation47_spill] sm:$0xff] }
 0x1ab   :  { %4759 = vmatprep.subr.bf16.mxu0 %v7891_v14  ;;  %v8011_v14 = vld [vmem:[#allocation51_spill] sm:$0xff] }
 0x1ad   :  { %4409 = vmatpush1.bf16.msra.mxu1 %v8006_v50 }
 0x1ae   :  { %4761 = vmatpush3.bf16.msra.mxu0 %v7893_v36  ;;  %4411 = vmatprep.subr.bf16.mxu1 %v8007_v55  ;;  %v8012_v36 = vld [vmem:[#allocation56_spill] sm:$0xff] }
 0x1af   :  { %4763 = vmatprep.subr.bf16.mxu0 %v7895_v53  ;;  %v8013_v53 = vld [vmem:[#allocation58_spill] sm:$0xff] }
 0x1b1   :  { %4413 = vmatpush1.bf16.msra.mxu1 %v8008_v17 }
 0x1b2   :  { %4765 = vmatpush3.bf16.msra.mxu0 %v7897_v25  ;;  %4415 = vmatprep.subr.bf16.mxu1 %v8009_v19  ;;  %v8014_v25 = vld [vmem:[#allocation66_spill] sm:$0xff] }
 0x1b3   :  { %4767 = vmatprep.subr.bf16.mxu0 %v7899_v1  ;;  %v8016_v1 = vmov 0.0  }
 0x1b5   :  { %4417 = vmatpush1.bf16.msra.mxu1 %v8010_v56 }
 0x1b6   :  { %4769 = vmatpush3.bf16.msra.mxu0 %v7901_v0  ;;  %4419 = vmatprep.subr.bf16.mxu1 %v8011_v14  ;;  %v8018_v0 = vld [vmem:[#allocation77_spill] sm:$0xff] }
 0x1b7   :  { %4771 = vmatprep.subr.bf16.mxu0 %v7904_v8  ;;  %v8020_v8 = vld [vmem:[#allocation87_spill] sm:$0xff] }
 0x1b9   :  { %4421 = vmatpush1.bf16.msra.mxu1 %v8012_v36 }
 0x1ba   :  { %4773 = vmatpush3.bf16.msra.mxu0 %v7910_v31  ;;  %4423 = vmatprep.subr.bf16.mxu1 %v8013_v53  ;;  %v8022_v31 = vld [vmem:[#allocation98_spill] sm:$0xff] }
 0x1bd   :  { %2761 = vmatmul.mubr.f32.vlgmr.msra.gmra.mrb[12].mxu0 %v6244_v22  ;;  %4425 = vmatpush1.bf16.msra.mxu1 %v8014_v25 }
 0x1be   :  { %4427 = vmatprep.subr.bf16.mxu1 %v8015_v51  ;;  %2908 = vmatprep.mubr.f32.mxu0 %v8016_v1  ;;  %v8029_v1 = vand.u32 4294901760, %v7875_v37  ;;  %v8037_v37 = vld [vmem:[#allocation12_spill] sm:$0xff] }
 0x1c1   :  { %4429 = vmatpush1.bf16.msra.mxu1 %v8017_v44 }
 0x1c2   :  { %4431 = vmatprep.subr.bf16.mxu1 %v8018_v0 }
 0x1c5   :  { %4433 = vmatpush1.bf16.msra.mxu1 %v8019_v63 }
 0x1c6   :  { %4435 = vmatprep.subr.bf16.mxu1 %v8020_v8  ;;  %v8030_v8 = vand.u32 4294901760, %v7876_v46  ;;  %v8038_v46 = vand.u32 4294901760, %v8037_v37 }
 0x1c8   :  { %v4454_v63 = vpack.c.bf16 %v8030_v8, %v8029_v1  ;;  %v8039_v1 = vld [vmem:[#allocation13_spill] sm:$0xff] }
 0x1c9   :  { %4437 = vmatpush1.bf16.msra.mxu1 %v8021_v20  ;;  %v8031_v20 = vld [vmem:[#allocation140_spill] sm:$0xff]  ;;  %v8040_v8 = vand.u32 4294901760, %v8039_v1 }
 0x1ca   :  { %4439 = vmatprep.subr.bf16.mxu1 %v8022_v31  ;;  %v8032_v31 = vand.u32 4294901760, %v7775_v2  ;;  %v8041_v2 = vld [vmem:[#allocation14_spill] sm:$0xff] }
 0x1cd   :  { %4441 = vmatpush1.bf16.msra.mxu1 %v8023_v35  ;;  %v8033_v35 = vand.u32 4294901760, %v7776_v43  ;;  %v8042_v43 = vand.u32 4294901760, %v8041_v2  ;;  %v8055_v2 = vld [vmem:[#allocation26_spill] sm:$0xff] }
 0x1ce   :  { %4443 = vmatprep.subr.bf16.mxu1 %v8024_v26 }
 0x1cf   :  { %v4456_v26 = vpack.c.bf16 %v8033_v35, %v8032_v31  ;;  %v8043_v31 = vld [vmem:[#allocation16_spill] sm:$0xff] }
 0x1d1   :  { %4445 = vmatpush1.bf16.msra.mxu1 %v8025_v41  ;;  %v8034_v41 = vand.u32 4294901760, %v7777_v52  ;;  %v8045_v52 = vld [vmem:[#allocation18_spill] sm:$0xff] }
 0x1d2   :  { %4447 = vmatprep.subr.bf16.mxu1 %v8026_v27  ;;  %v8035_v27 = vld [vmem:[#allocation10_spill] sm:$0xff] }
 0x1d3   :  { %v8036_v0 = vand.u32 4294901760, %v8035_v27  ;;  %v8046_v27 = vand.u32 4294901760, %v8045_v52  ;;  %v8059_v52 = vld [vmem:[#allocation29_spill] sm:$0xff] }
 0x1d5   :  { %4449 = vmatpush1.bf16.msra.mxu1 %v8027_v7  ;;  %v4458_v7 = vpack.c.bf16 %v8036_v0, %v8034_v41  ;;  %v8047_v0 = vld [vmem:[#allocation19_spill] sm:$0xff] }
 0x1d6   :  { %4451 = vmatprep.subr.bf16.mxu1 %v8028_v13  ;;  %v8048_v41 = vand.u32 4294901760, %v8047_v0  ;;  %v8050_v13 = vld [vmem:[#allocation22_spill] sm:$0xff] }
 0x1d7   :  { %v8051_v37 = vand.u32 4294901760, %v8050_v13  ;;  %v8063_v13 = vld [vmem:[#allocation33_spill] sm:$0xff] }
 0x1d9   :  { %4453 = vmatpush1.bf16.msra.mxu1 %v8031_v20  ;;  %v4460_v20 = vpack.c.bf16 %v8040_v8, %v8038_v46  ;;  %v8053_v46 = vld [vmem:[#allocation25_spill] sm:$0xff] }
 0x1da   :  { %4455 = vmatprep.subr.bf16.mxu1 %v4454_v63  ;;  %v8044_v63 = vand.u32 4294901760, %v8043_v31  ;;  %v8054_v1 = vand.u32 4294901760, %v8053_v46 }
 0x1dc   :  { %1496 = vmatmul.mubr.f32.vlgmr.msra.gmra.mrb[0].mxu1 %v7918_v45  ;;  %v4462_v35 = vpack.c.bf16 %v8044_v63, %v8042_v43  ;;  %v4464_v45 = vpack.c.bf16 %v8048_v41, %v8046_v27  ;;  %v8057_v43 = vld [vmem:[#allocation28_spill] sm:$0xff]  ;;  %v8061_v27 = vld [vmem:[#allocation30_spill] sm:$0xff]  ;;  %v8064_v41 = vand.u32 4294901760, %v8063_v13  ;;  %v8077_v13 = vld [vmem:[#allocation41_spill] sm:$0xff] }
 0x1dd   :  { %4457 = vmatpush1.bf16.msra.mxu1 %v4456_v26  ;;  %1759 = vmatprep.mubr.f32.mxu1 %v6248_v6  ;;  %v8049_v26 = vand.u32 4294901760, %v7792_v54  ;;  %v8058_v31 = vand.u32 4294901760, %v8057_v43  ;;  %v8062_v54 = vand.u32 4294901760, %v8061_v27  ;;  %v8075_v27 = vld [vmem:[#allocation40_spill] sm:$0xff] }
 0x1de   :  { %4459 = vmatprep.subr.bf16.mxu1 %v4458_v7  ;;  %v8052_v7 = vand.u32 4294901760, %v7796_v18 }
 0x1df   :  { %v4466_v44 = vpack.c.bf16 %v8051_v37, %v8049_v26  ;;  %v8067_v37 = vld [vmem:[#allocation35_spill] sm:$0xff] }
 0x1e0   :  { %v4468_v8 = vpack.c.bf16 %v8054_v1, %v8052_v7  ;;  %v8069_v7 = vld [vmem:[#allocation36_spill] sm:$0xff] }
 0x1e1   :  { %4461 = vmatpush1.bf16.msra.mxu1 %v4460_v20  ;;  %v8056_v20 = vand.u32 4294901760, %v8055_v2  ;;  %v8070_v46 = vand.u32 4294901760, %v8069_v7  ;;  %v8071_v2 = vld [vmem:[#allocation37_spill] sm:$0xff] }
 0x1e2   :  { %4463 = vmatprep.subr.bf16.mxu1 %v4462_v35  ;;  %v8060_v35 = vand.u32 4294901760, %v8059_v52  ;;  %v8083_v7 = vld [vmem:[#allocation45_spill] sm:$0xff] }
 0x1e3   :  { %v4470_v63 = vpack.c.bf16 %v8058_v31, %v8056_v20  ;;  %v8073_v20 = vld [vmem:[#allocation38_spill] sm:$0xff] }
 0x1e4   :  { %v4472_v0 = vpack.c.bf16 %v8062_v54, %v8060_v35  ;;  %v8074_v43 = vand.u32 4294901760, %v8073_v20  ;;  %v8076_v54 = vand.u32 4294901760, %v8075_v27  ;;  %v8091_v27 = vld [vmem:[#allocation54_spill] sm:$0xff] }
 0x1e5   :  { %4465 = vmatpush1.bf16.msra.mxu1 %v4464_v45  ;;  %v8065_v45 = vld [vmem:[#allocation34_spill] sm:$0xff] }
 0x1e6   :  { %4467 = vmatprep.subr.bf16.mxu1 %v4466_v44  ;;  %v8066_v18 = vand.u32 4294901760, %v8065_v45  ;;  %v8068_v44 = vand.u32 4294901760, %v8067_v37  ;;  %v8079_v45 = vld [vmem:[#allocation43_spill] sm:$0xff]  ;;  %v8081_v37 = vld [vmem:[#allocation44_spill] sm:$0xff] }
 0x1e8   :  { %v4474_v26 = vpack.c.bf16 %v8066_v18, %v8064_v41  ;;  %v4476_v1 = vpack.c.bf16 %v8070_v46, %v8068_v44  ;;  %v8078_v41 = vand.u32 4294901760, %v8077_v13  ;;  %v8080_v18 = vand.u32 4294901760, %v8079_v45 }
 0x1e9   :  { %4469 = vmatpush1.bf16.msra.mxu1 %v4468_v8  ;;  %v8072_v8 = vand.u32 4294901760, %v8071_v2  ;;  %v8082_v44 = vand.u32 4294901760, %v8081_v37  ;;  %v8084_v46 = vand.u32 4294901760, %v8083_v7  ;;  %v8085_v2 = vld [vmem:[#allocation46_spill] sm:$0xff] }
 0x1ea   :  { %4471 = vmatprep.subr.bf16.mxu1 %v4470_v63 }
 0x1eb   :  { %v4478_v31 = vpack.c.bf16 %v8074_v43, %v8072_v8  ;;  %v8086_v8 = vand.u32 4294901760, %v8085_v2  ;;  %v8088_v43 = vand.u32 4294901760, %v7911_v15  ;;  %v8097_v15 = vand.u32 4294901760, %v7933_v58 }
 0x1ed   :  { %4473 = vmatpush1.bf16.msra.mxu1 %v4472_v0  ;;  %v4480_v0 = vpack.c.bf16 %v8078_v41, %v8076_v54  ;;  %v4484_v20 = vpack.c.bf16 %v8086_v8, %v8084_v46  ;;  %v8092_v54 = vand.u32 4294901760, %v8091_v27  ;;  %v8093_v41 = vand.u32 4294901760, %v7925_v3  ;;  %v8111_v27 = vld [vmem:[#allocation108_spill] sm:$0xff] }
 0x1ee   :  { %4475 = vmatprep.subr.bf16.mxu1 %v4474_v26  ;;  %v4482_v26 = vpack.c.bf16 %v8082_v44, %v8080_v18  ;;  %v8095_v18 = vand.u32 4294901760, %v7930_v61  ;;  %v8098_v44 = vld [vmem:[#allocation70_spill] sm:$0xff]  ;;  %v8100_v46 = vand.u32 4294901760, %v7940_v34  ;;  %v8101_v3 = vand.u32 4294901760, %v7939_v4  ;;  %v8113_v4 = vld [vmem:[#allocation175_spill] sm:$0xff] }
 0x1ef   :  { %v4020_v52 = vpop.f32.mrb[2].mxu0  ;;  %v8112_v34 = vand.u32 4294901760, %v8111_v27 }
 0x1f0   :  { %v4021_v35 = vpop.f32.mrb[3].mxu0  ;;  %v4496_v2 = vpack.c.bf16 %v8101_v3, %v8100_v46  ;;  %v8122_v3 = vand.u32 4294901760, %v7980_v12 }
 0x1f1   :  { %4477 = vmatpush1.bf16.msra.mxu1 %v4476_v1  ;;  %v4022_v63 = vadd.f32 %v4021_v35, %v4020_v52  ;;  %v8087_v1 = vand.u32 4294901760, %v7912_v28  ;;  %v8089_v35 = vld [vmem:[#allocation53_spill] sm:$0xff]  ;;  %v8096_v28 = vand.u32 4294901760, %v7929_v33  ;;  %v8106_v33 = vand.u32 4294901760, %v7950_v48 }
 0x1f2   :  { %4479 = vmatprep.subr.bf16.mxu1 %v4478_v31  ;;  %v8090_v31 = vand.u32 4294901760, %v8089_v35  ;;  %v8109_v35 = vld [vmem:[#allocation107_spill] sm:$0xff] }
 0x1f3   :  { %v4486_v52 = vpack.c.bf16 %v8088_v43, %v8087_v1  ;;  %v4492_v37 = vpack.c.bf16 %v8096_v28, %v8095_v18  ;;  %v8107_v43 = vld [vmem:[#allocation86_spill] sm:$0xff]  ;;  %v8117_v28 = vand.u32 4294901760, %v7967_v59 }
 0x1f4   :  { %v4488_v13 = vpack.c.bf16 %v8092_v54, %v8090_v31  ;;  %v8108_v58 = vand.u32 4294901760, %v8107_v43  ;;  %v8110_v31 = vand.u32 4294901760, %v8109_v35  ;;  %v6746_v48 = vld [vmem:[%s7117_s0 + $0x2] ss:$8 sm:$0x7] }
 0x1f5   :  { %4481 = vmatpush1.bf16.msra.mxu1 %v4480_v0  ;;  %v8094_v0 = vand.u32 4294901760, %v7924_v11  ;;  %v8102_v11 = vld [vmem:[#allocation79_spill] sm:$0xff] }
 0x1f6   :  { %4483 = vmatprep.subr.bf16.mxu1 %v4482_v26  ;;  %v8099_v26 = vand.u32 4294901760, %v8098_v44  ;;  %v8103_v8 = vand.u32 4294901760, %v8102_v11  ;;  %v4502_v54 = vpack.c.bf16 %v8112_v34, %v8110_v31  ;;  %v8143_v34 = vsub.s32 1, %v8113_v4 }
 0x1f7   :  { %v4490_v45 = vpack.c.bf16 %v8094_v0, %v8093_v41  ;;  %v8114_v41 = vand.u32 4294901760, %v7964_v39  ;;  %v8115_v0 = vld [vmem:[#allocation112_spill] sm:$0xff]  ;;  %v8121_v39 = vand.u32 4294901760, %v7976_v10  ;;  %v8126_v10 = vand.u32 4294901760, %v7990_v24  ;;  %v8130_v24 = vld [vmem:[#allocation71_spill] sm:$0xff] }
 0x1f8   :  { %v4494_v7 = vpack.c.bf16 %v8099_v26, %v8097_v15 }
 0x1f9   :  { %4485 = vmatpush1.bf16.msra.mxu1 %v4484_v20  ;;  %v8104_v20 = vld [vmem:[#allocation81_spill] sm:$0xff] }
 0x1fa   :  { %4487 = vmatprep.subr.bf16.mxu1 %v4486_v52  ;;  %v8105_v61 = vand.u32 4294901760, %v8104_v20  ;;  %v4500_v52 = vpack.c.bf16 %v8108_v58, %v8106_v33  ;;  %v8125_v33 = vand.u32 4294901760, %v7986_v30 }
 0x1fc   :  { %v4498_v1 = vpack.c.bf16 %v8105_v61, %v8103_v8 }
 0x1fd   :  { %4489 = vmatpush1.bf16.msra.mxu1 %v4488_v13  ;;  %v615_v13 = vsub.s32 2, %v8113_v4 }
 0x1fe   :  { %4491 = vmatprep.subr.bf16.mxu1 %v4490_v45  ;;  %v8116_v45 = vand.u32 4294901760, %v8115_v0 }
 0x1ff   :  { %v616_v26 = vrot.slane %v6746_v48, %v615_v13  ;;  %v8144_v13 = vsub.s32 0, %v8113_v4 }
 0x200   :  { %v4504_v18 = vpack.c.bf16 %v8116_v45, %v8114_v41 }
 0x201   :  { %4493 = vmatpush1.bf16.msra.mxu1 %v4492_v37  ;;  %v8118_v37 = vld [vmem:[#allocation116_spill] sm:$0xff]  ;;  %v2013_v59 = vadd.f32 %v4022_v63, %v616_v26  ;;  %v608_v41 = vrot.slane %v6746_v48, %v8144_v13 }
 0x202   :  { %4495 = vmatprep.subr.bf16.mxu1 %v4494_v7  ;;  %v8119_v15 = vand.u32 4294901760, %v8118_v37  ;;  %v8120_v7 = vand.u32 4294901760, %v7977_v60  ;;  %v8127_v60 = vand.u32 4294901760, %v7989_v21 }
 0x204   :  { %v4506_v44 = vpack.c.bf16 %v8119_v15, %v8117_v28  ;;  %v4508_v46 = vpack.c.bf16 %v8121_v39, %v8120_v7  ;;  %v4514_v58 = vpack.c.bf16 %v8127_v60, %v8126_v10  ;;  %v8145_v7 = vlaneseq }
 0x205   :  { %4497 = vmatpush1.bf16.msra.mxu1 %v4496_v2  ;;  %v8123_v2 = vand.u32 4294901760, %v7979_v47  ;;  %v8128_v47 = vand.u32 4294901760, %v7995_v23  ;;  %v8132_v23 = vld [vmem:[#allocation83_spill] sm:$0xff] }
 0x206   :  { %4499 = vmatprep.subr.bf16.mxu1 %v4498_v1  ;;  %v8124_v1 = vand.u32 4294901760, %v7987_v16  ;;  %v2777_v39 = vand.u32 127, %v8145_v7 }
 0x207   :  { %v4510_v11 = vpack.c.bf16 %v8123_v2, %v8122_v3 }
 0x208   :  { %v4512_v43 = vpack.c.bf16 %v8125_v33, %v8124_v1  ;;  %vm2783_vm4 = vcmp.lt.s32.totalorder %v2777_v39, 36  ;;  %v2797_v1 = vld [vmem:[%s7119_s3] sm:$0xff] }
 0x209   :  { %4501 = vmatpush1.bf16.msra.mxu1 %v4500_v52  ;;  %v8129_v52 = vand.u32 4294901760, %v7994_v29  ;;  %v8131_v29 = vld [vmem:[#allocation77_spill] sm:$0xff]  ;;  %v2801_v33 = vld [vmem:[%s7119_s3 + $0x20] sm:$0xff]  ;;  %v2836_v10 = vand.u32 4294901760, %v2797_v1 }
 0x20a   :  { %4503 = vmatprep.subr.bf16.mxu1 %v4502_v54  ;;  %v612_v54 = vrot.slane %v6746_v48, %v8143_v34  ;;  %v2840_v60 = vand.u32 4294901760, %v2801_v33 }
 0x20b   :  { %v4516_v63 = vpack.c.bf16 %v8129_v52, %v8128_v47  ;;  %v2805_v47 = vld [vmem:[%s7119_s3 + $0x40] sm:$0xff] }
 0x20c   :  { %v2809_v52 = vld [vmem:[%s7119_s3 + $0x60] sm:$0xff] }
 0x20d   :  { %4505 = vmatpush1.bf16.msra.mxu1 %v4504_v18 }
 0x20e   :  { %4507 = vmatprep.subr.bf16.mxu1 %v4506_v44 }
 0x20f   :  { %v4055_v8 = vpop.f32.mrb[4].mxu0 }
 0x210   :  { %v4056_v20 = vpop.f32.mrb[5].mxu0 }
 0x211   :  { %v4057_v61 = vadd.f32 %v4056_v20, %v4055_v8  ;;  %4509 = vmatpush1.bf16.msra.mxu1 %v4508_v46  ;;  %v2798_v8 = vld [vmem:[%s7119_s3 + $0x8] sm:$0xff] }
 0x212   :  { %4511 = vmatprep.subr.bf16.mxu1 %v4510_v11  ;;  %v2802_v20 = vld [vmem:[%s7119_s3 + $0x28] sm:$0xff] }
 0x213   :  { %v2245_v12 = vadd.f32 %v4057_v61, %v2013_v59  ;;  %v2834_v59 = vand.u32 4294901760, %v2798_v8  ;;  %v2838_v61 = vand.u32 4294901760, %v2802_v20 }
 0x215   :  { %4513 = vmatpush1.bf16.msra.mxu1 %v4512_v43  ;;  %v2806_v43 = vld [vmem:[%s7119_s3 + $0x48] sm:$0xff] }
 0x216   :  { %4515 = vmatprep.subr.bf16.mxu1 %v4514_v58  ;;  %v2810_v58 = vld [vmem:[%s7119_s3 + $0x68] sm:$0xff] }
 0x219   :  { %4517 = vmatpush1.bf16.msra.mxu1 %v4516_v63  ;;  %v6843_v63 = vpack.c.bf16 %v2838_v61, %v2834_v59 }
 0x21a   :  { %4519 = vmatprep.subr.bf16.mxu1 %v7997_v57  ;;  %v8133_v57 = vld [vmem:[#allocation87_spill] sm:$0xff] }
 0x21b   :  { %4775 = vmatprep.subr.bf16.mxu0 %v6843_v63 }
 0x21c   :  { %1761 = vmatmul.mubr.f32.vlgmr.msra.gmra.mrb[0].mxu1 %v6244_v22 }
 0x21d   :  { %4521 = vmatpush1.bf16.msra.mxu1 %v7998_v5  ;;  %1896 = vmatprep.mubr.f32.mxu1 %v6248_v6  ;;  %v8134_v5 = vld [vmem:[#allocation90_spill] sm:$0xff] }
 0x21e   :  { %4523 = vmatprep.subr.bf16.mxu1 %v7999_v38  ;;  %v8135_v38 = vld [vmem:[#allocation98_spill] sm:$0xff] }
 0x221   :  { %4525 = vmatpush1.bf16.msra.mxu1 %v8000_v32  ;;  %v8136_v32 = vld [vmem:[#allocation100_spill] sm:$0xff] }
 0x222   :  { %4527 = vmatprep.subr.bf16.mxu1 %v8001_v42  ;;  %v8137_v42 = vld [vmem:[#allocation102_spill] sm:$0xff] }
 0x225   :  { %4529 = vmatpush1.bf16.msra.mxu1 %v8002_v62 }
 0x226   :  { %4531 = vmatprep.subr.bf16.mxu1 %v8003_v9 }
 0x229   :  { %4533 = vmatpush1.bf16.msra.mxu1 %v8004_v40  ;;  %v8138_v40 = vld [vmem:[#allocation104_spill] sm:$0xff] }
 0x22a   :  { %4535 = vmatprep.subr.bf16.mxu1 %v8005_v49 }
 0x22d   :  { %4537 = vmatpush1.bf16.msra.mxu1 %v8006_v50  ;;  %v8139_v50 = vld [vmem:[#allocation106_spill] sm:$0xff] }
 0x22e   :  { %4539 = vmatprep.subr.bf16.mxu1 %v8007_v55 }
 0x22f   :  { %v4090_v30 = vpop.f32.mrb[6].mxu0 }
 0x230   :  { %v4091_v6 = vpop.f32.mrb[7].mxu0 }
 0x231   :  { %v4092_v16 = vadd.f32 %v4091_v6, %v4090_v30  ;;  %4541 = vmatpush1.bf16.msra.mxu1 %v8008_v17  ;;  %v8140_v17 = vld [vmem:[#allocation128_spill] sm:$0xff]  ;;  %v6845_v30 = vsub.f32 %v2798_v8, %v2834_v59  ;;  %v6847_v6 = vsub.f32 %v2802_v20, %v2838_v61 }
 0x232   :  { %4543 = vmatprep.subr.bf16.mxu1 %v8009_v19  ;;  %v8141_v19 = vld [vmem:[#allocation135_spill] sm:$0xff] }
 0x233   :  { %v2383_v21 = vadd.f32 %v4092_v16, %v2245_v12  ;;  %v2842_v12 = vand.u32 4294901760, %v2806_v43  ;;  %v2846_v16 = vand.u32 4294901760, %v2810_v58 }
 0x235   :  { %4545 = vmatpush1.bf16.msra.mxu1 %v8010_v56  ;;  %v8142_v56 = vld [vmem:[#allocation140_spill] sm:$0xff] }
 0x236   :  { %4547 = vmatprep.subr.bf16.mxu1 %v8011_v14 }
 0x239   :  { %4549 = vmatpush1.bf16.msra.mxu1 %v8012_v36 }
 0x23a   :  { %4551 = vmatprep.subr.bf16.mxu1 %v8013_v53 }
 0x23d   :  { %4553 = vmatpush1.bf16.msra.mxu1 %v8014_v25 }
 0x23e   :  { %4555 = vmatprep.subr.bf16.mxu1 %v8015_v51 }
 0x241   :  { %4557 = vmatpush1.bf16.msra.mxu1 %v8130_v24  ;;  %v2813_v24 = vld [vmem:[%s7119_s3 + $0x80] sm:$0xf] }
 0x242   :  { %4559 = vmatprep.subr.bf16.mxu1 %v8131_v29  ;;  %v6855_v29 = vpack.c.bf16 %v2840_v60, %v2836_v10 }
 0x244   :  { %4777 = vmatpush1.bf16.msra.mxu0 %v6855_v29 }
 0x245   :  { %4561 = vmatpush1.bf16.msra.mxu1 %v8132_v23  ;;  %v6857_v23 = vsub.f32 %v2797_v1, %v2836_v10 }
 0x246   :  { %4563 = vmatprep.subr.bf16.mxu1 %v8133_v57  ;;  %v6859_v57 = vsub.f32 %v2801_v33, %v2840_v60 }
 0x248   :  { %v4792_v8 = vpack.c.bf16 %v6859_v57, %v6857_v23 }
 0x249   :  { %4565 = vmatpush1.bf16.msra.mxu1 %v8134_v5  ;;  %v6861_v5 = vsub.f32 %v2806_v43, %v2842_v12 }
 0x24a   :  { %4567 = vmatprep.subr.bf16.mxu1 %v8135_v38  ;;  %v6864_v38 = vpack.c.bf16 %v2846_v16, %v2842_v12 }
 0x24c   :  { %4779 = vmatprep.subr.bf16.mxu0 %v6864_v38 }
 0x24d   :  { %4569 = vmatpush1.bf16.msra.mxu1 %v8136_v32  ;;  %v6866_v32 = vsub.f32 %v2810_v58, %v2846_v16 }
 0x24e   :  { %4571 = vmatprep.subr.bf16.mxu1 %v8137_v42  ;;  %v2844_v42 = vand.u32 4294901760, %v2805_v47 }
 0x24f   :  { %v2958_v13 = vand.u32 4294901760, %v6866_v32  ;;  %v4794_v20 = vpack.c.bf16 %v6866_v32, %v6861_v5 }
 0x250   :  { %v4125_v62 = vpop.f32.mrb[8].mxu0 }
 0x251   :  { %v4126_v9 = vpop.f32.mrb[9].mxu0  ;;  %4573 = vmatpush1.bf16.msra.mxu1 %v8138_v40  ;;  %v6871_v40 = vsel %vm2821_vm5, %v2813_v24, 0 }
 0x252   :  { %v4127_v49 = vadd.f32 %v4126_v9, %v4125_v62  ;;  %4575 = vmatprep.subr.bf16.mxu1 %v8139_v50  ;;  %v2848_v62 = vand.u32 4294901760, %v2809_v52  ;;  %v2934_v50 = vand.u32 4294901760, %v6847_v6 }
 0x254   :  { %v2491_v55 = vadd.f32 %v4127_v49, %v2383_v21  ;;  %v2814_v21 = vld [vmem:[%s7119_s3 + $0x88] sm:$0xf]  ;;  %v2922_v49 = vand.u32 4294901760, %v6845_v30 }
 0x255   :  { %4577 = vmatpush1.bf16.msra.mxu1 %v8140_v17  ;;  %v2826_v9 = vsel %vm2821_vm5, %v2814_v21, 0  ;;  %v6878_v17 = vsub.f32 %v2805_v47, %v2844_v42  ;;  %v22_v47 = vld [vmem:[%s7117_s0 + $0x3] ss:$0 sm:$0xff] }
 0x256   :  { %4579 = vmatprep.subr.bf16.mxu1 %v8141_v19  ;;  %v6880_v19 = vsub.f32 %v2809_v52, %v2848_v62  ;;  %v4806_v61 = vpack.c.bf16 %v2934_v50, %v2922_v49 }
 0x258   :  { %v4796_v59 = vpack.c.bf16 %v6880_v19, %v6878_v17 }
 0x259   :  { %4581 = vmatpush1.bf16.msra.mxu1 %v8142_v56  ;;  %v6882_v56 = vand.u32 4294901760, %v2826_v9 }
 0x25c   :  { %1898 = vmatmul.mubr.f32.vlgmr.msra.gmra.mrb[0].mxu1 %v6244_v22 }
 0x270   :  { %v4160_v14 = vpop.f32.mrb[10].mxu0 }
 0x271   :  { %v4161_v36 = vpop.f32.mrb[11].mxu0 }
 0x272   :  { %v4162_v53 = vadd.f32 %v4161_v36, %v4160_v14  ;;  %v2923_v14 = vsub.f32 %v6845_v30, %v2922_v49  ;;  %v2935_v36 = vsub.f32 %v6847_v6, %v2934_v50 }
 0x274   :  { %v2659_v25 = vadd.f32 %v4162_v53, %v2491_v55  ;;  %v6876_v55 = vpack.c.bf16 %v2848_v62, %v2844_v42  ;;  %v2928_v53 = vand.u32 4294901760, %v6857_v23 }
 0x276   :  { %4781 = vmatpush1.bf16.msra.mxu0 %v6876_v55 }
 0x277   :  { %2851 = vmatprep.subr.mxu0 %v6882_v56 }
 0x290   :  { %v4195_v51 = vpop.f32.mrb[12].mxu0 }
 0x291   :  { %v4196_v35 = vpop.f32.mrb[13].mxu0 }
 0x292   :  { %v4197_v31 = vadd.f32 %v4196_v35, %v4195_v51  ;;  %v6890_v51 = vand.u32 4294901760, %v6871_v40  ;;  %v2924_v35 = vand.u32 4294901760, %v2923_v14 }
 0x294   :  { %v2763_v27 = vadd.f32 %v4197_v31, %v2659_v25  ;;  %v2940_v25 = vand.u32 4294901760, %v6859_v57  ;;  %v2936_v31 = vand.u32 4294901760, %v2935_v36  ;;  %2853 = vmatpush1.msra.mxu0 %v6890_v51  ;;  %v2800_v36 = vld [vmem:[%s7119_s3 + $0x18] sm:$0xff] }
 0x296   :  { %v2770_v37 = vrot.slane %v2763_v27, 6  ;;  %v2929_v27 = vsub.f32 %v6857_v23, %v2928_v53  ;;  %v2941_v34 = vsub.f32 %v6859_v57, %v2940_v25  ;;  %v4808_v1 = vpack.c.bf16 %v2940_v25, %v2928_v53  ;;  %v2804_v53 = vld [vmem:[%s7119_s3 + $0x38] sm:$0xff]  ;;  %v2799_v25 = vld [vmem:[%s7119_s3 + $0x10] sm:$0xff] }
 0x297   :  { %v2969_v57 = vsub.f32 %v2826_v9, %v6882_v56 }
 0x299   :  { %v2970_v42 = vand.u32 4294901760, %v2969_v57 }
 0x32f   :  { %v1899_v0 = vpop.f32.mrb[0].mxu1 }
 0x330   :  { %v1901_v45 = vpop.f32.mrb[1].mxu1  ;;  %v4872_v22 = vadd.f32 %v1899_v0, %v608_v41  ;;  %v4782_v41 = vpack.c.bf16 %v2936_v31, %v2924_v35  ;;  %v2952_v0 = vand.u32 4294901760, %v6878_v17  ;;  %v2803_v35 = vld [vmem:[%s7119_s3 + $0x30] sm:$0xff]  ;;  %v3403_v31 = vand.u32 4294901760, %v2800_v36 }
 0x331   :  { %v4873_v18 = vadd.f32 %v1901_v45, %v612_v54  ;;  %v2946_v54 = vand.u32 4294901760, %v6861_v5  ;;  %v2964_v45 = vand.u32 4294901760, %v6880_v19 }
 0x332   :  { %4783 = vmatprep.subr.bf16.mxu0 %v4782_v41  ;;  %v6966_v41 = vsub.f32 %v2800_v36, %v3403_v31 }
 0x333   :  { %v2767_v28 = vrot.slane %v4873_v18, 7  ;;  %v2930_v18 = vand.u32 4294901760, %v2929_v27  ;;  %v4810_v33 = vpack.c.bf16 %v2958_v13, %v2946_v54  ;;  %v4812_v43 = vpack.c.bf16 %v2964_v45, %v2952_v0  ;;  %v2808_v27 = vld [vmem:[%s7119_s3 + $0x58] sm:$0xff] }
 0x335   :  { %v2773_v15 = vsel %vm2772_vm1, %v4872_v22, %v2767_v28  ;;  %v2942_v22 = vand.u32 4294901760, %v2941_v34  ;;  %v2947_v28 = vsub.f32 %v6861_v5, %v2946_v54  ;;  %v2812_v34 = vld [vmem:[%s7119_s3 + $0x78] sm:$0xff]  ;;  %v3407_v54 = vand.u32 4294901760, %v2804_v53 }
 0x336   :  { %v2775_v44 = vsel %vm2774_vm2, %v2773_v15, %v2770_v37  ;;  %v2959_v37 = vsub.f32 %v6866_v32, %v2958_v13  ;;  %v2953_v15 = vsub.f32 %v6878_v17, %v2952_v0  ;;  %v2975_v32 = vsub.f32 %v6871_v40, %v6890_v51 }
 0x337   :  { %v2779_v26 = vsel %vm2778_vm3, %v2775_v44, 0.0  ;;  %v2948_v7 = vand.u32 4294901760, %v2947_v28  ;;  %v2971_v17 = vsub.f32 %v2969_v57, %v2970_v42  ;;  %v3405_v13 = vand.u32 4294901760, %v2799_v25 }
 0x338   :  { %2780 = vadd.xlane.f32.xlu0 %v2779_v26  ;;  %v4784_v26 = vpack.c.bf16 %v2942_v22, %v2930_v18  ;;  %v2960_v39 = vand.u32 4294901760, %v2959_v37  ;;  %v2976_v49 = vand.u32 4294901760, %v2975_v32  ;;  %v3409_v0 = vand.u32 4294901760, %v2803_v35  ;;  %v2807_v37 = vld [vmem:[%s7119_s3 + $0x50] sm:$0xff] }
 0x339   :  { %v2972_v14 = vand.u32 4294901760, %v2971_v17  ;;  %v6972_v18 = vsub.f32 %v2799_v25, %v3405_v13  ;;  %v3411_v22 = vand.u32 4294901760, %v2808_v27  ;;  %v3415_v28 = vand.u32 4294901760, %v2812_v34 }
 0x33a   :  { %v2977_v9 = vsub.f32 %v2975_v32, %v2976_v49 }
 0x33c   :  { %v2978_v40 = vand.u32 4294901760, %v2977_v9 }
 0x3c5   :  { %v2781_v46 = vpop.xlane.xlu0 %2780 }
 0x3c6   :  { %v2782_v3 = vmul.f32 0.027777778, %v2781_v46  ;;  %v2954_v46 = vand.u32 4294901760, %v2953_v15  ;;  %v2811_v15 = vld [vmem:[%s7119_s3 + $0x70] sm:$0xff] }
 0x3c8   :  { %v2784_v4 = vsub.f32 %v2775_v44, %v2782_v3  ;;  %v2965_v44 = vsub.f32 %v6880_v19, %v2964_v45  ;;  %v8146_v19 = vmov 0.0   ;;  %v6970_v45 = vsub.f32 %v2804_v53, %v3407_v54 }
 0x3ca   :  { %v6815_v48 = vsel %vm2783_vm4, %v2784_v4, 0.0  ;;  %v2966_v3 = vand.u32 4294901760, %v2965_v44  ;;  %v4786_v4 = vpack.c.bf16 %v2960_v39, %v2948_v7  ;;  %v6982_v44 = vsub.f32 %v2803_v35, %v3409_v0  ;;  %v2816_v7 = vld [vmem:[%s7119_s3 + $0x98] sm:$0xf] }
 0x3cb   :  { %v2786_v2 = vmul.f32 %v6815_v48, %v6815_v48  ;;  %v3413_v39 = vand.u32 4294901760, %v2807_v37 }
 0x3cd   :  { %v2787_v11 = vsel %vm2778_vm3, %v2786_v2, 0.0  ;;  %v4788_v2 = vpack.c.bf16 %v2966_v3, %v2954_v46  ;;  %v3417_v46 = vand.u32 4294901760, %v2811_v15  ;;  %v3491_v3 = vand.u32 4294901760, %v6966_v41 }
 0x3ce   :  { %2788 = vadd.xlane.f32.xlu0 %v2787_v11  ;;  %v4790_v11 = vpack.c.bf16 %v6847_v6, %v6845_v30  ;;  %v23_v30 = vld [vmem:[%s7117_s0 + $0x4] ss:$0 sm:$0xff] }
 0x45b   :  { %v2789_v10 = vpop.xlane.xlu0 %2788 }
 0x45c   :  { %v2790_v60 = vmul.f32 0.027777778, %v2789_v10 }
 0x45e   :  { %v2791_v58 = vadd.f32 1e-05, %v2790_v60 }
 0x460   :  { %4915 = vrsqrt.f32 %v2791_v58 }
 0x46a   :  { %v4916_v12 = vpop.eup %4915 }
 0x46b   :  { %v2793_v52 = vmul.f32 %v4916_v12, %v6815_v48 }
 0x46d   :  { %v2794_v6 = vmul.f32 %v2793_v52, %v22_v47 }
 0x46f   :  { %v2795_v16 = vadd.f32 %v2794_v6, %v23_v30 }
 0x471   :  { %v2796_v21 = vmul.f32 0.25, %v2795_v16  ;;  %v7044_v16 = vpack.c.bf16 %v3417_v46, %v3413_v39 }
 0x473   :  { %v2819_v24 = vsel %vm2817_vm6, %v2796_v21, 0 }
 0x474   :  { %v6919_v23 = vand.u32 4294901760, %v2819_v24 }
 0x476   :  { %v6923_v5 = vsub.f32 %v2819_v24, %v6919_v23 }
 0x478   :  { %v6928_v48 = vand.u32 4294901760, %v6923_v5 }
 0x47a   :  { %v2912_v62 = vsub.f32 %v6923_v5, %v6928_v48 }
 0x47c   :  { %v6932_v50 = vand.u32 4294901760, %v2912_v62 }
 0x47e   :  { %2914 = vmatmul.mubr.f32.vlgmr.msra.gmra.mrb[14].mxu0 %v6932_v50 }
 0x47f   :  { %4785 = vmatpush1.bf16.msra.mxu0 %v4784_v26  ;;  %3034 = vmatprep.mubr.f32.mxu0 %v8146_v19  ;;  %v6987_v26 = vsub.f32 %v2812_v34, %v3415_v28 }
 0x480   :  { %4787 = vmatprep.subr.bf16.mxu0 %v4786_v4  ;;  %v3497_v4 = vand.u32 4294901760, %v6972_v18 }
 0x482   :  { %v3498_v58 = vsub.f32 %v6972_v18, %v3497_v4 }
 0x483   :  { %4789 = vmatpush1.bf16.msra.mxu0 %v4788_v2  ;;  %v6996_v2 = vsub.f32 %v2807_v37, %v3413_v39  ;;  %v4840_v37 = vpack.c.bf16 %v6982_v44, %v6972_v18 }
 0x484   :  { %2973 = vmatprep.subr.mxu0 %v2972_v14 }
 0x485   :  { %v3521_v47 = vand.u32 4294901760, %v6996_v2 }
 0x487   :  { %2979 = vmatpush1.msra.mxu0 %v2978_v40 }
 0x488   :  { %3036 = vmatmul.mubr.f32.vlgmr.msra.gmra.mrb[14].mxu0 %v6919_v23  ;;  %4791 = vmatprep.subr.bf16.mxu0 %v4790_v11  ;;  %v2832_v11 = vsel %vm2821_vm5, %v2816_v7, 0 }
 0x489   :  { %4793 = vmatpush1.bf16.msra.mxu0 %v4792_v8  ;;  %3126 = vmatprep.mubr.f32.mxu0 %v8146_v19  ;;  %v2815_v8 = vld [vmem:[%s7119_s3 + $0x90] sm:$0xf]  ;;  %v7017_v10 = vand.u32 4294901760, %v2832_v11 }
 0x48a   :  { %4795 = vmatprep.subr.bf16.mxu0 %v4794_v20  ;;  %v3509_v20 = vand.u32 4294901760, %v6982_v44  ;;  %v2829_v60 = vsel %vm2821_vm5, %v2815_v8, 0 }
 0x48b   :  { %v7041_v6 = vsub.f32 %v2832_v11, %v7017_v10  ;;  %v7046_v21 = vand.u32 4294901760, %v2829_v60 }
 0x48c   :  { %v3510_v12 = vsub.f32 %v6982_v44, %v3509_v20 }
 0x48d   :  { %4797 = vmatpush1.bf16.msra.mxu0 %v4796_v59  ;;  %v7006_v59 = vpack.c.bf16 %v3407_v54, %v3403_v31  ;;  %v3539_v40 = vand.u32 4294901760, %v7041_v6 }
 0x48e   :  { %3068 = vmatprep.subr.mxu0 %v2969_v57  ;;  %v3511_v62 = vand.u32 4294901760, %v3510_v12 }
 0x48f   :  { %v3540_v34 = vsub.f32 %v7041_v6, %v3539_v40 }
 0x491   :  { %3071 = vmatpush1.msra.mxu0 %v2975_v32  ;;  %v3499_v32 = vand.u32 4294901760, %v3498_v58 }
 0x492   :  { %3129 = vmatmul.mubr.f32.vlgmr.msra.gmra.mrb[14].mxu0 %v6923_v5  ;;  %4799 = vmatprep.subr.bf16.mxu0 %v6843_v63 }
 0x493   :  { %4801 = vmatpush1.bf16.msra.mxu0 %v6855_v29  ;;  %3209 = vmatprep.mubr.f32.mxu0 %v8146_v19  ;;  %v4832_v53 = vpack.c.bf16 %v3511_v62, %v3499_v32 }
 0x494   :  { %4803 = vmatprep.subr.bf16.mxu0 %v6864_v38 }
 0x497   :  { %4805 = vmatpush1.bf16.msra.mxu0 %v6876_v55 }
 0x498   :  { %3152 = vmatprep.subr.mxu0 %v6882_v56 }
 0x49b   :  { %3154 = vmatpush1.msra.mxu0 %v6890_v51 }
 0x49c   :  { %3213 = vmatmul.mubr.f32.vlgmr.msra.gmra.mrb[14].mxu0 %v6928_v48  ;;  %4807 = vmatprep.subr.bf16.mxu0 %v4806_v61 }
 0x49d   :  { %4809 = vmatpush1.bf16.msra.mxu0 %v4808_v1  ;;  %3313 = vmatprep.mubr.f32.mxu0 %v8146_v19  ;;  %v7010_v1 = vpack.c.bf16 %v3409_v0, %v3405_v13  ;;  %v3541_v0 = vand.u32 4294901760, %v3540_v34 }
 0x49e   :  { %4811 = vmatprep.subr.bf16.mxu0 %v4810_v33  ;;  %v7012_v33 = vpack.c.bf16 %v3415_v28, %v3411_v22  ;;  %v4838_v28 = vpack.c.bf16 %v6970_v45, %v6966_v41 }
 0x4a1   :  { %4813 = vmatpush1.bf16.msra.mxu0 %v4812_v43  ;;  %v3492_v43 = vsub.f32 %v6966_v41, %v3491_v3 }
 0x4a2   :  { %3254 = vmatprep.subr.mxu0 %v2970_v42  ;;  %v3544_v42 = vsub.f32 %v2829_v60, %v7046_v21 }
 0x4a3   :  { %v3493_v24 = vand.u32 4294901760, %v3492_v43 }
 0x4a4   :  { %v3545_v31 = vand.u32 4294901760, %v3544_v42 }
 0x4a5   :  { %3258 = vmatpush1.msra.mxu0 %v2976_v49  ;;  %v3522_v49 = vsub.f32 %v6996_v2, %v3521_v47 }
 0x4a6   :  { %3315 = vmatmul.mubr.f32.vlgmr.msra.gmra.mrb[14].mxu0 %v6919_v23  ;;  %4815 = vmatprep.subr.bf16.mxu0 %v6843_v63  ;;  %v6985_v63 = vsub.f32 %v2808_v27, %v3411_v22  ;;  %v3546_v13 = vsub.f32 %v3544_v42, %v3545_v31 }
 0x4a7   :  { %4817 = vmatpush1.bf16.msra.mxu0 %v6855_v29  ;;  %3395 = vmatprep.mubr.f32.mxu0 %v8146_v19  ;;  %v3503_v29 = vand.u32 4294901760, %v6970_v45  ;;  %v3523_v25 = vand.u32 4294901760, %v3522_v49 }
 0x4a8   :  { %4819 = vmatprep.subr.bf16.mxu0 %v6864_v38  ;;  %v6998_v38 = vsub.f32 %v2811_v15, %v3417_v46  ;;  %v3515_v61 = vand.u32 4294901760, %v6985_v63  ;;  %v3547_v22 = vand.u32 4294901760, %v3546_v13 }
 0x4a9   :  { %v4854_v7 = vpack.c.bf16 %v3503_v29, %v3491_v3 }
 0x4aa   :  { %v3533_v52 = vand.u32 4294901760, %v6998_v38  ;;  %v3516_v30 = vsub.f32 %v6985_v63, %v3515_v61  ;;  %v4844_v15 = vpack.c.bf16 %v6998_v38, %v6996_v2 }
 0x4ab   :  { %4821 = vmatpush1.bf16.msra.mxu0 %v6876_v55  ;;  %v3527_v55 = vand.u32 4294901760, %v6987_v26 }
 0x4ac   :  { %3338 = vmatprep.subr.mxu0 %v6882_v56  ;;  %v3504_v56 = vsub.f32 %v6970_v45, %v3503_v29  ;;  %v3534_v17 = vsub.f32 %v6998_v38, %v3533_v52  ;;  %v3517_v9 = vand.u32 4294901760, %v3516_v30  ;;  %v4860_v41 = vpack.c.bf16 %v3533_v52, %v3521_v47 }
 0x4ad   :  { %v4858_v39 = vpack.c.bf16 %v3527_v55, %v3515_v61 }
 0x4ae   :  { %v3505_v57 = vand.u32 4294901760, %v3504_v56  ;;  %v3535_v35 = vand.u32 4294901760, %v3534_v17 }
 0x4af   :  { %3340 = vmatpush1.msra.mxu0 %v6890_v51  ;;  %v3528_v51 = vsub.f32 %v6987_v26, %v3527_v55 }
 0x4b0   :  { %3397 = vmatmul.mubr.f32.vlgmr.msra.gmra.mrb[14].mxu0 %v6919_v23  ;;  %4823 = vmatprep.subr.bf16.mxu0 %v7006_v59  ;;  %v4830_v36 = vpack.c.bf16 %v3505_v57, %v3493_v24  ;;  %v4836_v54 = vpack.c.bf16 %v3535_v35, %v3523_v25 }
 0x4b1   :  { %4825 = vmatpush1.bf16.msra.mxu0 %v7010_v1  ;;  %3477 = vmatprep.mubr.f32.mxu0 %v8146_v19  ;;  %v3529_v14 = vand.u32 4294901760, %v3528_v51 }
 0x4b2   :  { %4827 = vmatprep.subr.bf16.mxu0 %v7012_v33 }
 0x4b3   :  { %v4834_v27 = vpack.c.bf16 %v3529_v14, %v3517_v9 }
 0x4b5   :  { %4829 = vmatpush1.bf16.msra.mxu0 %v7044_v16 }
 0x4b6   :  { %3420 = vmatprep.subr.mxu0 %v7017_v10 }
 0x4b9   :  { %3422 = vmatpush1.msra.mxu0 %v7046_v21 }
 0x4ba   :  { %3483 = vmatmul.mubr.f32.vlgmr.msra.gmra.mrb[16].mxu0 %v6932_v50  ;;  %4831 = vmatprep.subr.bf16.mxu0 %v4830_v36  ;;  %v4842_v50 = vpack.c.bf16 %v6987_v26, %v6985_v63 }
 0x4bb   :  { %4833 = vmatpush1.bf16.msra.mxu0 %v4832_v53  ;;  %3603 = vmatprep.mubr.f32.mxu0 %v8146_v19 }
 0x4bc   :  { %4835 = vmatprep.subr.bf16.mxu0 %v4834_v27 }
 0x4bf   :  { %4837 = vmatpush1.bf16.msra.mxu0 %v4836_v54 }
 0x4c0   :  { %3542 = vmatprep.subr.mxu0 %v3541_v0 }
 0x4c3   :  { %3548 = vmatpush1.msra.mxu0 %v3547_v22 }
 0x4c4   :  { %3605 = vmatmul.mubr.f32.vlgmr.msra.gmra.mrb[16].mxu0 %v6919_v23  ;;  %4839 = vmatprep.subr.bf16.mxu0 %v4838_v28 }
 0x4c5   :  { %4841 = vmatpush1.bf16.msra.mxu0 %v4840_v37  ;;  %3695 = vmatprep.mubr.f32.mxu0 %v8146_v19 }
 0x4c6   :  { %4843 = vmatprep.subr.bf16.mxu0 %v4842_v50 }
 0x4c9   :  { %4845 = vmatpush1.bf16.msra.mxu0 %v4844_v15 }
 0x4ca   :  { %3637 = vmatprep.subr.mxu0 %v7041_v6 }
 0x4cd   :  { %3640 = vmatpush1.msra.mxu0 %v3544_v42 }
 0x4ce   :  { %3698 = vmatmul.mubr.f32.vlgmr.msra.gmra.mrb[16].mxu0 %v6923_v5  ;;  %4847 = vmatprep.subr.bf16.mxu0 %v7006_v59  ;;  %v4856_v5 = vpack.c.bf16 %v3509_v20, %v3497_v4 }
 0x4cf   :  { %4849 = vmatpush1.bf16.msra.mxu0 %v7010_v1  ;;  %3778 = vmatprep.mubr.f32.mxu0 %v8146_v19 }
 0x4d0   :  { %4851 = vmatprep.subr.bf16.mxu0 %v7012_v33 }
 0x4d3   :  { %4853 = vmatpush1.bf16.msra.mxu0 %v7044_v16 }
 0x4d4   :  { %3721 = vmatprep.subr.mxu0 %v7017_v10 }
 0x4d7   :  { %3723 = vmatpush1.msra.mxu0 %v7046_v21 }
 0x4d8   :  { %3782 = vmatmul.mubr.f32.vlgmr.msra.gmra.mrb[16].mxu0 %v6928_v48  ;;  %4855 = vmatprep.subr.bf16.mxu0 %v4854_v7 }
 0x4d9   :  { %4857 = vmatpush1.bf16.msra.mxu0 %v4856_v5  ;;  %3882 = vmatprep.mubr.f32.mxu0 %v8146_v19 }
 0x4da   :  { %4859 = vmatprep.subr.bf16.mxu0 %v4858_v39 }
 0x4dd   :  { %4861 = vmatpush1.bf16.msra.mxu0 %v4860_v41 }
 0x4de   :  { %3823 = vmatprep.subr.mxu0 %v3539_v40 }
 0x4e1   :  { %3827 = vmatpush1.msra.mxu0 %v3545_v31 }
 0x4e2   :  { %3884 = vmatmul.mubr.f32.vlgmr.msra.gmra.mrb[16].mxu0 %v6919_v23  ;;  %4863 = vmatprep.subr.bf16.mxu0 %v7006_v59 }
 0x4e3   :  { %4865 = vmatpush1.bf16.msra.mxu0 %v7010_v1  ;;  %3964 = vmatprep.mubr.f32.mxu0 %v8146_v19 }
 0x4e4   :  { %4867 = vmatprep.subr.bf16.mxu0 %v7012_v33 }
 0x4e7   :  { %4869 = vmatpush1.bf16.msra.mxu0 %v7044_v16 }
 0x4e8   :  { %3907 = vmatprep.subr.mxu0 %v7017_v10 }
 0x4eb   :  { %3909 = vmatpush1.msra.mxu0 %v7046_v21 }
 0x4ec   :  { %3966 = vmatmul.mubr.f32.vlgmr.msra.gmra.mrb[16].mxu0 %v6919_v23 }
 0x583   :  { %v3398_v48 = vpop.f32.mrb[14].mxu0 }
 0x584   :  { %v3400_v45 = vpop.f32.mrb[15].mxu0 }
 0x585   :  { %v3976_v18 = vcombine.low %v3398_v48, %v3400_v45 }
 0x587   :  { %3980 = vst [vmem:[%s7120_s4] sm:$0x77] %v3976_v18 }
 0x5bf   :  { %v3967_v44 = vpop.f32.mrb[16].mxu0 }
 0x5c0   :  { %v3969_v63 = vpop.f32.mrb[17].mxu0 }
 0x5c1   :  { %v3977_v19 = vcombine.low %v3967_v44, %v3969_v63 }
 0x5c3   :  { %3981 = vst [vmem:[%s7120_s4 + $0x8] sm:$0x77] %v3977_v19 }

</bundles_post_ra>
